<compile_context>
chip_gen: v7x
topology: tpu7x:2x2x1
jax: 0.10.0
libtpu: 0.0.40
codegen_flags: <defaults>
</compile_context>

<pallas_src>
import functools

import jax
import jax.numpy as jnp
from jax.experimental import pallas as pl
from jax.experimental.pallas import tpu as pltpu

_HIGH = jax.lax.Precision.HIGHEST


def _round_up(x, m):
    return (x + m - 1) // m * m


def _vmem_capacity_bytes():
    """Per-core VMEM capacity; conservative (v7x-sized) fallback."""
    try:
        return int(pltpu.get_tpu_info().vmem_capacity_bytes)
    except Exception:
        return 64 * 1024 * 1024


# --------------------------- fused per-layer kernel ---------------------------
def _bigru_layer_kernel(gif_ref, gib_ref, len_ref,
                        whhf_ref, whhb_ref, bhnf_ref, bhnb_ref,
                        outf_ref, outb_ref, hf_last_ref, hb_last_ref,
                        hf_s, hb_s, *, tc, hidden, batch, unroll):
    c = pl.program_id(0)
    total_t = pl.num_programs(0) * tc            # padded sequence length

    @pl.when(c == 0)
    def _():
        # hidden_state=None in the PyTorch forward -> zero initial hidden
        hf_s[...] = jnp.zeros_like(hf_s)
        hb_s[...] = jnp.zeros_like(hb_s)

    H = hidden
    # Loop invariants hoisted out of the time loop (JAX does not CSE the
    # broadcast, so materialize the (B,H) bias once, not once per step).
    lens = len_ref[...]                          # (B, 1) int32, resident
    bhnf = jnp.broadcast_to(bhnf_ref[...], (batch, H))
    bhnb = jnp.broadcast_to(bhnb_ref[...], (batch, H))
    t0 = c * tc

    def gru_gates(gi, gh, bhn, h):
        r = jax.nn.sigmoid(gi[:, :H] + gh[:, :H])
        z = jax.nn.sigmoid(gi[:, H:2 * H] + gh[:, H:2 * H])
        n = jnp.tanh(gi[:, 2 * H:] + r * (gh[:, 2 * H:] + bhn))
        return n + z * (h - n)                   # == (1 - z) * n + z * h

    def body(i, carry):
        # ---- forward direction: global time t_f = c*tc + i ----
        t_f = t0 + i
        hf = hf_s[...]
        gh = jnp.dot(hf.astype(jnp.bfloat16), whhf_ref[...],
                     preferred_element_type=jnp.float32)
        h_new = gru_gates(gif_ref[i], gh, bhnf, hf)
        m = (lens > t_f).astype(jnp.float32)     # (B,1) validity (t < len)
        hf_s[...] = hf + m * (h_new - hf)        # freeze hidden past length
        outf_ref[i] = m * h_new                  # zero output on padding

        # ---- backward direction: global time total_t-1-t_f, local tc-1-i ----
        j = tc - 1 - i
        t_b = total_t - 1 - t_f
        hb = hb_s[...]
        ghb = jnp.dot(hb.astype(jnp.bfloat16), whhb_ref[...],
                      preferred_element_type=jnp.float32)
        hb_new = gru_gates(gib_ref[j], ghb, bhnb, hb)
        mb = (lens > t_b).astype(jnp.float32)
        hb_s[...] = hb + mb * (hb_new - hb)
        outb_ref[j] = mb * hb_new
        return carry

    jax.lax.fori_loop(0, tc, body, 0, unroll=unroll)

    hf_last_ref[...] = hf_s[...]
    hb_last_ref[...] = hb_s[...]


def _pick_chunk(T, Bp, Hp, capacity):
    """Chunk length / count: ~20% of VMEM for the double-buffered streams.

    tc is NOT forced to divide T; the caller pads T up to nc*tc (padded
    timesteps are masked out by the length check in-kernel).
    """
    f32, bf16 = 4, 2
    resident = (2 * 2 * Hp * 3 * Hp * bf16     # W_hh fwd/bwd, double-buffered
                + 4 * Hp * f32 * 2             # n-gate biases
                + 8 * Bp * Hp * f32)           # scratch + final-hidden buffers
    budget = max(capacity // 5 - resident, 2 * 1024 * 1024)
    per_step = 2 * (2 * Bp * 3 * Hp + 2 * Bp * Hp) * f32   # dbl-buffered gi + out
    tc_max = max(1, min(T, 128, budget // max(per_step, 1)))
    nc = -(-T // tc_max)          # ceil
    tc = -(-T // nc)              # smallest tc giving nc chunks (minimal padding)
    return tc, nc, nc * tc


def _bigru_layer(gi_f, gi_b, lengths, w_hh_f, w_hh_b, b_hh_f, b_hh_b):
    """Fused fwd+bwd recurrence of one bidirectional GRU layer.

    gi_f / gi_b: (T, B, 3H) precomputed input projections (b_ih and the r/z
      part of b_hh already folded in), stored in natural time order.
    lengths: (B,) int32 valid lengths.
    Returns out_f, out_b: (T, B, H); h_f, h_b: (B, H).
    """
    T, B, G = gi_f.shape
    H = G // 3

    # Pad batch to sublane (8) and hidden to lane (128) granularity so blocks
    # are (8,128)-aligned and stores are unmasked.  Padded batch rows have
    # length 0; padded hidden columns provably stay exactly 0 through the GRU
    # update with zero-padded weights/biases.
    Bp = _round_up(B, 8)
    Hp = _round_up(H, 128)

    capacity = _vmem_capacity_bytes()
    tc, nc, Tp = _pick_chunk(T, Bp, Hp, capacity)

    def pad_gi(gi):
        gi = gi.reshape(T, B, 3, H)
        gi = jnp.pad(gi, ((0, Tp - T), (0, Bp - B), (0, 0), (0, Hp - H)))
        return gi.reshape(Tp, Bp, 3 * Hp)

    def pad_whh(w):                              # torch (3H, H) -> (Hp, 3Hp) for x @ W
        wt = w.T.reshape(H, 3, H)
        wt = jnp.pad(wt, ((0, Hp - H), (0, 0), (0, Hp - H)))
        return wt.reshape(Hp, 3 * Hp).astype(jnp.bfloat16)   # bf16 storage

    gif_p = pad_gi(gi_f)
    gib_p = pad_gi(gi_b)
    lens_p = jnp.pad(lengths.astype(jnp.int32), (0, Bp - B)).reshape(Bp, 1)
    whhf_p = pad_whh(w_hh_f)
    whhb_p = pad_whh(w_hh_b)
    bhnf = jnp.pad(b_hh_f[2 * H:], (0, Hp - H)).reshape(1, Hp)
    bhnb = jnp.pad(b_hh_b[2 * H:], (0, Hp - H)).reshape(1, Hp)

    unroll = max(1, min(tc, 8 if Hp <= 256 else 2))
    kernel = functools.partial(_bigru_layer_kernel, tc=tc, hidden=Hp,
                               batch=Bp, unroll=unroll)

    fwd_t = lambda c: (c, 0, 0)
    bwd_t = lambda c: (nc - 1 - c, 0, 0)
    const2 = lambda c: (0, 0)

    # Explicit VMEM budget, counting the x2 double-buffer factor on every
    # pipelined operand, with headroom; never below the 32 MiB scoped default
    # and capped at ~80% of physical VMEM (leaves compiler scratch headroom,
    # especially on v7x's 64 MiB parts; actually uses v5e/v6e's 128 MiB).
    f32, bf16 = 4, 2
    need = (2 * 2 * tc * Bp * 3 * Hp * f32     # gi fwd/bwd streams
            + 2 * 2 * tc * Bp * Hp * f32       # out fwd/bwd streams
            + 2 * 2 * Hp * 3 * Hp * bf16       # W_hh fwd/bwd (bf16)
            + 2 * 2 * Hp * f32                 # n-gate biases
            + 2 * Bp * 4                       # lengths
            + 2 * 2 * Bp * Hp * f32            # final hiddens
            + 2 * Bp * Hp * f32)               # hidden-state scratch
    cap = max(int(capacity * 0.8), 40 * 1024 * 1024)
    vmem_limit = int(min(max(int(need * 1.25) + (4 << 20),
                             32 * 1024 * 1024), cap))

    out_f, out_b, h_f, h_b = pl.pallas_call(
        kernel,
        out_shape=(jax.ShapeDtypeStruct((Tp, Bp, Hp), jnp.float32),
                   jax.ShapeDtypeStruct((Tp, Bp, Hp), jnp.float32),
                   jax.ShapeDtypeStruct((Bp, Hp), jnp.float32),
                   jax.ShapeDtypeStruct((Bp, Hp), jnp.float32)),
        grid_spec=pltpu.PrefetchScalarGridSpec(
            num_scalar_prefetch=0,
            grid=(nc,),
            in_specs=[
                pl.BlockSpec((tc, Bp, 3 * Hp), fwd_t),     # gi fwd chunk
                pl.BlockSpec((tc, Bp, 3 * Hp), bwd_t),     # gi bwd chunk (reversed sweep)
                pl.BlockSpec((Bp, 1), const2),             # lengths (mask built in-kernel)
                pl.BlockSpec((Hp, 3 * Hp), const2),        # W_hh fwd (x @ W layout, bf16)
                pl.BlockSpec((Hp, 3 * Hp), const2),        # W_hh bwd (bf16)
                pl.BlockSpec((1, Hp), const2),             # b_hh n-gate fwd
                pl.BlockSpec((1, Hp), const2),             # b_hh n-gate bwd
            ],
            out_specs=[
                pl.BlockSpec((tc, Bp, Hp), fwd_t),         # out fwd
                pl.BlockSpec((tc, Bp, Hp), bwd_t),         # out bwd
                pl.BlockSpec((Bp, Hp), const2),            # final hidden fwd
                pl.BlockSpec((Bp, Hp), const2),            # final hidden bwd
            ],
            scratch_shapes=[pltpu.VMEM((Bp, Hp), jnp.float32),
                            pltpu.VMEM((Bp, Hp), jnp.float32)],
        ),
        compiler_params=pltpu.CompilerParams(
            dimension_semantics=("arbitrary",),            # time recurrence
            vmem_limit_bytes=vmem_limit),
    )(gif_p, gib_p, lens_p, whhf_p, whhb_p, bhnf, bhnb)

    return (out_f[:T, :B, :H], out_b[:T, :B, :H],
            h_f[:B, :H], h_b[:B, :H])


# --------------------------- input projection (XLA) ---------------------------
def _input_proj(x_parts, w_ih, b_ih, b_hh, H):
    """gi = x @ W_ih^T + b_ih + [b_hh_r, b_hh_z, 0], all timesteps at once.

    One big (T*B, D_in) x (D_in, 3H) matmul per direction, hoisted out of the
    serial recurrence.  DEFAULT matmul precision (bf16 MXU passes, f32
    accumulate) per the performance review.  x_parts is a tuple of (T, B, Hi)
    slabs whose concat along the last dim is the layer input; splitting W_ih
    accordingly avoids materializing the concat in HBM between layers.
    """
    gi = None
    d0 = 0
    for xp in x_parts:
        d = xp.shape[-1]
        contrib = jnp.einsum('tbd,gd->tbg', xp, w_ih[:, d0:d0 + d])
        gi = contrib if gi is None else gi + contrib
        d0 += d
    bias = b_ih + jnp.concatenate([b_hh[:2 * H], jnp.zeros((H,), b_hh.dtype)])
    return gi + bias[None, None, :]


# ------------------------------ encoder forward --------------------------------
def bigru_encoder_forward(params, tokens, lengths, *, n_layers, hidden_dim):
    """Matches BiGruEncoder.forward(input, input_length, hidden_state=None)."""
    T, B = tokens.shape
    H = hidden_dim

    # embedding lookup (glue, plain JAX gather)
    emb = jnp.take(params["embedding"], tokens, axis=0)               # (T, B, H)
    lengths = lengths.astype(jnp.int32)

    x_parts = (emb,)
    hiddens = []
    out_f = out_b = None
    for l in range(n_layers):
        gi_f = _input_proj(x_parts, params[f"w_ih_l{l}"],
                           params[f"b_ih_l{l}"], params[f"b_hh_l{l}"], H)
        gi_b = _input_proj(x_parts, params[f"w_ih_l{l}_rev"],
                           params[f"b_ih_l{l}_rev"], params[f"b_hh_l{l}_rev"], H)
        out_f, out_b, h_f, h_b = _bigru_layer(
            gi_f, gi_b, lengths,
            params[f"w_hh_l{l}"], params[f"w_hh_l{l}_rev"],
            params[f"b_hh_l{l}"], params[f"b_hh_l{l}_rev"])
        hiddens.extend([h_f, h_b])
        x_parts = (out_f, out_b)        # next layer input, concat avoided

    output = out_f + out_b               # output[:, :, :H] + output[:, :, H:]
    hidden = jnp.stack(hiddens, axis=0)  # (2*n_layers, B, H)
    return output, hidden


# ----------------------------- pure-JAX reference ------------------------------
def _ref_gru_direction(x, lengths, w_ih, w_hh, b_ih, b_hh, reverse):
    T, B, _ = x.shape
    H = w_hh.shape[1]
    h = jnp.zeros((B, H), jnp.float32)
    outs = [None] * T
    order = range(T - 1, -1, -1) if reverse else range(T)
    for t in order:
        # Input projection at DEFAULT precision (same choice as the kernel
        # path); the recurrence matmul is kept at HIGHEST as a tighter check.
        gi = jnp.dot(x[t], w_ih.T) + b_ih
        gh = jnp.dot(h, w_hh.T, precision=_HIGH) + b_hh
        r = jax.nn.sigmoid(gi[:, :H] + gh[:, :H])
        z = jax.nn.sigmoid(gi[:, H:2 * H] + gh[:, H:2 * H])
        n = jnp.tanh(gi[:, 2 * H:] + r * gh[:, 2 * H:])
        h_new = (1.0 - z) * n + z * h
        valid = (t < lengths)[:, None]
        h = jnp.where(valid, h_new, h)
        outs[t] = jnp.where(valid, h_new, 0.0)
    return jnp.stack(outs, axis=0), h


def _ref_forward(params, tokens, lengths, *, n_layers, hidden_dim):
    x = jnp.take(params["embedding"], tokens, axis=0)
    hiddens = []
    out_f = out_b = None
    for l in range(n_layers):
        out_f, h_f = _ref_gru_direction(
            x, lengths, params[f"w_ih_l{l}"], params[f"w_hh_l{l}"],
            params[f"b_ih_l{l}"], params[f"b_hh_l{l}"], False)
        out_b, h_b = _ref_gru_direction(
            x, lengths, params[f"w_ih_l{l}_rev"], params[f"w_hh_l{l}_rev"],
            params[f"b_ih_l{l}_rev"], params[f"b_hh_l{l}_rev"], True)
        hiddens.extend([h_f, h_b])
        x = jnp.concatenate([out_f, out_b], axis=-1)
    return out_f + out_b, jnp.stack(hiddens, axis=0)


# ------------------------------- param init ------------------------------------
def init_params(key, vocab_size, hidden_dim, n_layers):
    params = {}
    k_emb, key = jax.random.split(key)
    params["embedding"] = jax.random.normal(
        k_emb, (vocab_size, hidden_dim), jnp.float32)
    bound = 1.0 / jnp.sqrt(hidden_dim)              # PyTorch nn.GRU default init
    for l in range(n_layers):
        d_in = hidden_dim if l == 0 else 2 * hidden_dim
        for suffix in ("", "_rev"):
            ks = jax.random.split(key, 5)
            key = ks[0]
            u = lambda k, shape: jax.random.uniform(
                k, shape, jnp.float32, -bound, bound)
            params[f"w_ih_l{l}{suffix}"] = u(ks[1], (3 * hidden_dim, d_in))
            params[f"w_hh_l{l}{suffix}"] = u(ks[2], (3 * hidden_dim, hidden_dim))
            params[f"b_ih_l{l}{suffix}"] = u(ks[3], (3 * hidden_dim,))
            params[f"b_hh_l{l}{suffix}"] = u(ks[4], (3 * hidden_dim,))
    return params


if __name__ == "__main__":
    T, B, H = 8, 2, 32
    VOCAB, N_LAYERS = 50, 2

    key = jax.random.PRNGKey(0)
    k_par, k_tok = jax.random.split(key)
    params = init_params(k_par, VOCAB, H, N_LAYERS)

    tokens = jax.random.randint(k_tok, (T, B), 0, VOCAB, dtype=jnp.int32)
    # pack_padded_sequence default requires sorted-descending lengths
    lengths = jnp.array([8, 5], dtype=jnp.int32)

    fwd = jax.jit(functools.partial(bigru_encoder_forward,
                                    n_layers=N_LAYERS, hidden_dim=H))
    out, hid = fwd(params, tokens, lengths)
    out = jax.block_until_ready(out)
    hid = jax.block_until_ready(hid)

    ref_out, ref_hid = _ref_forward(params, tokens, lengths,
                                    n_layers=N_LAYERS, hidden_dim=H)

    assert out.shape == (T, B, H) and hid.shape == (2 * N_LAYERS, B, H)
    # Tolerance reflects the intentional DEFAULT-precision projection and the
    # bf16 recurrence weights (review-recommended precision trade-off).
    assert jnp.allclose(out, ref_out, rtol=1e-2, atol=1e-2)
    assert jnp.allclose(hid, ref_hid, rtol=1e-2, atol=1e-2)
    print("KERNEL_OK")
</pallas_src>

<mosaic_0001>
module attributes {stable_mosaic.version = 11 : i64} {
  func.func @_bigru_layer_kernel(%arg0: i32, %arg1: memref<8x8x384xf32, #tpu.memory_space<vmem>>, %arg2: memref<8x8x384xf32, #tpu.memory_space<vmem>>, %arg3: memref<8x1xi32, #tpu.memory_space<vmem>>, %arg4: memref<128x384xbf16, #tpu.memory_space<vmem>>, %arg5: memref<128x384xbf16, #tpu.memory_space<vmem>>, %arg6: memref<1x128xf32, #tpu.memory_space<vmem>>, %arg7: memref<1x128xf32, #tpu.memory_space<vmem>>, %arg8: memref<8x8x128xf32, #tpu.memory_space<vmem>>, %arg9: memref<8x8x128xf32, #tpu.memory_space<vmem>>, %arg10: memref<8x128xf32, #tpu.memory_space<vmem>>, %arg11: memref<8x128xf32, #tpu.memory_space<vmem>>, %arg12: memref<8x128xf32, #tpu.memory_space<vmem>>, %arg13: memref<8x128xf32, #tpu.memory_space<vmem>>) attributes {dimension_semantics = [#tpu.dimension_semantics<arbitrary>], iteration_bounds = array<i64: 1>, scalar_prefetch = 0 : i64, scratch_operands = 2 : i64, tpu.core_type = #tpu.core_type<tc>, window_params = [{transform_indices = @transform_0, window_bounds = array<i64: 8, 8, 384>}, {transform_indices = @transform_1, window_bounds = array<i64: 8, 8, 384>}, {pipeline_mode = #tpu.pipeline_mode<synchronous>, transform_indices = @transform_2, window_bounds = array<i64: 8, 1>}, {pipeline_mode = #tpu.pipeline_mode<synchronous>, transform_indices = @transform_3, window_bounds = array<i64: 128, 384>}, {pipeline_mode = #tpu.pipeline_mode<synchronous>, transform_indices = @transform_4, window_bounds = array<i64: 128, 384>}, {pipeline_mode = #tpu.pipeline_mode<synchronous>, transform_indices = @transform_5, window_bounds = array<i64: 1, 128>}, {pipeline_mode = #tpu.pipeline_mode<synchronous>, transform_indices = @transform_6, window_bounds = array<i64: 1, 128>}, {transform_indices = @transform_7, window_bounds = array<i64: 8, 8, 128>}, {transform_indices = @transform_8, window_bounds = array<i64: 8, 8, 128>}, {pipeline_mode = #tpu.pipeline_mode<synchronous>, transform_indices = @transform_9, window_bounds = array<i64: 8, 128>}, {pipeline_mode = #tpu.pipeline_mode<synchronous>, transform_indices = @transform_10, window_bounds = array<i64: 8, 128>}]} {
    %c0_i32 = arith.constant 0 : i32
    %0 = arith.cmpi eq, %arg0, %c0_i32 : i32
    %1 = arith.extui %0 : i1 to i32
    %c0_i32_0 = arith.constant 0 : i32
    %2 = arith.cmpi ne, %1, %c0_i32_0 : i32
    scf.if %2 {
      %cst_239 = arith.constant 0.000000e+00 : f32
      %791 = vector.broadcast %cst_239 : f32 to vector<8x128xf32>
      %c0_240 = arith.constant 0 : index
      %c0_241 = arith.constant 0 : index
      %792 = vector.load %arg12[%c0_240, %c0_241] : memref<8x128xf32, #tpu.memory_space<vmem>>, vector<8x128xf32>
      tpu.vector_store %arg12[%c0_240, %c0_241], %791 {strides = array<i32>} : memref<8x128xf32, #tpu.memory_space<vmem>>, vector<8x128xf32>,
      %cst_242 = arith.constant 0.000000e+00 : f32
      %793 = vector.broadcast %cst_242 : f32 to vector<8x128xf32>
      %c0_243 = arith.constant 0 : index
      %c0_244 = arith.constant 0 : index
      %794 = vector.load %arg13[%c0_243, %c0_244] : memref<8x128xf32, #tpu.memory_space<vmem>>, vector<8x128xf32>
      tpu.vector_store %arg13[%c0_243, %c0_244], %793 {strides = array<i32>} : memref<8x128xf32, #tpu.memory_space<vmem>>, vector<8x128xf32>,
    } else {
    }
    %c0 = arith.constant 0 : index
    %c0_1 = arith.constant 0 : index
    %3 = vector.load %arg3[%c0, %c0_1] : memref<8x1xi32, #tpu.memory_space<vmem>>, vector<8x1xi32>
    %c0_2 = arith.constant 0 : index
    %c0_3 = arith.constant 0 : index
    %4 = vector.load %arg6[%c0_2, %c0_3] : memref<1x128xf32, #tpu.memory_space<vmem>>, vector<1x128xf32>
    %5 = vector.shape_cast %4 : vector<1x128xf32> to vector<1x128xf32>
    %6 = vector.broadcast %5 : vector<1x128xf32> to vector<8x128xf32>
    %c0_4 = arith.constant 0 : index
    %c0_5 = arith.constant 0 : index
    %7 = vector.load %arg7[%c0_4, %c0_5] : memref<1x128xf32, #tpu.memory_space<vmem>>, vector<1x128xf32>
    %8 = vector.shape_cast %7 : vector<1x128xf32> to vector<1x128xf32>
    %9 = vector.broadcast %8 : vector<1x128xf32> to vector<8x128xf32>
    %c8_i32 = arith.constant 8 : i32
    %10 = arith.muli %arg0, %c8_i32 : i32
    %c0_i32_6 = arith.constant 0 : i32
    %11 = arith.addi %10, %c0_i32_6 : i32
    %c0_7 = arith.constant 0 : index
    %c0_8 = arith.constant 0 : index
    %12 = vector.load %arg12[%c0_7, %c0_8] : memref<8x128xf32, #tpu.memory_space<vmem>>, vector<8x128xf32>
    %13 = arith.truncf %12 : vector<8x128xf32> to vector<8x128xbf16>
    %c0_9 = arith.constant 0 : index
    %c0_10 = arith.constant 0 : index
    %14 = vector.load %arg4[%c0_9, %c0_10] : memref<128x384xbf16, #tpu.memory_space<vmem>>, vector<128x384xbf16>
    %cst = arith.constant dense<0.000000e+00> : vector<8x384xf32>
    %15 = tpu.matmul %13, %14, %cst {dimension_numbers = #tpu.dot_dimension_numbers<[1], [0], [0], [1], [0, 0, 1, 1], [], []>} : vector<8x128xbf16>, vector<128x384xbf16>, vector<8x384xf32> -> vector<8x384xf32>
    %16 = arith.index_cast %c0_i32_6 : i32 to index
    %c0_11 = arith.constant 0 : index
    %c0_12 = arith.constant 0 : index
    %17 = vector.load %arg1[%16, %c0_11, %c0_12] : memref<8x8x384xf32, #tpu.memory_space<vmem>>, vector<1x8x384xf32>
    %18 = vector.shape_cast %17 : vector<1x8x384xf32> to vector<8x384xf32>
    %19 = vector.extract_strided_slice %18 {offsets = [0, 0], sizes = [8, 128], strides = [1, 1]} : vector<8x384xf32> to vector<8x128xf32>
    %20 = vector.extract_strided_slice %15 {offsets = [0, 0], sizes = [8, 128], strides = [1, 1]} : vector<8x384xf32> to vector<8x128xf32>
    %21 = arith.addf %19, %20 : vector<8x128xf32>
    %22 = arith.negf %21 : vector<8x128xf32>
    %23 = math.exp %22 : vector<8x128xf32>
    %cst_13 = arith.constant 1.000000e+00 : f32
    %24 = vector.broadcast %cst_13 : f32 to vector<8x128xf32>
    %25 = arith.addf %24, %23 : vector<8x128xf32>
    %26 = arith.divf %24, %25 : vector<8x128xf32>
    %27 = vector.extract_strided_slice %18 {offsets = [0, 128], sizes = [8, 128], strides = [1, 1]} : vector<8x384xf32> to vector<8x128xf32>
    %28 = vector.extract_strided_slice %15 {offsets = [0, 128], sizes = [8, 128], strides = [1, 1]} : vector<8x384xf32> to vector<8x128xf32>
    %29 = arith.addf %27, %28 : vector<8x128xf32>
    %30 = arith.negf %29 : vector<8x128xf32>
    %31 = math.exp %30 : vector<8x128xf32>
    %cst_14 = arith.constant 1.000000e+00 : f32
    %32 = vector.broadcast %cst_14 : f32 to vector<8x128xf32>
    %33 = arith.addf %32, %31 : vector<8x128xf32>
    %34 = arith.divf %32, %33 : vector<8x128xf32>
    %35 = vector.extract_strided_slice %18 {offsets = [0, 256], sizes = [8, 128], strides = [1, 1]} : vector<8x384xf32> to vector<8x128xf32>
    %36 = vector.extract_strided_slice %15 {offsets = [0, 256], sizes = [8, 128], strides = [1, 1]} : vector<8x384xf32> to vector<8x128xf32>
    %37 = arith.addf %36, %6 : vector<8x128xf32>
    %38 = arith.mulf %26, %37 : vector<8x128xf32>
    %39 = arith.addf %35, %38 : vector<8x128xf32>
    %40 = math.tanh %39 : vector<8x128xf32>
    %41 = arith.subf %12, %40 : vector<8x128xf32>
    %42 = arith.mulf %34, %41 : vector<8x128xf32>
    %43 = arith.addf %40, %42 : vector<8x128xf32>
    %44 = vector.broadcast %11 : i32 to vector<8x1xi32>
    %45 = arith.cmpi sgt, %3, %44 : vector<8x1xi32>
    %46 = arith.extui %45 : vector<8x1xi1> to vector<8x1xi32>
    %47 = arith.sitofp %46 : vector<8x1xi32> to vector<8x1xf32>
    %48 = arith.subf %43, %12 : vector<8x128xf32>
    %49 = vector.broadcast %47 : vector<8x1xf32> to vector<8x128xf32>
    %50 = arith.mulf %49, %48 : vector<8x128xf32>
    %51 = arith.addf %12, %50 : vector<8x128xf32>
    %c0_15 = arith.constant 0 : index
    %c0_16 = arith.constant 0 : index
    %52 = vector.load %arg12[%c0_15, %c0_16] : memref<8x128xf32, #tpu.memory_space<vmem>>, vector<8x128xf32>
    tpu.vector_store %arg12[%c0_15, %c0_16], %51 {strides = array<i32>} : memref<8x128xf32, #tpu.memory_space<vmem>>, vector<8x128xf32>,
    %53 = vector.broadcast %47 : vector<8x1xf32> to vector<8x128xf32>
    %54 = arith.mulf %53, %43 : vector<8x128xf32>
    %55 = arith.index_cast %c0_i32_6 : i32 to index
    %c0_17 = arith.constant 0 : index
    %c0_18 = arith.constant 0 : index
    %56 = vector.load %arg8[%55, %c0_17, %c0_18] : memref<8x8x128xf32, #tpu.memory_space<vmem>>, vector<1x8x128xf32>
    %57 = vector.shape_cast %56 : vector<1x8x128xf32> to vector<8x128xf32>
    %58 = vector.shape_cast %54 : vector<8x128xf32> to vector<1x8x128xf32>
    tpu.vector_store %arg8[%55, %c0_17, %c0_18], %58 {strides = array<i32>} : memref<8x8x128xf32, #tpu.memory_space<vmem>>, vector<1x8x128xf32>,
    %c7_i32 = arith.constant 7 : i32
    %59 = arith.subi %c7_i32, %c0_i32_6 : i32
    %c7_i32_19 = arith.constant 7 : i32
    %60 = arith.subi %c7_i32_19, %11 : i32
    %c0_20 = arith.constant 0 : index
    %c0_21 = arith.constant 0 : index
    %61 = vector.load %arg13[%c0_20, %c0_21] : memref<8x128xf32, #tpu.memory_space<vmem>>, vector<8x128xf32>
    %62 = arith.truncf %61 : vector<8x128xf32> to vector<8x128xbf16>
    %c0_22 = arith.constant 0 : index
    %c0_23 = arith.constant 0 : index
    %63 = vector.load %arg5[%c0_22, %c0_23] : memref<128x384xbf16, #tpu.memory_space<vmem>>, vector<128x384xbf16>
    %cst_24 = arith.constant dense<0.000000e+00> : vector<8x384xf32>
    %64 = tpu.matmul %62, %63, %cst_24 {dimension_numbers = #tpu.dot_dimension_numbers<[1], [0], [0], [1], [0, 0, 1, 1], [], []>} : vector<8x128xbf16>, vector<128x384xbf16>, vector<8x384xf32> -> vector<8x384xf32>
    %65 = arith.index_cast %59 : i32 to index
    %c0_25 = arith.constant 0 : index
    %c0_26 = arith.constant 0 : index
    %66 = vector.load %arg2[%65, %c0_25, %c0_26] : memref<8x8x384xf32, #tpu.memory_space<vmem>>, vector<1x8x384xf32>
    %67 = vector.shape_cast %66 : vector<1x8x384xf32> to vector<8x384xf32>
    %68 = vector.extract_strided_slice %67 {offsets = [0, 0], sizes = [8, 128], strides = [1, 1]} : vector<8x384xf32> to vector<8x128xf32>
    %69 = vector.extract_strided_slice %64 {offsets = [0, 0], sizes = [8, 128], strides = [1, 1]} : vector<8x384xf32> to vector<8x128xf32>
    %70 = arith.addf %68, %69 : vector<8x128xf32>
    %71 = arith.negf %70 : vector<8x128xf32>
    %72 = math.exp %71 : vector<8x128xf32>
    %cst_27 = arith.constant 1.000000e+00 : f32
    %73 = vector.broadcast %cst_27 : f32 to vector<8x128xf32>
    %74 = arith.addf %73, %72 : vector<8x128xf32>
    %75 = arith.divf %73, %74 : vector<8x128xf32>
    %76 = vector.extract_strided_slice %67 {offsets = [0, 128], sizes = [8, 128], strides = [1, 1]} : vector<8x384xf32> to vector<8x128xf32>
    %77 = vector.extract_strided_slice %64 {offsets = [0, 128], sizes = [8, 128], strides = [1, 1]} : vector<8x384xf32> to vector<8x128xf32>
    %78 = arith.addf %76, %77 : vector<8x128xf32>
    %79 = arith.negf %78 : vector<8x128xf32>
    %80 = math.exp %79 : vector<8x128xf32>
    %cst_28 = arith.constant 1.000000e+00 : f32
    %81 = vector.broadcast %cst_28 : f32 to vector<8x128xf32>
    %82 = arith.addf %81, %80 : vector<8x128xf32>
    %83 = arith.divf %81, %82 : vector<8x128xf32>
    %84 = vector.extract_strided_slice %67 {offsets = [0, 256], sizes = [8, 128], strides = [1, 1]} : vector<8x384xf32> to vector<8x128xf32>
    %85 = vector.extract_strided_slice %64 {offsets = [0, 256], sizes = [8, 128], strides = [1, 1]} : vector<8x384xf32> to vector<8x128xf32>
    %86 = arith.addf %85, %9 : vector<8x128xf32>
    %87 = arith.mulf %75, %86 : vector<8x128xf32>
    %88 = arith.addf %84, %87 : vector<8x128xf32>
    %89 = math.tanh %88 : vector<8x128xf32>
    %90 = arith.subf %61, %89 : vector<8x128xf32>
    %91 = arith.mulf %83, %90 : vector<8x128xf32>
    %92 = arith.addf %89, %91 : vector<8x128xf32>
    %93 = vector.broadcast %60 : i32 to vector<8x1xi32>
    %94 = arith.cmpi sgt, %3, %93 : vector<8x1xi32>
    %95 = arith.extui %94 : vector<8x1xi1> to vector<8x1xi32>
    %96 = arith.sitofp %95 : vector<8x1xi32> to vector<8x1xf32>
    %97 = arith.subf %92, %61 : vector<8x128xf32>
    %98 = vector.broadcast %96 : vector<8x1xf32> to vector<8x128xf32>
    %99 = arith.mulf %98, %97 : vector<8x128xf32>
    %100 = arith.addf %61, %99 : vector<8x128xf32>
    %c0_29 = arith.constant 0 : index
    %c0_30 = arith.constant 0 : index
    %101 = vector.load %arg13[%c0_29, %c0_30] : memref<8x128xf32, #tpu.memory_space<vmem>>, vector<8x128xf32>
    tpu.vector_store %arg13[%c0_29, %c0_30], %100 {strides = array<i32>} : memref<8x128xf32, #tpu.memory_space<vmem>>, vector<8x128xf32>,
    %102 = vector.broadcast %96 : vector<8x1xf32> to vector<8x128xf32>
    %103 = arith.mulf %102, %92 : vector<8x128xf32>
    %104 = arith.index_cast %59 : i32 to index
    %c0_31 = arith.constant 0 : index
    %c0_32 = arith.constant 0 : index
    %105 = vector.load %arg9[%104, %c0_31, %c0_32] : memref<8x8x128xf32, #tpu.memory_space<vmem>>, vector<1x8x128xf32>
    %106 = vector.shape_cast %105 : vector<1x8x128xf32> to vector<8x128xf32>
    %107 = vector.shape_cast %103 : vector<8x128xf32> to vector<1x8x128xf32>
    tpu.vector_store %arg9[%104, %c0_31, %c0_32], %107 {strides = array<i32>} : memref<8x8x128xf32, #tpu.memory_space<vmem>>, vector<1x8x128xf32>,
    %c1_i32 = arith.constant 1 : i32
    %108 = arith.addi %10, %c1_i32 : i32
    %c0_33 = arith.constant 0 : index
    %c0_34 = arith.constant 0 : index
    %109 = vector.load %arg12[%c0_33, %c0_34] : memref<8x128xf32, #tpu.memory_space<vmem>>, vector<8x128xf32>
    %110 = arith.truncf %109 : vector<8x128xf32> to vector<8x128xbf16>
    %c0_35 = arith.constant 0 : index
    %c0_36 = arith.constant 0 : index
    %111 = vector.load %arg4[%c0_35, %c0_36] : memref<128x384xbf16, #tpu.memory_space<vmem>>, vector<128x384xbf16>
    %cst_37 = arith.constant dense<0.000000e+00> : vector<8x384xf32>
    %112 = tpu.matmul %110, %111, %cst_37 {dimension_numbers = #tpu.dot_dimension_numbers<[1], [0], [0], [1], [0, 0, 1, 1], [], []>} : vector<8x128xbf16>, vector<128x384xbf16>, vector<8x384xf32> -> vector<8x384xf32>
    %113 = arith.index_cast %c1_i32 : i32 to index
    %c0_38 = arith.constant 0 : index
    %c0_39 = arith.constant 0 : index
    %114 = vector.load %arg1[%113, %c0_38, %c0_39] : memref<8x8x384xf32, #tpu.memory_space<vmem>>, vector<1x8x384xf32>
    %115 = vector.shape_cast %114 : vector<1x8x384xf32> to vector<8x384xf32>
    %116 = vector.extract_strided_slice %115 {offsets = [0, 0], sizes = [8, 128], strides = [1, 1]} : vector<8x384xf32> to vector<8x128xf32>
    %117 = vector.extract_strided_slice %112 {offsets = [0, 0], sizes = [8, 128], strides = [1, 1]} : vector<8x384xf32> to vector<8x128xf32>
    %118 = arith.addf %116, %117 : vector<8x128xf32>
    %119 = arith.negf %118 : vector<8x128xf32>
    %120 = math.exp %119 : vector<8x128xf32>
    %cst_40 = arith.constant 1.000000e+00 : f32
    %121 = vector.broadcast %cst_40 : f32 to vector<8x128xf32>
    %122 = arith.addf %121, %120 : vector<8x128xf32>
    %123 = arith.divf %121, %122 : vector<8x128xf32>
    %124 = vector.extract_strided_slice %115 {offsets = [0, 128], sizes = [8, 128], strides = [1, 1]} : vector<8x384xf32> to vector<8x128xf32>
    %125 = vector.extract_strided_slice %112 {offsets = [0, 128], sizes = [8, 128], strides = [1, 1]} : vector<8x384xf32> to vector<8x128xf32>
    %126 = arith.addf %124, %125 : vector<8x128xf32>
    %127 = arith.negf %126 : vector<8x128xf32>
    %128 = math.exp %127 : vector<8x128xf32>
    %cst_41 = arith.constant 1.000000e+00 : f32
    %129 = vector.broadcast %cst_41 : f32 to vector<8x128xf32>
    %130 = arith.addf %129, %128 : vector<8x128xf32>
    %131 = arith.divf %129, %130 : vector<8x128xf32>
    %132 = vector.extract_strided_slice %115 {offsets = [0, 256], sizes = [8, 128], strides = [1, 1]} : vector<8x384xf32> to vector<8x128xf32>
    %133 = vector.extract_strided_slice %112 {offsets = [0, 256], sizes = [8, 128], strides = [1, 1]} : vector<8x384xf32> to vector<8x128xf32>
    %134 = arith.addf %133, %6 : vector<8x128xf32>
    %135 = arith.mulf %123, %134 : vector<8x128xf32>
    %136 = arith.addf %132, %135 : vector<8x128xf32>
    %137 = math.tanh %136 : vector<8x128xf32>
    %138 = arith.subf %109, %137 : vector<8x128xf32>
    %139 = arith.mulf %131, %138 : vector<8x128xf32>
    %140 = arith.addf %137, %139 : vector<8x128xf32>
    %141 = vector.broadcast %108 : i32 to vector<8x1xi32>
    %142 = arith.cmpi sgt, %3, %141 : vector<8x1xi32>
    %143 = arith.extui %142 : vector<8x1xi1> to vector<8x1xi32>
    %144 = arith.sitofp %143 : vector<8x1xi32> to vector<8x1xf32>
    %145 = arith.subf %140, %109 : vector<8x128xf32>
    %146 = vector.broadcast %144 : vector<8x1xf32> to vector<8x128xf32>
    %147 = arith.mulf %146, %145 : vector<8x128xf32>
    %148 = arith.addf %109, %147 : vector<8x128xf32>
    %c0_42 = arith.constant 0 : index
    %c0_43 = arith.constant 0 : index
    %149 = vector.load %arg12[%c0_42, %c0_43] : memref<8x128xf32, #tpu.memory_space<vmem>>, vector<8x128xf32>
    tpu.vector_store %arg12[%c0_42, %c0_43], %148 {strides = array<i32>} : memref<8x128xf32, #tpu.memory_space<vmem>>, vector<8x128xf32>,
    %150 = vector.broadcast %144 : vector<8x1xf32> to vector<8x128xf32>
    %151 = arith.mulf %150, %140 : vector<8x128xf32>
    %152 = arith.index_cast %c1_i32 : i32 to index
    %c0_44 = arith.constant 0 : index
    %c0_45 = arith.constant 0 : index
    %153 = vector.load %arg8[%152, %c0_44, %c0_45] : memref<8x8x128xf32, #tpu.memory_space<vmem>>, vector<1x8x128xf32>
    %154 = vector.shape_cast %153 : vector<1x8x128xf32> to vector<8x128xf32>
    %155 = vector.shape_cast %151 : vector<8x128xf32> to vector<1x8x128xf32>
    tpu.vector_store %arg8[%152, %c0_44, %c0_45], %155 {strides = array<i32>} : memref<8x8x128xf32, #tpu.memory_space<vmem>>, vector<1x8x128xf32>,
    %c7_i32_46 = arith.constant 7 : i32
    %156 = arith.subi %c7_i32_46, %c1_i32 : i32
    %c7_i32_47 = arith.constant 7 : i32
    %157 = arith.subi %c7_i32_47, %108 : i32
    %c0_48 = arith.constant 0 : index
    %c0_49 = arith.constant 0 : index
    %158 = vector.load %arg13[%c0_48, %c0_49] : memref<8x128xf32, #tpu.memory_space<vmem>>, vector<8x128xf32>
    %159 = arith.truncf %158 : vector<8x128xf32> to vector<8x128xbf16>
    %c0_50 = arith.constant 0 : index
    %c0_51 = arith.constant 0 : index
    %160 = vector.load %arg5[%c0_50, %c0_51] : memref<128x384xbf16, #tpu.memory_space<vmem>>, vector<128x384xbf16>
    %cst_52 = arith.constant dense<0.000000e+00> : vector<8x384xf32>
    %161 = tpu.matmul %159, %160, %cst_52 {dimension_numbers = #tpu.dot_dimension_numbers<[1], [0], [0], [1], [0, 0, 1, 1], [], []>} : vector<8x128xbf16>, vector<128x384xbf16>, vector<8x384xf32> -> vector<8x384xf32>
    %162 = arith.index_cast %156 : i32 to index
    %c0_53 = arith.constant 0 : index
    %c0_54 = arith.constant 0 : index
    %163 = vector.load %arg2[%162, %c0_53, %c0_54] : memref<8x8x384xf32, #tpu.memory_space<vmem>>, vector<1x8x384xf32>
    %164 = vector.shape_cast %163 : vector<1x8x384xf32> to vector<8x384xf32>
    %165 = vector.extract_strided_slice %164 {offsets = [0, 0], sizes = [8, 128], strides = [1, 1]} : vector<8x384xf32> to vector<8x128xf32>
    %166 = vector.extract_strided_slice %161 {offsets = [0, 0], sizes = [8, 128], strides = [1, 1]} : vector<8x384xf32> to vector<8x128xf32>
    %167 = arith.addf %165, %166 : vector<8x128xf32>
    %168 = arith.negf %167 : vector<8x128xf32>
    %169 = math.exp %168 : vector<8x128xf32>
    %cst_55 = arith.constant 1.000000e+00 : f32
    %170 = vector.broadcast %cst_55 : f32 to vector<8x128xf32>
    %171 = arith.addf %170, %169 : vector<8x128xf32>
    %172 = arith.divf %170, %171 : vector<8x128xf32>
    %173 = vector.extract_strided_slice %164 {offsets = [0, 128], sizes = [8, 128], strides = [1, 1]} : vector<8x384xf32> to vector<8x128xf32>
    %174 = vector.extract_strided_slice %161 {offsets = [0, 128], sizes = [8, 128], strides = [1, 1]} : vector<8x384xf32> to vector<8x128xf32>
    %175 = arith.addf %173, %174 : vector<8x128xf32>
    %176 = arith.negf %175 : vector<8x128xf32>
    %177 = math.exp %176 : vector<8x128xf32>
    %cst_56 = arith.constant 1.000000e+00 : f32
    %178 = vector.broadcast %cst_56 : f32 to vector<8x128xf32>
    %179 = arith.addf %178, %177 : vector<8x128xf32>
    %180 = arith.divf %178, %179 : vector<8x128xf32>
    %181 = vector.extract_strided_slice %164 {offsets = [0, 256], sizes = [8, 128], strides = [1, 1]} : vector<8x384xf32> to vector<8x128xf32>
    %182 = vector.extract_strided_slice %161 {offsets = [0, 256], sizes = [8, 128], strides = [1, 1]} : vector<8x384xf32> to vector<8x128xf32>
    %183 = arith.addf %182, %9 : vector<8x128xf32>
    %184 = arith.mulf %172, %183 : vector<8x128xf32>
    %185 = arith.addf %181, %184 : vector<8x128xf32>
    %186 = math.tanh %185 : vector<8x128xf32>
    %187 = arith.subf %158, %186 : vector<8x128xf32>
    %188 = arith.mulf %180, %187 : vector<8x128xf32>
    %189 = arith.addf %186, %188 : vector<8x128xf32>
    %190 = vector.broadcast %157 : i32 to vector<8x1xi32>
    %191 = arith.cmpi sgt, %3, %190 : vector<8x1xi32>
    %192 = arith.extui %191 : vector<8x1xi1> to vector<8x1xi32>
    %193 = arith.sitofp %192 : vector<8x1xi32> to vector<8x1xf32>
    %194 = arith.subf %189, %158 : vector<8x128xf32>
    %195 = vector.broadcast %193 : vector<8x1xf32> to vector<8x128xf32>
    %196 = arith.mulf %195, %194 : vector<8x128xf32>
    %197 = arith.addf %158, %196 : vector<8x128xf32>
    %c0_57 = arith.constant 0 : index
    %c0_58 = arith.constant 0 : index
    %198 = vector.load %arg13[%c0_57, %c0_58] : memref<8x128xf32, #tpu.memory_space<vmem>>, vector<8x128xf32>
    tpu.vector_store %arg13[%c0_57, %c0_58], %197 {strides = array<i32>} : memref<8x128xf32, #tpu.memory_space<vmem>>, vector<8x128xf32>,
    %199 = vector.broadcast %193 : vector<8x1xf32> to vector<8x128xf32>
    %200 = arith.mulf %199, %189 : vector<8x128xf32>
    %201 = arith.index_cast %156 : i32 to index
    %c0_59 = arith.constant 0 : index
    %c0_60 = arith.constant 0 : index
    %202 = vector.load %arg9[%201, %c0_59, %c0_60] : memref<8x8x128xf32, #tpu.memory_space<vmem>>, vector<1x8x128xf32>
    %203 = vector.shape_cast %202 : vector<1x8x128xf32> to vector<8x128xf32>
    %204 = vector.shape_cast %200 : vector<8x128xf32> to vector<1x8x128xf32>
    tpu.vector_store %arg9[%201, %c0_59, %c0_60], %204 {strides = array<i32>} : memref<8x8x128xf32, #tpu.memory_space<vmem>>, vector<1x8x128xf32>,
    %c2_i32 = arith.constant 2 : i32
    %205 = arith.addi %10, %c2_i32 : i32
    %c0_61 = arith.constant 0 : index
    %c0_62 = arith.constant 0 : index
    %206 = vector.load %arg12[%c0_61, %c0_62] : memref<8x128xf32, #tpu.memory_space<vmem>>, vector<8x128xf32>
    %207 = arith.truncf %206 : vector<8x128xf32> to vector<8x128xbf16>
    %c0_63 = arith.constant 0 : index
    %c0_64 = arith.constant 0 : index
    %208 = vector.load %arg4[%c0_63, %c0_64] : memref<128x384xbf16, #tpu.memory_space<vmem>>, vector<128x384xbf16>
    %cst_65 = arith.constant dense<0.000000e+00> : vector<8x384xf32>
    %209 = tpu.matmul %207, %208, %cst_65 {dimension_numbers = #tpu.dot_dimension_numbers<[1], [0], [0], [1], [0, 0, 1, 1], [], []>} : vector<8x128xbf16>, vector<128x384xbf16>, vector<8x384xf32> -> vector<8x384xf32>
    %210 = arith.index_cast %c2_i32 : i32 to index
    %c0_66 = arith.constant 0 : index
    %c0_67 = arith.constant 0 : index
    %211 = vector.load %arg1[%210, %c0_66, %c0_67] : memref<8x8x384xf32, #tpu.memory_space<vmem>>, vector<1x8x384xf32>
    %212 = vector.shape_cast %211 : vector<1x8x384xf32> to vector<8x384xf32>
    %213 = vector.extract_strided_slice %212 {offsets = [0, 0], sizes = [8, 128], strides = [1, 1]} : vector<8x384xf32> to vector<8x128xf32>
    %214 = vector.extract_strided_slice %209 {offsets = [0, 0], sizes = [8, 128], strides = [1, 1]} : vector<8x384xf32> to vector<8x128xf32>
    %215 = arith.addf %213, %214 : vector<8x128xf32>
    %216 = arith.negf %215 : vector<8x128xf32>
    %217 = math.exp %216 : vector<8x128xf32>
    %cst_68 = arith.constant 1.000000e+00 : f32
    %218 = vector.broadcast %cst_68 : f32 to vector<8x128xf32>
    %219 = arith.addf %218, %217 : vector<8x128xf32>
    %220 = arith.divf %218, %219 : vector<8x128xf32>
    %221 = vector.extract_strided_slice %212 {offsets = [0, 128], sizes = [8, 128], strides = [1, 1]} : vector<8x384xf32> to vector<8x128xf32>
    %222 = vector.extract_strided_slice %209 {offsets = [0, 128], sizes = [8, 128], strides = [1, 1]} : vector<8x384xf32> to vector<8x128xf32>
    %223 = arith.addf %221, %222 : vector<8x128xf32>
    %224 = arith.negf %223 : vector<8x128xf32>
    %225 = math.exp %224 : vector<8x128xf32>
    %cst_69 = arith.constant 1.000000e+00 : f32
    %226 = vector.broadcast %cst_69 : f32 to vector<8x128xf32>
    %227 = arith.addf %226, %225 : vector<8x128xf32>
    %228 = arith.divf %226, %227 : vector<8x128xf32>
    %229 = vector.extract_strided_slice %212 {offsets = [0, 256], sizes = [8, 128], strides = [1, 1]} : vector<8x384xf32> to vector<8x128xf32>
    %230 = vector.extract_strided_slice %209 {offsets = [0, 256], sizes = [8, 128], strides = [1, 1]} : vector<8x384xf32> to vector<8x128xf32>
    %231 = arith.addf %230, %6 : vector<8x128xf32>
    %232 = arith.mulf %220, %231 : vector<8x128xf32>
    %233 = arith.addf %229, %232 : vector<8x128xf32>
    %234 = math.tanh %233 : vector<8x128xf32>
    %235 = arith.subf %206, %234 : vector<8x128xf32>
    %236 = arith.mulf %228, %235 : vector<8x128xf32>
    %237 = arith.addf %234, %236 : vector<8x128xf32>
    %238 = vector.broadcast %205 : i32 to vector<8x1xi32>
    %239 = arith.cmpi sgt, %3, %238 : vector<8x1xi32>
    %240 = arith.extui %239 : vector<8x1xi1> to vector<8x1xi32>
    %241 = arith.sitofp %240 : vector<8x1xi32> to vector<8x1xf32>
    %242 = arith.subf %237, %206 : vector<8x128xf32>
    %243 = vector.broadcast %241 : vector<8x1xf32> to vector<8x128xf32>
    %244 = arith.mulf %243, %242 : vector<8x128xf32>
    %245 = arith.addf %206, %244 : vector<8x128xf32>
    %c0_70 = arith.constant 0 : index
    %c0_71 = arith.constant 0 : index
    %246 = vector.load %arg12[%c0_70, %c0_71] : memref<8x128xf32, #tpu.memory_space<vmem>>, vector<8x128xf32>
    tpu.vector_store %arg12[%c0_70, %c0_71], %245 {strides = array<i32>} : memref<8x128xf32, #tpu.memory_space<vmem>>, vector<8x128xf32>,
    %247 = vector.broadcast %241 : vector<8x1xf32> to vector<8x128xf32>
    %248 = arith.mulf %247, %237 : vector<8x128xf32>
    %249 = arith.index_cast %c2_i32 : i32 to index
    %c0_72 = arith.constant 0 : index
    %c0_73 = arith.constant 0 : index
    %250 = vector.load %arg8[%249, %c0_72, %c0_73] : memref<8x8x128xf32, #tpu.memory_space<vmem>>, vector<1x8x128xf32>
    %251 = vector.shape_cast %250 : vector<1x8x128xf32> to vector<8x128xf32>
    %252 = vector.shape_cast %248 : vector<8x128xf32> to vector<1x8x128xf32>
    tpu.vector_store %arg8[%249, %c0_72, %c0_73], %252 {strides = array<i32>} : memref<8x8x128xf32, #tpu.memory_space<vmem>>, vector<1x8x128xf32>,
    %c7_i32_74 = arith.constant 7 : i32
    %253 = arith.subi %c7_i32_74, %c2_i32 : i32
    %c7_i32_75 = arith.constant 7 : i32
    %254 = arith.subi %c7_i32_75, %205 : i32
    %c0_76 = arith.constant 0 : index
    %c0_77 = arith.constant 0 : index
    %255 = vector.load %arg13[%c0_76, %c0_77] : memref<8x128xf32, #tpu.memory_space<vmem>>, vector<8x128xf32>
    %256 = arith.truncf %255 : vector<8x128xf32> to vector<8x128xbf16>
    %c0_78 = arith.constant 0 : index
    %c0_79 = arith.constant 0 : index
    %257 = vector.load %arg5[%c0_78, %c0_79] : memref<128x384xbf16, #tpu.memory_space<vmem>>, vector<128x384xbf16>
    %cst_80 = arith.constant dense<0.000000e+00> : vector<8x384xf32>
    %258 = tpu.matmul %256, %257, %cst_80 {dimension_numbers = #tpu.dot_dimension_numbers<[1], [0], [0], [1], [0, 0, 1, 1], [], []>} : vector<8x128xbf16>, vector<128x384xbf16>, vector<8x384xf32> -> vector<8x384xf32>
    %259 = arith.index_cast %253 : i32 to index
    %c0_81 = arith.constant 0 : index
    %c0_82 = arith.constant 0 : index
    %260 = vector.load %arg2[%259, %c0_81, %c0_82] : memref<8x8x384xf32, #tpu.memory_space<vmem>>, vector<1x8x384xf32>
    %261 = vector.shape_cast %260 : vector<1x8x384xf32> to vector<8x384xf32>
    %262 = vector.extract_strided_slice %261 {offsets = [0, 0], sizes = [8, 128], strides = [1, 1]} : vector<8x384xf32> to vector<8x128xf32>
    %263 = vector.extract_strided_slice %258 {offsets = [0, 0], sizes = [8, 128], strides = [1, 1]} : vector<8x384xf32> to vector<8x128xf32>
    %264 = arith.addf %262, %263 : vector<8x128xf32>
    %265 = arith.negf %264 : vector<8x128xf32>
    %266 = math.exp %265 : vector<8x128xf32>
    %cst_83 = arith.constant 1.000000e+00 : f32
    %267 = vector.broadcast %cst_83 : f32 to vector<8x128xf32>
    %268 = arith.addf %267, %266 : vector<8x128xf32>
    %269 = arith.divf %267, %268 : vector<8x128xf32>
    %270 = vector.extract_strided_slice %261 {offsets = [0, 128], sizes = [8, 128], strides = [1, 1]} : vector<8x384xf32> to vector<8x128xf32>
    %271 = vector.extract_strided_slice %258 {offsets = [0, 128], sizes = [8, 128], strides = [1, 1]} : vector<8x384xf32> to vector<8x128xf32>
    %272 = arith.addf %270, %271 : vector<8x128xf32>
    %273 = arith.negf %272 : vector<8x128xf32>
    %274 = math.exp %273 : vector<8x128xf32>
    %cst_84 = arith.constant 1.000000e+00 : f32
    %275 = vector.broadcast %cst_84 : f32 to vector<8x128xf32>
    %276 = arith.addf %275, %274 : vector<8x128xf32>
    %277 = arith.divf %275, %276 : vector<8x128xf32>
    %278 = vector.extract_strided_slice %261 {offsets = [0, 256], sizes = [8, 128], strides = [1, 1]} : vector<8x384xf32> to vector<8x128xf32>
    %279 = vector.extract_strided_slice %258 {offsets = [0, 256], sizes = [8, 128], strides = [1, 1]} : vector<8x384xf32> to vector<8x128xf32>
    %280 = arith.addf %279, %9 : vector<8x128xf32>
    %281 = arith.mulf %269, %280 : vector<8x128xf32>
    %282 = arith.addf %278, %281 : vector<8x128xf32>
    %283 = math.tanh %282 : vector<8x128xf32>
    %284 = arith.subf %255, %283 : vector<8x128xf32>
    %285 = arith.mulf %277, %284 : vector<8x128xf32>
    %286 = arith.addf %283, %285 : vector<8x128xf32>
    %287 = vector.broadcast %254 : i32 to vector<8x1xi32>
    %288 = arith.cmpi sgt, %3, %287 : vector<8x1xi32>
    %289 = arith.extui %288 : vector<8x1xi1> to vector<8x1xi32>
    %290 = arith.sitofp %289 : vector<8x1xi32> to vector<8x1xf32>
    %291 = arith.subf %286, %255 : vector<8x128xf32>
    %292 = vector.broadcast %290 : vector<8x1xf32> to vector<8x128xf32>
    %293 = arith.mulf %292, %291 : vector<8x128xf32>
    %294 = arith.addf %255, %293 : vector<8x128xf32>
    %c0_85 = arith.constant 0 : index
    %c0_86 = arith.constant 0 : index
    %295 = vector.load %arg13[%c0_85, %c0_86] : memref<8x128xf32, #tpu.memory_space<vmem>>, vector<8x128xf32>
    tpu.vector_store %arg13[%c0_85, %c0_86], %294 {strides = array<i32>} : memref<8x128xf32, #tpu.memory_space<vmem>>, vector<8x128xf32>,
    %296 = vector.broadcast %290 : vector<8x1xf32> to vector<8x128xf32>
    %297 = arith.mulf %296, %286 : vector<8x128xf32>
    %298 = arith.index_cast %253 : i32 to index
    %c0_87 = arith.constant 0 : index
    %c0_88 = arith.constant 0 : index
    %299 = vector.load %arg9[%298, %c0_87, %c0_88] : memref<8x8x128xf32, #tpu.memory_space<vmem>>, vector<1x8x128xf32>
    %300 = vector.shape_cast %299 : vector<1x8x128xf32> to vector<8x128xf32>
    %301 = vector.shape_cast %297 : vector<8x128xf32> to vector<1x8x128xf32>
    tpu.vector_store %arg9[%298, %c0_87, %c0_88], %301 {strides = array<i32>} : memref<8x8x128xf32, #tpu.memory_space<vmem>>, vector<1x8x128xf32>,
    %c3_i32 = arith.constant 3 : i32
    %302 = arith.addi %10, %c3_i32 : i32
    %c0_89 = arith.constant 0 : index
    %c0_90 = arith.constant 0 : index
    %303 = vector.load %arg12[%c0_89, %c0_90] : memref<8x128xf32, #tpu.memory_space<vmem>>, vector<8x128xf32>
    %304 = arith.truncf %303 : vector<8x128xf32> to vector<8x128xbf16>
    %c0_91 = arith.constant 0 : index
    %c0_92 = arith.constant 0 : index
    %305 = vector.load %arg4[%c0_91, %c0_92] : memref<128x384xbf16, #tpu.memory_space<vmem>>, vector<128x384xbf16>
    %cst_93 = arith.constant dense<0.000000e+00> : vector<8x384xf32>
    %306 = tpu.matmul %304, %305, %cst_93 {dimension_numbers = #tpu.dot_dimension_numbers<[1], [0], [0], [1], [0, 0, 1, 1], [], []>} : vector<8x128xbf16>, vector<128x384xbf16>, vector<8x384xf32> -> vector<8x384xf32>
    %307 = arith.index_cast %c3_i32 : i32 to index
    %c0_94 = arith.constant 0 : index
    %c0_95 = arith.constant 0 : index
    %308 = vector.load %arg1[%307, %c0_94, %c0_95] : memref<8x8x384xf32, #tpu.memory_space<vmem>>, vector<1x8x384xf32>
    %309 = vector.shape_cast %308 : vector<1x8x384xf32> to vector<8x384xf32>
    %310 = vector.extract_strided_slice %309 {offsets = [0, 0], sizes = [8, 128], strides = [1, 1]} : vector<8x384xf32> to vector<8x128xf32>
    %311 = vector.extract_strided_slice %306 {offsets = [0, 0], sizes = [8, 128], strides = [1, 1]} : vector<8x384xf32> to vector<8x128xf32>
    %312 = arith.addf %310, %311 : vector<8x128xf32>
    %313 = arith.negf %312 : vector<8x128xf32>
    %314 = math.exp %313 : vector<8x128xf32>
    %cst_96 = arith.constant 1.000000e+00 : f32
    %315 = vector.broadcast %cst_96 : f32 to vector<8x128xf32>
    %316 = arith.addf %315, %314 : vector<8x128xf32>
    %317 = arith.divf %315, %316 : vector<8x128xf32>
    %318 = vector.extract_strided_slice %309 {offsets = [0, 128], sizes = [8, 128], strides = [1, 1]} : vector<8x384xf32> to vector<8x128xf32>
    %319 = vector.extract_strided_slice %306 {offsets = [0, 128], sizes = [8, 128], strides = [1, 1]} : vector<8x384xf32> to vector<8x128xf32>
    %320 = arith.addf %318, %319 : vector<8x128xf32>
    %321 = arith.negf %320 : vector<8x128xf32>
    %322 = math.exp %321 : vector<8x128xf32>
    %cst_97 = arith.constant 1.000000e+00 : f32
    %323 = vector.broadcast %cst_97 : f32 to vector<8x128xf32>
    %324 = arith.addf %323, %322 : vector<8x128xf32>
    %325 = arith.divf %323, %324 : vector<8x128xf32>
    %326 = vector.extract_strided_slice %309 {offsets = [0, 256], sizes = [8, 128], strides = [1, 1]} : vector<8x384xf32> to vector<8x128xf32>
    %327 = vector.extract_strided_slice %306 {offsets = [0, 256], sizes = [8, 128], strides = [1, 1]} : vector<8x384xf32> to vector<8x128xf32>
    %328 = arith.addf %327, %6 : vector<8x128xf32>
    %329 = arith.mulf %317, %328 : vector<8x128xf32>
    %330 = arith.addf %326, %329 : vector<8x128xf32>
    %331 = math.tanh %330 : vector<8x128xf32>
    %332 = arith.subf %303, %331 : vector<8x128xf32>
    %333 = arith.mulf %325, %332 : vector<8x128xf32>
    %334 = arith.addf %331, %333 : vector<8x128xf32>
    %335 = vector.broadcast %302 : i32 to vector<8x1xi32>
    %336 = arith.cmpi sgt, %3, %335 : vector<8x1xi32>
    %337 = arith.extui %336 : vector<8x1xi1> to vector<8x1xi32>
    %338 = arith.sitofp %337 : vector<8x1xi32> to vector<8x1xf32>
    %339 = arith.subf %334, %303 : vector<8x128xf32>
    %340 = vector.broadcast %338 : vector<8x1xf32> to vector<8x128xf32>
    %341 = arith.mulf %340, %339 : vector<8x128xf32>
    %342 = arith.addf %303, %341 : vector<8x128xf32>
    %c0_98 = arith.constant 0 : index
    %c0_99 = arith.constant 0 : index
    %343 = vector.load %arg12[%c0_98, %c0_99] : memref<8x128xf32, #tpu.memory_space<vmem>>, vector<8x128xf32>
    tpu.vector_store %arg12[%c0_98, %c0_99], %342 {strides = array<i32>} : memref<8x128xf32, #tpu.memory_space<vmem>>, vector<8x128xf32>,
    %344 = vector.broadcast %338 : vector<8x1xf32> to vector<8x128xf32>
    %345 = arith.mulf %344, %334 : vector<8x128xf32>
    %346 = arith.index_cast %c3_i32 : i32 to index
    %c0_100 = arith.constant 0 : index
    %c0_101 = arith.constant 0 : index
    %347 = vector.load %arg8[%346, %c0_100, %c0_101] : memref<8x8x128xf32, #tpu.memory_space<vmem>>, vector<1x8x128xf32>
    %348 = vector.shape_cast %347 : vector<1x8x128xf32> to vector<8x128xf32>
    %349 = vector.shape_cast %345 : vector<8x128xf32> to vector<1x8x128xf32>
    tpu.vector_store %arg8[%346, %c0_100, %c0_101], %349 {strides = array<i32>} : memref<8x8x128xf32, #tpu.memory_space<vmem>>, vector<1x8x128xf32>,
    %c7_i32_102 = arith.constant 7 : i32
    %350 = arith.subi %c7_i32_102, %c3_i32 : i32
    %c7_i32_103 = arith.constant 7 : i32
    %351 = arith.subi %c7_i32_103, %302 : i32
    %c0_104 = arith.constant 0 : index
    %c0_105 = arith.constant 0 : index
    %352 = vector.load %arg13[%c0_104, %c0_105] : memref<8x128xf32, #tpu.memory_space<vmem>>, vector<8x128xf32>
    %353 = arith.truncf %352 : vector<8x128xf32> to vector<8x128xbf16>
    %c0_106 = arith.constant 0 : index
    %c0_107 = arith.constant 0 : index
    %354 = vector.load %arg5[%c0_106, %c0_107] : memref<128x384xbf16, #tpu.memory_space<vmem>>, vector<128x384xbf16>
    %cst_108 = arith.constant dense<0.000000e+00> : vector<8x384xf32>
    %355 = tpu.matmul %353, %354, %cst_108 {dimension_numbers = #tpu.dot_dimension_numbers<[1], [0], [0], [1], [0, 0, 1, 1], [], []>} : vector<8x128xbf16>, vector<128x384xbf16>, vector<8x384xf32> -> vector<8x384xf32>
    %356 = arith.index_cast %350 : i32 to index
    %c0_109 = arith.constant 0 : index
    %c0_110 = arith.constant 0 : index
    %357 = vector.load %arg2[%356, %c0_109, %c0_110] : memref<8x8x384xf32, #tpu.memory_space<vmem>>, vector<1x8x384xf32>
    %358 = vector.shape_cast %357 : vector<1x8x384xf32> to vector<8x384xf32>
    %359 = vector.extract_strided_slice %358 {offsets = [0, 0], sizes = [8, 128], strides = [1, 1]} : vector<8x384xf32> to vector<8x128xf32>
    %360 = vector.extract_strided_slice %355 {offsets = [0, 0], sizes = [8, 128], strides = [1, 1]} : vector<8x384xf32> to vector<8x128xf32>
    %361 = arith.addf %359, %360 : vector<8x128xf32>
    %362 = arith.negf %361 : vector<8x128xf32>
    %363 = math.exp %362 : vector<8x128xf32>
    %cst_111 = arith.constant 1.000000e+00 : f32
    %364 = vector.broadcast %cst_111 : f32 to vector<8x128xf32>
    %365 = arith.addf %364, %363 : vector<8x128xf32>
    %366 = arith.divf %364, %365 : vector<8x128xf32>
    %367 = vector.extract_strided_slice %358 {offsets = [0, 128], sizes = [8, 128], strides = [1, 1]} : vector<8x384xf32> to vector<8x128xf32>
    %368 = vector.extract_strided_slice %355 {offsets = [0, 128], sizes = [8, 128], strides = [1, 1]} : vector<8x384xf32> to vector<8x128xf32>
    %369 = arith.addf %367, %368 : vector<8x128xf32>
    %370 = arith.negf %369 : vector<8x128xf32>
    %371 = math.exp %370 : vector<8x128xf32>
    %cst_112 = arith.constant 1.000000e+00 : f32
    %372 = vector.broadcast %cst_112 : f32 to vector<8x128xf32>
    %373 = arith.addf %372, %371 : vector<8x128xf32>
    %374 = arith.divf %372, %373 : vector<8x128xf32>
    %375 = vector.extract_strided_slice %358 {offsets = [0, 256], sizes = [8, 128], strides = [1, 1]} : vector<8x384xf32> to vector<8x128xf32>
    %376 = vector.extract_strided_slice %355 {offsets = [0, 256], sizes = [8, 128], strides = [1, 1]} : vector<8x384xf32> to vector<8x128xf32>
    %377 = arith.addf %376, %9 : vector<8x128xf32>
    %378 = arith.mulf %366, %377 : vector<8x128xf32>
    %379 = arith.addf %375, %378 : vector<8x128xf32>
    %380 = math.tanh %379 : vector<8x128xf32>
    %381 = arith.subf %352, %380 : vector<8x128xf32>
    %382 = arith.mulf %374, %381 : vector<8x128xf32>
    %383 = arith.addf %380, %382 : vector<8x128xf32>
    %384 = vector.broadcast %351 : i32 to vector<8x1xi32>
    %385 = arith.cmpi sgt, %3, %384 : vector<8x1xi32>
    %386 = arith.extui %385 : vector<8x1xi1> to vector<8x1xi32>
    %387 = arith.sitofp %386 : vector<8x1xi32> to vector<8x1xf32>
    %388 = arith.subf %383, %352 : vector<8x128xf32>
    %389 = vector.broadcast %387 : vector<8x1xf32> to vector<8x128xf32>
    %390 = arith.mulf %389, %388 : vector<8x128xf32>
    %391 = arith.addf %352, %390 : vector<8x128xf32>
    %c0_113 = arith.constant 0 : index
    %c0_114 = arith.constant 0 : index
    %392 = vector.load %arg13[%c0_113, %c0_114] : memref<8x128xf32, #tpu.memory_space<vmem>>, vector<8x128xf32>
    tpu.vector_store %arg13[%c0_113, %c0_114], %391 {strides = array<i32>} : memref<8x128xf32, #tpu.memory_space<vmem>>, vector<8x128xf32>,
    %393 = vector.broadcast %387 : vector<8x1xf32> to vector<8x128xf32>
    %394 = arith.mulf %393, %383 : vector<8x128xf32>
    %395 = arith.index_cast %350 : i32 to index
    %c0_115 = arith.constant 0 : index
    %c0_116 = arith.constant 0 : index
    %396 = vector.load %arg9[%395, %c0_115, %c0_116] : memref<8x8x128xf32, #tpu.memory_space<vmem>>, vector<1x8x128xf32>
    %397 = vector.shape_cast %396 : vector<1x8x128xf32> to vector<8x128xf32>
    %398 = vector.shape_cast %394 : vector<8x128xf32> to vector<1x8x128xf32>
    tpu.vector_store %arg9[%395, %c0_115, %c0_116], %398 {strides = array<i32>} : memref<8x8x128xf32, #tpu.memory_space<vmem>>, vector<1x8x128xf32>,
    %c4_i32 = arith.constant 4 : i32
    %399 = arith.addi %10, %c4_i32 : i32
    %c0_117 = arith.constant 0 : index
    %c0_118 = arith.constant 0 : index
    %400 = vector.load %arg12[%c0_117, %c0_118] : memref<8x128xf32, #tpu.memory_space<vmem>>, vector<8x128xf32>
    %401 = arith.truncf %400 : vector<8x128xf32> to vector<8x128xbf16>
    %c0_119 = arith.constant 0 : index
    %c0_120 = arith.constant 0 : index
    %402 = vector.load %arg4[%c0_119, %c0_120] : memref<128x384xbf16, #tpu.memory_space<vmem>>, vector<128x384xbf16>
    %cst_121 = arith.constant dense<0.000000e+00> : vector<8x384xf32>
    %403 = tpu.matmul %401, %402, %cst_121 {dimension_numbers = #tpu.dot_dimension_numbers<[1], [0], [0], [1], [0, 0, 1, 1], [], []>} : vector<8x128xbf16>, vector<128x384xbf16>, vector<8x384xf32> -> vector<8x384xf32>
    %404 = arith.index_cast %c4_i32 : i32 to index
    %c0_122 = arith.constant 0 : index
    %c0_123 = arith.constant 0 : index
    %405 = vector.load %arg1[%404, %c0_122, %c0_123] : memref<8x8x384xf32, #tpu.memory_space<vmem>>, vector<1x8x384xf32>
    %406 = vector.shape_cast %405 : vector<1x8x384xf32> to vector<8x384xf32>
    %407 = vector.extract_strided_slice %406 {offsets = [0, 0], sizes = [8, 128], strides = [1, 1]} : vector<8x384xf32> to vector<8x128xf32>
    %408 = vector.extract_strided_slice %403 {offsets = [0, 0], sizes = [8, 128], strides = [1, 1]} : vector<8x384xf32> to vector<8x128xf32>
    %409 = arith.addf %407, %408 : vector<8x128xf32>
    %410 = arith.negf %409 : vector<8x128xf32>
    %411 = math.exp %410 : vector<8x128xf32>
    %cst_124 = arith.constant 1.000000e+00 : f32
    %412 = vector.broadcast %cst_124 : f32 to vector<8x128xf32>
    %413 = arith.addf %412, %411 : vector<8x128xf32>
    %414 = arith.divf %412, %413 : vector<8x128xf32>
    %415 = vector.extract_strided_slice %406 {offsets = [0, 128], sizes = [8, 128], strides = [1, 1]} : vector<8x384xf32> to vector<8x128xf32>
    %416 = vector.extract_strided_slice %403 {offsets = [0, 128], sizes = [8, 128], strides = [1, 1]} : vector<8x384xf32> to vector<8x128xf32>
    %417 = arith.addf %415, %416 : vector<8x128xf32>
    %418 = arith.negf %417 : vector<8x128xf32>
    %419 = math.exp %418 : vector<8x128xf32>
    %cst_125 = arith.constant 1.000000e+00 : f32
    %420 = vector.broadcast %cst_125 : f32 to vector<8x128xf32>
    %421 = arith.addf %420, %419 : vector<8x128xf32>
    %422 = arith.divf %420, %421 : vector<8x128xf32>
    %423 = vector.extract_strided_slice %406 {offsets = [0, 256], sizes = [8, 128], strides = [1, 1]} : vector<8x384xf32> to vector<8x128xf32>
    %424 = vector.extract_strided_slice %403 {offsets = [0, 256], sizes = [8, 128], strides = [1, 1]} : vector<8x384xf32> to vector<8x128xf32>
    %425 = arith.addf %424, %6 : vector<8x128xf32>
    %426 = arith.mulf %414, %425 : vector<8x128xf32>
    %427 = arith.addf %423, %426 : vector<8x128xf32>
    %428 = math.tanh %427 : vector<8x128xf32>
    %429 = arith.subf %400, %428 : vector<8x128xf32>
    %430 = arith.mulf %422, %429 : vector<8x128xf32>
    %431 = arith.addf %428, %430 : vector<8x128xf32>
    %432 = vector.broadcast %399 : i32 to vector<8x1xi32>
    %433 = arith.cmpi sgt, %3, %432 : vector<8x1xi32>
    %434 = arith.extui %433 : vector<8x1xi1> to vector<8x1xi32>
    %435 = arith.sitofp %434 : vector<8x1xi32> to vector<8x1xf32>
    %436 = arith.subf %431, %400 : vector<8x128xf32>
    %437 = vector.broadcast %435 : vector<8x1xf32> to vector<8x128xf32>
    %438 = arith.mulf %437, %436 : vector<8x128xf32>
    %439 = arith.addf %400, %438 : vector<8x128xf32>
    %c0_126 = arith.constant 0 : index
    %c0_127 = arith.constant 0 : index
    %440 = vector.load %arg12[%c0_126, %c0_127] : memref<8x128xf32, #tpu.memory_space<vmem>>, vector<8x128xf32>
    tpu.vector_store %arg12[%c0_126, %c0_127], %439 {strides = array<i32>} : memref<8x128xf32, #tpu.memory_space<vmem>>, vector<8x128xf32>,
    %441 = vector.broadcast %435 : vector<8x1xf32> to vector<8x128xf32>
    %442 = arith.mulf %441, %431 : vector<8x128xf32>
    %443 = arith.index_cast %c4_i32 : i32 to index
    %c0_128 = arith.constant 0 : index
    %c0_129 = arith.constant 0 : index
    %444 = vector.load %arg8[%443, %c0_128, %c0_129] : memref<8x8x128xf32, #tpu.memory_space<vmem>>, vector<1x8x128xf32>
    %445 = vector.shape_cast %444 : vector<1x8x128xf32> to vector<8x128xf32>
    %446 = vector.shape_cast %442 : vector<8x128xf32> to vector<1x8x128xf32>
    tpu.vector_store %arg8[%443, %c0_128, %c0_129], %446 {strides = array<i32>} : memref<8x8x128xf32, #tpu.memory_space<vmem>>, vector<1x8x128xf32>,
    %c7_i32_130 = arith.constant 7 : i32
    %447 = arith.subi %c7_i32_130, %c4_i32 : i32
    %c7_i32_131 = arith.constant 7 : i32
    %448 = arith.subi %c7_i32_131, %399 : i32
    %c0_132 = arith.constant 0 : index
    %c0_133 = arith.constant 0 : index
    %449 = vector.load %arg13[%c0_132, %c0_133] : memref<8x128xf32, #tpu.memory_space<vmem>>, vector<8x128xf32>
    %450 = arith.truncf %449 : vector<8x128xf32> to vector<8x128xbf16>
    %c0_134 = arith.constant 0 : index
    %c0_135 = arith.constant 0 : index
    %451 = vector.load %arg5[%c0_134, %c0_135] : memref<128x384xbf16, #tpu.memory_space<vmem>>, vector<128x384xbf16>
    %cst_136 = arith.constant dense<0.000000e+00> : vector<8x384xf32>
    %452 = tpu.matmul %450, %451, %cst_136 {dimension_numbers = #tpu.dot_dimension_numbers<[1], [0], [0], [1], [0, 0, 1, 1], [], []>} : vector<8x128xbf16>, vector<128x384xbf16>, vector<8x384xf32> -> vector<8x384xf32>
    %453 = arith.index_cast %447 : i32 to index
    %c0_137 = arith.constant 0 : index
    %c0_138 = arith.constant 0 : index
    %454 = vector.load %arg2[%453, %c0_137, %c0_138] : memref<8x8x384xf32, #tpu.memory_space<vmem>>, vector<1x8x384xf32>
    %455 = vector.shape_cast %454 : vector<1x8x384xf32> to vector<8x384xf32>
    %456 = vector.extract_strided_slice %455 {offsets = [0, 0], sizes = [8, 128], strides = [1, 1]} : vector<8x384xf32> to vector<8x128xf32>
    %457 = vector.extract_strided_slice %452 {offsets = [0, 0], sizes = [8, 128], strides = [1, 1]} : vector<8x384xf32> to vector<8x128xf32>
    %458 = arith.addf %456, %457 : vector<8x128xf32>
    %459 = arith.negf %458 : vector<8x128xf32>
    %460 = math.exp %459 : vector<8x128xf32>
    %cst_139 = arith.constant 1.000000e+00 : f32
    %461 = vector.broadcast %cst_139 : f32 to vector<8x128xf32>
    %462 = arith.addf %461, %460 : vector<8x128xf32>
    %463 = arith.divf %461, %462 : vector<8x128xf32>
    %464 = vector.extract_strided_slice %455 {offsets = [0, 128], sizes = [8, 128], strides = [1, 1]} : vector<8x384xf32> to vector<8x128xf32>
    %465 = vector.extract_strided_slice %452 {offsets = [0, 128], sizes = [8, 128], strides = [1, 1]} : vector<8x384xf32> to vector<8x128xf32>
    %466 = arith.addf %464, %465 : vector<8x128xf32>
    %467 = arith.negf %466 : vector<8x128xf32>
    %468 = math.exp %467 : vector<8x128xf32>
    %cst_140 = arith.constant 1.000000e+00 : f32
    %469 = vector.broadcast %cst_140 : f32 to vector<8x128xf32>
    %470 = arith.addf %469, %468 : vector<8x128xf32>
    %471 = arith.divf %469, %470 : vector<8x128xf32>
    %472 = vector.extract_strided_slice %455 {offsets = [0, 256], sizes = [8, 128], strides = [1, 1]} : vector<8x384xf32> to vector<8x128xf32>
    %473 = vector.extract_strided_slice %452 {offsets = [0, 256], sizes = [8, 128], strides = [1, 1]} : vector<8x384xf32> to vector<8x128xf32>
    %474 = arith.addf %473, %9 : vector<8x128xf32>
    %475 = arith.mulf %463, %474 : vector<8x128xf32>
    %476 = arith.addf %472, %475 : vector<8x128xf32>
    %477 = math.tanh %476 : vector<8x128xf32>
    %478 = arith.subf %449, %477 : vector<8x128xf32>
    %479 = arith.mulf %471, %478 : vector<8x128xf32>
    %480 = arith.addf %477, %479 : vector<8x128xf32>
    %481 = vector.broadcast %448 : i32 to vector<8x1xi32>
    %482 = arith.cmpi sgt, %3, %481 : vector<8x1xi32>
    %483 = arith.extui %482 : vector<8x1xi1> to vector<8x1xi32>
    %484 = arith.sitofp %483 : vector<8x1xi32> to vector<8x1xf32>
    %485 = arith.subf %480, %449 : vector<8x128xf32>
    %486 = vector.broadcast %484 : vector<8x1xf32> to vector<8x128xf32>
    %487 = arith.mulf %486, %485 : vector<8x128xf32>
    %488 = arith.addf %449, %487 : vector<8x128xf32>
    %c0_141 = arith.constant 0 : index
    %c0_142 = arith.constant 0 : index
    %489 = vector.load %arg13[%c0_141, %c0_142] : memref<8x128xf32, #tpu.memory_space<vmem>>, vector<8x128xf32>
    tpu.vector_store %arg13[%c0_141, %c0_142], %488 {strides = array<i32>} : memref<8x128xf32, #tpu.memory_space<vmem>>, vector<8x128xf32>,
    %490 = vector.broadcast %484 : vector<8x1xf32> to vector<8x128xf32>
    %491 = arith.mulf %490, %480 : vector<8x128xf32>
    %492 = arith.index_cast %447 : i32 to index
    %c0_143 = arith.constant 0 : index
    %c0_144 = arith.constant 0 : index
    %493 = vector.load %arg9[%492, %c0_143, %c0_144] : memref<8x8x128xf32, #tpu.memory_space<vmem>>, vector<1x8x128xf32>
    %494 = vector.shape_cast %493 : vector<1x8x128xf32> to vector<8x128xf32>
    %495 = vector.shape_cast %491 : vector<8x128xf32> to vector<1x8x128xf32>
    tpu.vector_store %arg9[%492, %c0_143, %c0_144], %495 {strides = array<i32>} : memref<8x8x128xf32, #tpu.memory_space<vmem>>, vector<1x8x128xf32>,
    %c5_i32 = arith.constant 5 : i32
    %496 = arith.addi %10, %c5_i32 : i32
    %c0_145 = arith.constant 0 : index
    %c0_146 = arith.constant 0 : index
    %497 = vector.load %arg12[%c0_145, %c0_146] : memref<8x128xf32, #tpu.memory_space<vmem>>, vector<8x128xf32>
    %498 = arith.truncf %497 : vector<8x128xf32> to vector<8x128xbf16>
    %c0_147 = arith.constant 0 : index
    %c0_148 = arith.constant 0 : index
    %499 = vector.load %arg4[%c0_147, %c0_148] : memref<128x384xbf16, #tpu.memory_space<vmem>>, vector<128x384xbf16>
    %cst_149 = arith.constant dense<0.000000e+00> : vector<8x384xf32>
    %500 = tpu.matmul %498, %499, %cst_149 {dimension_numbers = #tpu.dot_dimension_numbers<[1], [0], [0], [1], [0, 0, 1, 1], [], []>} : vector<8x128xbf16>, vector<128x384xbf16>, vector<8x384xf32> -> vector<8x384xf32>
    %501 = arith.index_cast %c5_i32 : i32 to index
    %c0_150 = arith.constant 0 : index
    %c0_151 = arith.constant 0 : index
    %502 = vector.load %arg1[%501, %c0_150, %c0_151] : memref<8x8x384xf32, #tpu.memory_space<vmem>>, vector<1x8x384xf32>
    %503 = vector.shape_cast %502 : vector<1x8x384xf32> to vector<8x384xf32>
    %504 = vector.extract_strided_slice %503 {offsets = [0, 0], sizes = [8, 128], strides = [1, 1]} : vector<8x384xf32> to vector<8x128xf32>
    %505 = vector.extract_strided_slice %500 {offsets = [0, 0], sizes = [8, 128], strides = [1, 1]} : vector<8x384xf32> to vector<8x128xf32>
    %506 = arith.addf %504, %505 : vector<8x128xf32>
    %507 = arith.negf %506 : vector<8x128xf32>
    %508 = math.exp %507 : vector<8x128xf32>
    %cst_152 = arith.constant 1.000000e+00 : f32
    %509 = vector.broadcast %cst_152 : f32 to vector<8x128xf32>
    %510 = arith.addf %509, %508 : vector<8x128xf32>
    %511 = arith.divf %509, %510 : vector<8x128xf32>
    %512 = vector.extract_strided_slice %503 {offsets = [0, 128], sizes = [8, 128], strides = [1, 1]} : vector<8x384xf32> to vector<8x128xf32>
    %513 = vector.extract_strided_slice %500 {offsets = [0, 128], sizes = [8, 128], strides = [1, 1]} : vector<8x384xf32> to vector<8x128xf32>
    %514 = arith.addf %512, %513 : vector<8x128xf32>
    %515 = arith.negf %514 : vector<8x128xf32>
    %516 = math.exp %515 : vector<8x128xf32>
    %cst_153 = arith.constant 1.000000e+00 : f32
    %517 = vector.broadcast %cst_153 : f32 to vector<8x128xf32>
    %518 = arith.addf %517, %516 : vector<8x128xf32>
    %519 = arith.divf %517, %518 : vector<8x128xf32>
    %520 = vector.extract_strided_slice %503 {offsets = [0, 256], sizes = [8, 128], strides = [1, 1]} : vector<8x384xf32> to vector<8x128xf32>
    %521 = vector.extract_strided_slice %500 {offsets = [0, 256], sizes = [8, 128], strides = [1, 1]} : vector<8x384xf32> to vector<8x128xf32>
    %522 = arith.addf %521, %6 : vector<8x128xf32>
    %523 = arith.mulf %511, %522 : vector<8x128xf32>
    %524 = arith.addf %520, %523 : vector<8x128xf32>
    %525 = math.tanh %524 : vector<8x128xf32>
    %526 = arith.subf %497, %525 : vector<8x128xf32>
    %527 = arith.mulf %519, %526 : vector<8x128xf32>
    %528 = arith.addf %525, %527 : vector<8x128xf32>
    %529 = vector.broadcast %496 : i32 to vector<8x1xi32>
    %530 = arith.cmpi sgt, %3, %529 : vector<8x1xi32>
    %531 = arith.extui %530 : vector<8x1xi1> to vector<8x1xi32>
    %532 = arith.sitofp %531 : vector<8x1xi32> to vector<8x1xf32>
    %533 = arith.subf %528, %497 : vector<8x128xf32>
    %534 = vector.broadcast %532 : vector<8x1xf32> to vector<8x128xf32>
    %535 = arith.mulf %534, %533 : vector<8x128xf32>
    %536 = arith.addf %497, %535 : vector<8x128xf32>
    %c0_154 = arith.constant 0 : index
    %c0_155 = arith.constant 0 : index
    %537 = vector.load %arg12[%c0_154, %c0_155] : memref<8x128xf32, #tpu.memory_space<vmem>>, vector<8x128xf32>
    tpu.vector_store %arg12[%c0_154, %c0_155], %536 {strides = array<i32>} : memref<8x128xf32, #tpu.memory_space<vmem>>, vector<8x128xf32>,
    %538 = vector.broadcast %532 : vector<8x1xf32> to vector<8x128xf32>
    %539 = arith.mulf %538, %528 : vector<8x128xf32>
    %540 = arith.index_cast %c5_i32 : i32 to index
    %c0_156 = arith.constant 0 : index
    %c0_157 = arith.constant 0 : index
    %541 = vector.load %arg8[%540, %c0_156, %c0_157] : memref<8x8x128xf32, #tpu.memory_space<vmem>>, vector<1x8x128xf32>
    %542 = vector.shape_cast %541 : vector<1x8x128xf32> to vector<8x128xf32>
    %543 = vector.shape_cast %539 : vector<8x128xf32> to vector<1x8x128xf32>
    tpu.vector_store %arg8[%540, %c0_156, %c0_157], %543 {strides = array<i32>} : memref<8x8x128xf32, #tpu.memory_space<vmem>>, vector<1x8x128xf32>,
    %c7_i32_158 = arith.constant 7 : i32
    %544 = arith.subi %c7_i32_158, %c5_i32 : i32
    %c7_i32_159 = arith.constant 7 : i32
    %545 = arith.subi %c7_i32_159, %496 : i32
    %c0_160 = arith.constant 0 : index
    %c0_161 = arith.constant 0 : index
    %546 = vector.load %arg13[%c0_160, %c0_161] : memref<8x128xf32, #tpu.memory_space<vmem>>, vector<8x128xf32>
    %547 = arith.truncf %546 : vector<8x128xf32> to vector<8x128xbf16>
    %c0_162 = arith.constant 0 : index
    %c0_163 = arith.constant 0 : index
    %548 = vector.load %arg5[%c0_162, %c0_163] : memref<128x384xbf16, #tpu.memory_space<vmem>>, vector<128x384xbf16>
    %cst_164 = arith.constant dense<0.000000e+00> : vector<8x384xf32>
    %549 = tpu.matmul %547, %548, %cst_164 {dimension_numbers = #tpu.dot_dimension_numbers<[1], [0], [0], [1], [0, 0, 1, 1], [], []>} : vector<8x128xbf16>, vector<128x384xbf16>, vector<8x384xf32> -> vector<8x384xf32>
    %550 = arith.index_cast %544 : i32 to index
    %c0_165 = arith.constant 0 : index
    %c0_166 = arith.constant 0 : index
    %551 = vector.load %arg2[%550, %c0_165, %c0_166] : memref<8x8x384xf32, #tpu.memory_space<vmem>>, vector<1x8x384xf32>
    %552 = vector.shape_cast %551 : vector<1x8x384xf32> to vector<8x384xf32>
    %553 = vector.extract_strided_slice %552 {offsets = [0, 0], sizes = [8, 128], strides = [1, 1]} : vector<8x384xf32> to vector<8x128xf32>
    %554 = vector.extract_strided_slice %549 {offsets = [0, 0], sizes = [8, 128], strides = [1, 1]} : vector<8x384xf32> to vector<8x128xf32>
    %555 = arith.addf %553, %554 : vector<8x128xf32>
    %556 = arith.negf %555 : vector<8x128xf32>
    %557 = math.exp %556 : vector<8x128xf32>
    %cst_167 = arith.constant 1.000000e+00 : f32
    %558 = vector.broadcast %cst_167 : f32 to vector<8x128xf32>
    %559 = arith.addf %558, %557 : vector<8x128xf32>
    %560 = arith.divf %558, %559 : vector<8x128xf32>
    %561 = vector.extract_strided_slice %552 {offsets = [0, 128], sizes = [8, 128], strides = [1, 1]} : vector<8x384xf32> to vector<8x128xf32>
    %562 = vector.extract_strided_slice %549 {offsets = [0, 128], sizes = [8, 128], strides = [1, 1]} : vector<8x384xf32> to vector<8x128xf32>
    %563 = arith.addf %561, %562 : vector<8x128xf32>
    %564 = arith.negf %563 : vector<8x128xf32>
    %565 = math.exp %564 : vector<8x128xf32>
    %cst_168 = arith.constant 1.000000e+00 : f32
    %566 = vector.broadcast %cst_168 : f32 to vector<8x128xf32>
    %567 = arith.addf %566, %565 : vector<8x128xf32>
    %568 = arith.divf %566, %567 : vector<8x128xf32>
    %569 = vector.extract_strided_slice %552 {offsets = [0, 256], sizes = [8, 128], strides = [1, 1]} : vector<8x384xf32> to vector<8x128xf32>
    %570 = vector.extract_strided_slice %549 {offsets = [0, 256], sizes = [8, 128], strides = [1, 1]} : vector<8x384xf32> to vector<8x128xf32>
    %571 = arith.addf %570, %9 : vector<8x128xf32>
    %572 = arith.mulf %560, %571 : vector<8x128xf32>
    %573 = arith.addf %569, %572 : vector<8x128xf32>
    %574 = math.tanh %573 : vector<8x128xf32>
    %575 = arith.subf %546, %574 : vector<8x128xf32>
    %576 = arith.mulf %568, %575 : vector<8x128xf32>
    %577 = arith.addf %574, %576 : vector<8x128xf32>
    %578 = vector.broadcast %545 : i32 to vector<8x1xi32>
    %579 = arith.cmpi sgt, %3, %578 : vector<8x1xi32>
    %580 = arith.extui %579 : vector<8x1xi1> to vector<8x1xi32>
    %581 = arith.sitofp %580 : vector<8x1xi32> to vector<8x1xf32>
    %582 = arith.subf %577, %546 : vector<8x128xf32>
    %583 = vector.broadcast %581 : vector<8x1xf32> to vector<8x128xf32>
    %584 = arith.mulf %583, %582 : vector<8x128xf32>
    %585 = arith.addf %546, %584 : vector<8x128xf32>
    %c0_169 = arith.constant 0 : index
    %c0_170 = arith.constant 0 : index
    %586 = vector.load %arg13[%c0_169, %c0_170] : memref<8x128xf32, #tpu.memory_space<vmem>>, vector<8x128xf32>
    tpu.vector_store %arg13[%c0_169, %c0_170], %585 {strides = array<i32>} : memref<8x128xf32, #tpu.memory_space<vmem>>, vector<8x128xf32>,
    %587 = vector.broadcast %581 : vector<8x1xf32> to vector<8x128xf32>
    %588 = arith.mulf %587, %577 : vector<8x128xf32>
    %589 = arith.index_cast %544 : i32 to index
    %c0_171 = arith.constant 0 : index
    %c0_172 = arith.constant 0 : index
    %590 = vector.load %arg9[%589, %c0_171, %c0_172] : memref<8x8x128xf32, #tpu.memory_space<vmem>>, vector<1x8x128xf32>
    %591 = vector.shape_cast %590 : vector<1x8x128xf32> to vector<8x128xf32>
    %592 = vector.shape_cast %588 : vector<8x128xf32> to vector<1x8x128xf32>
    tpu.vector_store %arg9[%589, %c0_171, %c0_172], %592 {strides = array<i32>} : memref<8x8x128xf32, #tpu.memory_space<vmem>>, vector<1x8x128xf32>,
    %c6_i32 = arith.constant 6 : i32
    %593 = arith.addi %10, %c6_i32 : i32
    %c0_173 = arith.constant 0 : index
    %c0_174 = arith.constant 0 : index
    %594 = vector.load %arg12[%c0_173, %c0_174] : memref<8x128xf32, #tpu.memory_space<vmem>>, vector<8x128xf32>
    %595 = arith.truncf %594 : vector<8x128xf32> to vector<8x128xbf16>
    %c0_175 = arith.constant 0 : index
    %c0_176 = arith.constant 0 : index
    %596 = vector.load %arg4[%c0_175, %c0_176] : memref<128x384xbf16, #tpu.memory_space<vmem>>, vector<128x384xbf16>
    %cst_177 = arith.constant dense<0.000000e+00> : vector<8x384xf32>
    %597 = tpu.matmul %595, %596, %cst_177 {dimension_numbers = #tpu.dot_dimension_numbers<[1], [0], [0], [1], [0, 0, 1, 1], [], []>} : vector<8x128xbf16>, vector<128x384xbf16>, vector<8x384xf32> -> vector<8x384xf32>
    %598 = arith.index_cast %c6_i32 : i32 to index
    %c0_178 = arith.constant 0 : index
    %c0_179 = arith.constant 0 : index
    %599 = vector.load %arg1[%598, %c0_178, %c0_179] : memref<8x8x384xf32, #tpu.memory_space<vmem>>, vector<1x8x384xf32>
    %600 = vector.shape_cast %599 : vector<1x8x384xf32> to vector<8x384xf32>
    %601 = vector.extract_strided_slice %600 {offsets = [0, 0], sizes = [8, 128], strides = [1, 1]} : vector<8x384xf32> to vector<8x128xf32>
    %602 = vector.extract_strided_slice %597 {offsets = [0, 0], sizes = [8, 128], strides = [1, 1]} : vector<8x384xf32> to vector<8x128xf32>
    %603 = arith.addf %601, %602 : vector<8x128xf32>
    %604 = arith.negf %603 : vector<8x128xf32>
    %605 = math.exp %604 : vector<8x128xf32>
    %cst_180 = arith.constant 1.000000e+00 : f32
    %606 = vector.broadcast %cst_180 : f32 to vector<8x128xf32>
    %607 = arith.addf %606, %605 : vector<8x128xf32>
    %608 = arith.divf %606, %607 : vector<8x128xf32>
    %609 = vector.extract_strided_slice %600 {offsets = [0, 128], sizes = [8, 128], strides = [1, 1]} : vector<8x384xf32> to vector<8x128xf32>
    %610 = vector.extract_strided_slice %597 {offsets = [0, 128], sizes = [8, 128], strides = [1, 1]} : vector<8x384xf32> to vector<8x128xf32>
    %611 = arith.addf %609, %610 : vector<8x128xf32>
    %612 = arith.negf %611 : vector<8x128xf32>
    %613 = math.exp %612 : vector<8x128xf32>
    %cst_181 = arith.constant 1.000000e+00 : f32
    %614 = vector.broadcast %cst_181 : f32 to vector<8x128xf32>
    %615 = arith.addf %614, %613 : vector<8x128xf32>
    %616 = arith.divf %614, %615 : vector<8x128xf32>
    %617 = vector.extract_strided_slice %600 {offsets = [0, 256], sizes = [8, 128], strides = [1, 1]} : vector<8x384xf32> to vector<8x128xf32>
    %618 = vector.extract_strided_slice %597 {offsets = [0, 256], sizes = [8, 128], strides = [1, 1]} : vector<8x384xf32> to vector<8x128xf32>
    %619 = arith.addf %618, %6 : vector<8x128xf32>
    %620 = arith.mulf %608, %619 : vector<8x128xf32>
    %621 = arith.addf %617, %620 : vector<8x128xf32>
    %622 = math.tanh %621 : vector<8x128xf32>
    %623 = arith.subf %594, %622 : vector<8x128xf32>
    %624 = arith.mulf %616, %623 : vector<8x128xf32>
    %625 = arith.addf %622, %624 : vector<8x128xf32>
    %626 = vector.broadcast %593 : i32 to vector<8x1xi32>
    %627 = arith.cmpi sgt, %3, %626 : vector<8x1xi32>
    %628 = arith.extui %627 : vector<8x1xi1> to vector<8x1xi32>
    %629 = arith.sitofp %628 : vector<8x1xi32> to vector<8x1xf32>
    %630 = arith.subf %625, %594 : vector<8x128xf32>
    %631 = vector.broadcast %629 : vector<8x1xf32> to vector<8x128xf32>
    %632 = arith.mulf %631, %630 : vector<8x128xf32>
    %633 = arith.addf %594, %632 : vector<8x128xf32>
    %c0_182 = arith.constant 0 : index
    %c0_183 = arith.constant 0 : index
    %634 = vector.load %arg12[%c0_182, %c0_183] : memref<8x128xf32, #tpu.memory_space<vmem>>, vector<8x128xf32>
    tpu.vector_store %arg12[%c0_182, %c0_183], %633 {strides = array<i32>} : memref<8x128xf32, #tpu.memory_space<vmem>>, vector<8x128xf32>,
    %635 = vector.broadcast %629 : vector<8x1xf32> to vector<8x128xf32>
    %636 = arith.mulf %635, %625 : vector<8x128xf32>
    %637 = arith.index_cast %c6_i32 : i32 to index
    %c0_184 = arith.constant 0 : index
    %c0_185 = arith.constant 0 : index
    %638 = vector.load %arg8[%637, %c0_184, %c0_185] : memref<8x8x128xf32, #tpu.memory_space<vmem>>, vector<1x8x128xf32>
    %639 = vector.shape_cast %638 : vector<1x8x128xf32> to vector<8x128xf32>
    %640 = vector.shape_cast %636 : vector<8x128xf32> to vector<1x8x128xf32>
    tpu.vector_store %arg8[%637, %c0_184, %c0_185], %640 {strides = array<i32>} : memref<8x8x128xf32, #tpu.memory_space<vmem>>, vector<1x8x128xf32>,
    %c7_i32_186 = arith.constant 7 : i32
    %641 = arith.subi %c7_i32_186, %c6_i32 : i32
    %c7_i32_187 = arith.constant 7 : i32
    %642 = arith.subi %c7_i32_187, %593 : i32
    %c0_188 = arith.constant 0 : index
    %c0_189 = arith.constant 0 : index
    %643 = vector.load %arg13[%c0_188, %c0_189] : memref<8x128xf32, #tpu.memory_space<vmem>>, vector<8x128xf32>
    %644 = arith.truncf %643 : vector<8x128xf32> to vector<8x128xbf16>
    %c0_190 = arith.constant 0 : index
    %c0_191 = arith.constant 0 : index
    %645 = vector.load %arg5[%c0_190, %c0_191] : memref<128x384xbf16, #tpu.memory_space<vmem>>, vector<128x384xbf16>
    %cst_192 = arith.constant dense<0.000000e+00> : vector<8x384xf32>
    %646 = tpu.matmul %644, %645, %cst_192 {dimension_numbers = #tpu.dot_dimension_numbers<[1], [0], [0], [1], [0, 0, 1, 1], [], []>} : vector<8x128xbf16>, vector<128x384xbf16>, vector<8x384xf32> -> vector<8x384xf32>
    %647 = arith.index_cast %641 : i32 to index
    %c0_193 = arith.constant 0 : index
    %c0_194 = arith.constant 0 : index
    %648 = vector.load %arg2[%647, %c0_193, %c0_194] : memref<8x8x384xf32, #tpu.memory_space<vmem>>, vector<1x8x384xf32>
    %649 = vector.shape_cast %648 : vector<1x8x384xf32> to vector<8x384xf32>
    %650 = vector.extract_strided_slice %649 {offsets = [0, 0], sizes = [8, 128], strides = [1, 1]} : vector<8x384xf32> to vector<8x128xf32>
    %651 = vector.extract_strided_slice %646 {offsets = [0, 0], sizes = [8, 128], strides = [1, 1]} : vector<8x384xf32> to vector<8x128xf32>
    %652 = arith.addf %650, %651 : vector<8x128xf32>
    %653 = arith.negf %652 : vector<8x128xf32>
    %654 = math.exp %653 : vector<8x128xf32>
    %cst_195 = arith.constant 1.000000e+00 : f32
    %655 = vector.broadcast %cst_195 : f32 to vector<8x128xf32>
    %656 = arith.addf %655, %654 : vector<8x128xf32>
    %657 = arith.divf %655, %656 : vector<8x128xf32>
    %658 = vector.extract_strided_slice %649 {offsets = [0, 128], sizes = [8, 128], strides = [1, 1]} : vector<8x384xf32> to vector<8x128xf32>
    %659 = vector.extract_strided_slice %646 {offsets = [0, 128], sizes = [8, 128], strides = [1, 1]} : vector<8x384xf32> to vector<8x128xf32>
    %660 = arith.addf %658, %659 : vector<8x128xf32>
    %661 = arith.negf %660 : vector<8x128xf32>
    %662 = math.exp %661 : vector<8x128xf32>
    %cst_196 = arith.constant 1.000000e+00 : f32
    %663 = vector.broadcast %cst_196 : f32 to vector<8x128xf32>
    %664 = arith.addf %663, %662 : vector<8x128xf32>
    %665 = arith.divf %663, %664 : vector<8x128xf32>
    %666 = vector.extract_strided_slice %649 {offsets = [0, 256], sizes = [8, 128], strides = [1, 1]} : vector<8x384xf32> to vector<8x128xf32>
    %667 = vector.extract_strided_slice %646 {offsets = [0, 256], sizes = [8, 128], strides = [1, 1]} : vector<8x384xf32> to vector<8x128xf32>
    %668 = arith.addf %667, %9 : vector<8x128xf32>
    %669 = arith.mulf %657, %668 : vector<8x128xf32>
    %670 = arith.addf %666, %669 : vector<8x128xf32>
    %671 = math.tanh %670 : vector<8x128xf32>
    %672 = arith.subf %643, %671 : vector<8x128xf32>
    %673 = arith.mulf %665, %672 : vector<8x128xf32>
    %674 = arith.addf %671, %673 : vector<8x128xf32>
    %675 = vector.broadcast %642 : i32 to vector<8x1xi32>
    %676 = arith.cmpi sgt, %3, %675 : vector<8x1xi32>
    %677 = arith.extui %676 : vector<8x1xi1> to vector<8x1xi32>
    %678 = arith.sitofp %677 : vector<8x1xi32> to vector<8x1xf32>
    %679 = arith.subf %674, %643 : vector<8x128xf32>
    %680 = vector.broadcast %678 : vector<8x1xf32> to vector<8x128xf32>
    %681 = arith.mulf %680, %679 : vector<8x128xf32>
    %682 = arith.addf %643, %681 : vector<8x128xf32>
    %c0_197 = arith.constant 0 : index
    %c0_198 = arith.constant 0 : index
    %683 = vector.load %arg13[%c0_197, %c0_198] : memref<8x128xf32, #tpu.memory_space<vmem>>, vector<8x128xf32>
    tpu.vector_store %arg13[%c0_197, %c0_198], %682 {strides = array<i32>} : memref<8x128xf32, #tpu.memory_space<vmem>>, vector<8x128xf32>,
    %684 = vector.broadcast %678 : vector<8x1xf32> to vector<8x128xf32>
    %685 = arith.mulf %684, %674 : vector<8x128xf32>
    %686 = arith.index_cast %641 : i32 to index
    %c0_199 = arith.constant 0 : index
    %c0_200 = arith.constant 0 : index
    %687 = vector.load %arg9[%686, %c0_199, %c0_200] : memref<8x8x128xf32, #tpu.memory_space<vmem>>, vector<1x8x128xf32>
    %688 = vector.shape_cast %687 : vector<1x8x128xf32> to vector<8x128xf32>
    %689 = vector.shape_cast %685 : vector<8x128xf32> to vector<1x8x128xf32>
    tpu.vector_store %arg9[%686, %c0_199, %c0_200], %689 {strides = array<i32>} : memref<8x8x128xf32, #tpu.memory_space<vmem>>, vector<1x8x128xf32>,
    %c7_i32_201 = arith.constant 7 : i32
    %690 = arith.addi %10, %c7_i32_201 : i32
    %c0_202 = arith.constant 0 : index
    %c0_203 = arith.constant 0 : index
    %691 = vector.load %arg12[%c0_202, %c0_203] : memref<8x128xf32, #tpu.memory_space<vmem>>, vector<8x128xf32>
    %692 = arith.truncf %691 : vector<8x128xf32> to vector<8x128xbf16>
    %c0_204 = arith.constant 0 : index
    %c0_205 = arith.constant 0 : index
    %693 = vector.load %arg4[%c0_204, %c0_205] : memref<128x384xbf16, #tpu.memory_space<vmem>>, vector<128x384xbf16>
    %cst_206 = arith.constant dense<0.000000e+00> : vector<8x384xf32>
    %694 = tpu.matmul %692, %693, %cst_206 {dimension_numbers = #tpu.dot_dimension_numbers<[1], [0], [0], [1], [0, 0, 1, 1], [], []>} : vector<8x128xbf16>, vector<128x384xbf16>, vector<8x384xf32> -> vector<8x384xf32>
    %695 = arith.index_cast %c7_i32_201 : i32 to index
    %c0_207 = arith.constant 0 : index
    %c0_208 = arith.constant 0 : index
    %696 = vector.load %arg1[%695, %c0_207, %c0_208] : memref<8x8x384xf32, #tpu.memory_space<vmem>>, vector<1x8x384xf32>
    %697 = vector.shape_cast %696 : vector<1x8x384xf32> to vector<8x384xf32>
    %698 = vector.extract_strided_slice %697 {offsets = [0, 0], sizes = [8, 128], strides = [1, 1]} : vector<8x384xf32> to vector<8x128xf32>
    %699 = vector.extract_strided_slice %694 {offsets = [0, 0], sizes = [8, 128], strides = [1, 1]} : vector<8x384xf32> to vector<8x128xf32>
    %700 = arith.addf %698, %699 : vector<8x128xf32>
    %701 = arith.negf %700 : vector<8x128xf32>
    %702 = math.exp %701 : vector<8x128xf32>
    %cst_209 = arith.constant 1.000000e+00 : f32
    %703 = vector.broadcast %cst_209 : f32 to vector<8x128xf32>
    %704 = arith.addf %703, %702 : vector<8x128xf32>
    %705 = arith.divf %703, %704 : vector<8x128xf32>
    %706 = vector.extract_strided_slice %697 {offsets = [0, 128], sizes = [8, 128], strides = [1, 1]} : vector<8x384xf32> to vector<8x128xf32>
    %707 = vector.extract_strided_slice %694 {offsets = [0, 128], sizes = [8, 128], strides = [1, 1]} : vector<8x384xf32> to vector<8x128xf32>
    %708 = arith.addf %706, %707 : vector<8x128xf32>
    %709 = arith.negf %708 : vector<8x128xf32>
    %710 = math.exp %709 : vector<8x128xf32>
    %cst_210 = arith.constant 1.000000e+00 : f32
    %711 = vector.broadcast %cst_210 : f32 to vector<8x128xf32>
    %712 = arith.addf %711, %710 : vector<8x128xf32>
    %713 = arith.divf %711, %712 : vector<8x128xf32>
    %714 = vector.extract_strided_slice %697 {offsets = [0, 256], sizes = [8, 128], strides = [1, 1]} : vector<8x384xf32> to vector<8x128xf32>
    %715 = vector.extract_strided_slice %694 {offsets = [0, 256], sizes = [8, 128], strides = [1, 1]} : vector<8x384xf32> to vector<8x128xf32>
    %716 = arith.addf %715, %6 : vector<8x128xf32>
    %717 = arith.mulf %705, %716 : vector<8x128xf32>
    %718 = arith.addf %714, %717 : vector<8x128xf32>
    %719 = math.tanh %718 : vector<8x128xf32>
    %720 = arith.subf %691, %719 : vector<8x128xf32>
    %721 = arith.mulf %713, %720 : vector<8x128xf32>
    %722 = arith.addf %719, %721 : vector<8x128xf32>
    %723 = vector.broadcast %690 : i32 to vector<8x1xi32>
    %724 = arith.cmpi sgt, %3, %723 : vector<8x1xi32>
    %725 = arith.extui %724 : vector<8x1xi1> to vector<8x1xi32>
    %726 = arith.sitofp %725 : vector<8x1xi32> to vector<8x1xf32>
    %727 = arith.subf %722, %691 : vector<8x128xf32>
    %728 = vector.broadcast %726 : vector<8x1xf32> to vector<8x128xf32>
    %729 = arith.mulf %728, %727 : vector<8x128xf32>
    %730 = arith.addf %691, %729 : vector<8x128xf32>
    %c0_211 = arith.constant 0 : index
    %c0_212 = arith.constant 0 : index
    %731 = vector.load %arg12[%c0_211, %c0_212] : memref<8x128xf32, #tpu.memory_space<vmem>>, vector<8x128xf32>
    tpu.vector_store %arg12[%c0_211, %c0_212], %730 {strides = array<i32>} : memref<8x128xf32, #tpu.memory_space<vmem>>, vector<8x128xf32>,
    %732 = vector.broadcast %726 : vector<8x1xf32> to vector<8x128xf32>
    %733 = arith.mulf %732, %722 : vector<8x128xf32>
    %734 = arith.index_cast %c7_i32_201 : i32 to index
    %c0_213 = arith.constant 0 : index
    %c0_214 = arith.constant 0 : index
    %735 = vector.load %arg8[%734, %c0_213, %c0_214] : memref<8x8x128xf32, #tpu.memory_space<vmem>>, vector<1x8x128xf32>
    %736 = vector.shape_cast %735 : vector<1x8x128xf32> to vector<8x128xf32>
    %737 = vector.shape_cast %733 : vector<8x128xf32> to vector<1x8x128xf32>
    tpu.vector_store %arg8[%734, %c0_213, %c0_214], %737 {strides = array<i32>} : memref<8x8x128xf32, #tpu.memory_space<vmem>>, vector<1x8x128xf32>,
    %c7_i32_215 = arith.constant 7 : i32
    %738 = arith.subi %c7_i32_215, %c7_i32_201 : i32
    %c7_i32_216 = arith.constant 7 : i32
    %739 = arith.subi %c7_i32_216, %690 : i32
    %c0_217 = arith.constant 0 : index
    %c0_218 = arith.constant 0 : index
    %740 = vector.load %arg13[%c0_217, %c0_218] : memref<8x128xf32, #tpu.memory_space<vmem>>, vector<8x128xf32>
    %741 = arith.truncf %740 : vector<8x128xf32> to vector<8x128xbf16>
    %c0_219 = arith.constant 0 : index
    %c0_220 = arith.constant 0 : index
    %742 = vector.load %arg5[%c0_219, %c0_220] : memref<128x384xbf16, #tpu.memory_space<vmem>>, vector<128x384xbf16>
    %cst_221 = arith.constant dense<0.000000e+00> : vector<8x384xf32>
    %743 = tpu.matmul %741, %742, %cst_221 {dimension_numbers = #tpu.dot_dimension_numbers<[1], [0], [0], [1], [0, 0, 1, 1], [], []>} : vector<8x128xbf16>, vector<128x384xbf16>, vector<8x384xf32> -> vector<8x384xf32>
    %744 = arith.index_cast %738 : i32 to index
    %c0_222 = arith.constant 0 : index
    %c0_223 = arith.constant 0 : index
    %745 = vector.load %arg2[%744, %c0_222, %c0_223] : memref<8x8x384xf32, #tpu.memory_space<vmem>>, vector<1x8x384xf32>
    %746 = vector.shape_cast %745 : vector<1x8x384xf32> to vector<8x384xf32>
    %747 = vector.extract_strided_slice %746 {offsets = [0, 0], sizes = [8, 128], strides = [1, 1]} : vector<8x384xf32> to vector<8x128xf32>
    %748 = vector.extract_strided_slice %743 {offsets = [0, 0], sizes = [8, 128], strides = [1, 1]} : vector<8x384xf32> to vector<8x128xf32>
    %749 = arith.addf %747, %748 : vector<8x128xf32>
    %750 = arith.negf %749 : vector<8x128xf32>
    %751 = math.exp %750 : vector<8x128xf32>
    %cst_224 = arith.constant 1.000000e+00 : f32
    %752 = vector.broadcast %cst_224 : f32 to vector<8x128xf32>
    %753 = arith.addf %752, %751 : vector<8x128xf32>
    %754 = arith.divf %752, %753 : vector<8x128xf32>
    %755 = vector.extract_strided_slice %746 {offsets = [0, 128], sizes = [8, 128], strides = [1, 1]} : vector<8x384xf32> to vector<8x128xf32>
    %756 = vector.extract_strided_slice %743 {offsets = [0, 128], sizes = [8, 128], strides = [1, 1]} : vector<8x384xf32> to vector<8x128xf32>
    %757 = arith.addf %755, %756 : vector<8x128xf32>
    %758 = arith.negf %757 : vector<8x128xf32>
    %759 = math.exp %758 : vector<8x128xf32>
    %cst_225 = arith.constant 1.000000e+00 : f32
    %760 = vector.broadcast %cst_225 : f32 to vector<8x128xf32>
    %761 = arith.addf %760, %759 : vector<8x128xf32>
    %762 = arith.divf %760, %761 : vector<8x128xf32>
    %763 = vector.extract_strided_slice %746 {offsets = [0, 256], sizes = [8, 128], strides = [1, 1]} : vector<8x384xf32> to vector<8x128xf32>
    %764 = vector.extract_strided_slice %743 {offsets = [0, 256], sizes = [8, 128], strides = [1, 1]} : vector<8x384xf32> to vector<8x128xf32>
    %765 = arith.addf %764, %9 : vector<8x128xf32>
    %766 = arith.mulf %754, %765 : vector<8x128xf32>
    %767 = arith.addf %763, %766 : vector<8x128xf32>
    %768 = math.tanh %767 : vector<8x128xf32>
    %769 = arith.subf %740, %768 : vector<8x128xf32>
    %770 = arith.mulf %762, %769 : vector<8x128xf32>
    %771 = arith.addf %768, %770 : vector<8x128xf32>
    %772 = vector.broadcast %739 : i32 to vector<8x1xi32>
    %773 = arith.cmpi sgt, %3, %772 : vector<8x1xi32>
    %774 = arith.extui %773 : vector<8x1xi1> to vector<8x1xi32>
    %775 = arith.sitofp %774 : vector<8x1xi32> to vector<8x1xf32>
    %776 = arith.subf %771, %740 : vector<8x128xf32>
    %777 = vector.broadcast %775 : vector<8x1xf32> to vector<8x128xf32>
    %778 = arith.mulf %777, %776 : vector<8x128xf32>
    %779 = arith.addf %740, %778 : vector<8x128xf32>
    %c0_226 = arith.constant 0 : index
    %c0_227 = arith.constant 0 : index
    %780 = vector.load %arg13[%c0_226, %c0_227] : memref<8x128xf32, #tpu.memory_space<vmem>>, vector<8x128xf32>
    tpu.vector_store %arg13[%c0_226, %c0_227], %779 {strides = array<i32>} : memref<8x128xf32, #tpu.memory_space<vmem>>, vector<8x128xf32>,
    %781 = vector.broadcast %775 : vector<8x1xf32> to vector<8x128xf32>
    %782 = arith.mulf %781, %771 : vector<8x128xf32>
    %783 = arith.index_cast %738 : i32 to index
    %c0_228 = arith.constant 0 : index
    %c0_229 = arith.constant 0 : index
    %784 = vector.load %arg9[%783, %c0_228, %c0_229] : memref<8x8x128xf32, #tpu.memory_space<vmem>>, vector<1x8x128xf32>
    %785 = vector.shape_cast %784 : vector<1x8x128xf32> to vector<8x128xf32>
    %786 = vector.shape_cast %782 : vector<8x128xf32> to vector<1x8x128xf32>
    tpu.vector_store %arg9[%783, %c0_228, %c0_229], %786 {strides = array<i32>} : memref<8x8x128xf32, #tpu.memory_space<vmem>>, vector<1x8x128xf32>,
    %c8_i32_230 = arith.constant 8 : i32
    %c0_231 = arith.constant 0 : index
    %c0_232 = arith.constant 0 : index
    %787 = vector.load %arg12[%c0_231, %c0_232] : memref<8x128xf32, #tpu.memory_space<vmem>>, vector<8x128xf32>
    %c0_233 = arith.constant 0 : index
    %c0_234 = arith.constant 0 : index
    %788 = vector.load %arg10[%c0_233, %c0_234] : memref<8x128xf32, #tpu.memory_space<vmem>>, vector<8x128xf32>
    tpu.vector_store %arg10[%c0_233, %c0_234], %787 {strides = array<i32>} : memref<8x128xf32, #tpu.memory_space<vmem>>, vector<8x128xf32>,
    %c0_235 = arith.constant 0 : index
    %c0_236 = arith.constant 0 : index
    %789 = vector.load %arg13[%c0_235, %c0_236] : memref<8x128xf32, #tpu.memory_space<vmem>>, vector<8x128xf32>
    %c0_237 = arith.constant 0 : index
    %c0_238 = arith.constant 0 : index
    %790 = vector.load %arg11[%c0_237, %c0_238] : memref<8x128xf32, #tpu.memory_space<vmem>>, vector<8x128xf32>
    tpu.vector_store %arg11[%c0_237, %c0_238], %789 {strides = array<i32>} : memref<8x128xf32, #tpu.memory_space<vmem>>, vector<8x128xf32>,
    return
  }
  func.func @transform_0(%arg0: i32) -> (i32, i32, i32) {
    %c0_i32 = arith.constant 0 : i32
    %c0_i32_0 = arith.constant 0 : i32
    %c0_i32_1 = arith.constant 0 : i32
    return %arg0, %c0_i32, %c0_i32_0 : i32, i32, i32
  }
  func.func @transform_1(%arg0: i32) -> (i32, i32, i32) {
    %c0_i32 = arith.constant 0 : i32
    %0 = arith.subi %c0_i32, %arg0 : i32
    %c0_i32_0 = arith.constant 0 : i32
    %c0_i32_1 = arith.constant 0 : i32
    %c0_i32_2 = arith.constant 0 : i32
    return %0, %c0_i32_0, %c0_i32_1 : i32, i32, i32
  }
  func.func @transform_2(%arg0: i32) -> (i32, i32) {
    %c0_i32 = arith.constant 0 : i32
    %c0_i32_0 = arith.constant 0 : i32
    %c0_i32_1 = arith.constant 0 : i32
    return %c0_i32, %c0_i32_0 : i32, i32
  }
  func.func @transform_3(%arg0: i32) -> (i32, i32) {
    %c0_i32 = arith.constant 0 : i32
    %c0_i32_0 = arith.constant 0 : i32
    %c0_i32_1 = arith.constant 0 : i32
    return %c0_i32, %c0_i32_0 : i32, i32
  }
  func.func @transform_4(%arg0: i32) -> (i32, i32) {
    %c0_i32 = arith.constant 0 : i32
    %c0_i32_0 = arith.constant 0 : i32
    %c0_i32_1 = arith.constant 0 : i32
    return %c0_i32, %c0_i32_0 : i32, i32
  }
  func.func @transform_5(%arg0: i32) -> (i32, i32) {
    %c0_i32 = arith.constant 0 : i32
    %c0_i32_0 = arith.constant 0 : i32
    %c0_i32_1 = arith.constant 0 : i32
    return %c0_i32, %c0_i32_0 : i32, i32
  }
  func.func @transform_6(%arg0: i32) -> (i32, i32) {
    %c0_i32 = arith.constant 0 : i32
    %c0_i32_0 = arith.constant 0 : i32
    %c0_i32_1 = arith.constant 0 : i32
    return %c0_i32, %c0_i32_0 : i32, i32
  }
  func.func @transform_7(%arg0: i32) -> (i32, i32, i32) {
    %c0_i32 = arith.constant 0 : i32
    %c0_i32_0 = arith.constant 0 : i32
    %c0_i32_1 = arith.constant 0 : i32
    return %arg0, %c0_i32, %c0_i32_0 : i32, i32, i32
  }
  func.func @transform_8(%arg0: i32) -> (i32, i32, i32) {
    %c0_i32 = arith.constant 0 : i32
    %0 = arith.subi %c0_i32, %arg0 : i32
    %c0_i32_0 = arith.constant 0 : i32
    %c0_i32_1 = arith.constant 0 : i32
    %c0_i32_2 = arith.constant 0 : i32
    return %0, %c0_i32_0, %c0_i32_1 : i32, i32, i32
  }
  func.func @transform_9(%arg0: i32) -> (i32, i32) {
    %c0_i32 = arith.constant 0 : i32
    %c0_i32_0 = arith.constant 0 : i32
    %c0_i32_1 = arith.constant 0 : i32
    return %c0_i32, %c0_i32_0 : i32, i32
  }
  func.func @transform_10(%arg0: i32) -> (i32, i32) {
    %c0_i32 = arith.constant 0 : i32
    %c0_i32_0 = arith.constant 0 : i32
    %c0_i32_1 = arith.constant 0 : i32
    return %c0_i32, %c0_i32_0 : i32, i32
  }
}

</mosaic_0001>

<bundles_post_ra>
// kernel: bigru_encoder_forward.2
= control target key start
LH: loop header
LB: loop body
LE: loop exit
PB: predicated region body
PF: predicated region fallthrough
CT: control target
= control target key end

     0   :  { %v6098_v2 = vmov 0.0   ;;  %v6099_v3 = vmov 0   ;;  %vm6100_vm0 = vmmov 0   ;;  %v6101_v31 = vmov 0.0|0.0   ;;  %s7853_s3 = inlined_call_operand.vmem [shape: bf16[128,384], index: 3, kind: input, shape index: {}]   ;;  %s7854_s4 = inlined_call_operand.vmem [shape: bf16[128,384], index: 4, kind: input, shape index: {}]   ;;  %s7855_s2 = inlined_call_operand.vmem [shape: s32[8,1], index: 2, kind: input, shape index: {}]   ;;  %s7856_s0 = inlined_call_operand.vmem [shape: f32[8,8,384], index: 0, kind: input, shape index: {}]   ;;  %s7857_s5 = inlined_call_operand.vmem [shape: f32[1,128], index: 5, kind: input, shape index: {}]   ;;  %s7858_s1 = inlined_call_operand.vmem [shape: f32[8,8,384], index: 1, kind: input, shape index: {}]   ;;  %s7859_s7 = inlined_call_operand.vmem [shape: f32[8,8,128], index: 7, kind: output, shape index: {0}]   ;;  %s7860_s6 = inlined_call_operand.vmem [shape: f32[1,128], index: 6, kind: input, shape index: {}]   ;;  %s7861_s8 = inlined_call_operand.vmem [shape: f32[8,8,128], index: 8, kind: output, shape index: {1}]   ;;  %s7862_s9 = inlined_call_operand.vmem [shape: f32[8,128], index: 9, kind: output, shape index: {2}]   ;;  %s7863_s10 = inlined_call_operand.vmem [shape: f32[8,128], index: 10, kind: output, shape index: {3}]  }
   0x1   :  { %v94_v0 = vld [vmem:[%s7853_s3] sm:$0xff]  ;;  %v96_v1 = vld [vmem:[%s7853_s3 + $0xc] sm:$0xff]  ;;  %5329 = vmatprep.subr.bf16.mxu1 %v6098_v2  ;;  %286 = vmatprep.mubr.bf16.mxu0 %v6099_v3  ;;  %v6172_v6 = vld [vmem:[%s7853_s3 + $0x1c] ss:$12 sps:$4 sm:$0xff]  }
   0x2   :  { %v6165_v4 = vcombine.high %v94_v0, %v96_v1  ;;  %v6167_v5 = vcombine.low %v94_v0, %v96_v1  ;;  %5345 = vmatprep.mubr.msk.bf16.mxu1 %vm6100_vm0, %v6098_v2  ;;  %5653 = vset.pattern.permute.xlu0 %v6099_v3  ;;  %v6183_v7 = vld [vmem:[%s7853_s3 + $0x18] ss:$12 sps:$4 sm:$0xff]   ;;  %v6189_v8 = vld [vmem:[%s7853_s3 + $0x34] ss:$12 sps:$4 sm:$0xff]   ;;  %v6195_v9 = vld [vmem:[%s7853_s3 + $0x30] ss:$12 sps:$4 sm:$0xff]  }
   0x3   :  { %5654 = vset.pattern.permute.xlu1 %v6099_v3  ;;  %v6201_v10 = vld [vmem:[%s7853_s3 + $0x4c] ss:$12 sps:$4 sm:$0xff]   ;;  %v5679_v11 = vld [vmem:[%s7853_s3 + $0x8] ss:$12 sps:$4 sm:$0xff]   ;;  %v6220_v14 = vld [vmem:[%s7853_s3 + $0x64] ss:$12 sps:$4 sm:$0xff]  }
   0x4   :  { %254 = vmatprep.subr.bf16.mxu0 %v6165_v4  ;;  %5330 = vmatpush3.bf16.msra.mxu1 %v5679_v11  ;;  %v5683_v12 = vld [vmem:[%s7853_s3 + $0x20] ss:$12 sps:$4 sm:$0xff]   ;;  %v6213_v13 = vld [vmem:[%s7853_s3 + $0x48] ss:$12 sps:$4 sm:$0xff]   ;;  %v5685_v15 = vld [vmem:[%s7853_s3 + $0x38] ss:$12 sps:$4 sm:$0xff]  }
   0x5   :  { %255 = vmatpush1.bf16.msra.mxu0 %v6167_v5  ;;  %5331 = vmatprep.subr.bf16.mxu1 %v6098_v2  ;;  %v6229_v16 = vld [vmem:[%s7853_s3 + $0x60] ss:$12 sps:$4 sm:$0xff]   ;;  %v6236_v17 = vld [vmem:[%s7853_s3 + $0x7c] ss:$12 sps:$4 sm:$0xff]   ;;  %v6245_v19 = vld [vmem:[%s7853_s3 + $0x78] ss:$12 sps:$4 sm:$0xff]  }
   0x6   :  { %256 = vmatprep.subr.bf16.mxu0 %v6172_v6  ;;  %v5689_v18 = vld [vmem:[%s7853_s3 + $0x50] ss:$12 sps:$4 sm:$0xff]   ;;  %v6252_v20 = vld [vmem:[%s7853_s3 + $0x94] ss:$12 sps:$4 sm:$0xff]   ;;  %v6268_v23 = vld [vmem:[%s7853_s3 + $0xac] ss:$12 sps:$4 sm:$0xff]  }
   0x7   :  { %v5693_v21 = vld [vmem:[%s7853_s3 + $0x68] ss:$12 sps:$4 sm:$0xff]   ;;  %v6261_v22 = vld [vmem:[%s7853_s3 + $0x90] ss:$12 sps:$4 sm:$0xff]   ;;  %v5697_v24 = vld [vmem:[%s7853_s3 + $0x80] ss:$12 sps:$4 sm:$0xff]  }
   0x8   :  { %5332 = vmatpush3.bf16.msra.mxu1 %v5683_v12  ;;  %v6277_v25 = vld [vmem:[%s7853_s3 + $0xa8] ss:$12 sps:$4 sm:$0xff]   ;;  %v6284_v26 = vld [vmem:[%s7854_s4 + $0x4] ss:$12 sps:$4 sm:$0xff]   ;;  %v6293_v28 = vld [vmem:[%s7854_s4] ss:$12 sps:$4 sm:$0xff]  }
   0x9   :  { %257 = vmatpush1.bf16.msra.mxu0 %v6183_v7  ;;  %5333 = vmatprep.subr.bf16.mxu1 %v6098_v2  ;;  %v5701_v27 = vld [vmem:[%s7853_s3 + $0x98] ss:$12 sps:$4 sm:$0xff]   ;;  %v6300_v29 = vld [vmem:[%s7854_s4 + $0x1c] ss:$12 sps:$4 sm:$0xff]   ;;  %v6315_v33 = vld [vmem:[%s7854_s4 + $0x34] ss:$12 sps:$4 sm:$0xff]  }
   0xa   :  { %258 = vmatprep.subr.bf16.mxu0 %v6189_v8  ;;  %v6305_v30 = vld [vmem:[%s7854_s4 + $0x18] ss:$12 sps:$4 sm:$0xff]   ;;  %v5705_v32 = vld [vmem:[%s7853_s3 + $0xb0] ss:$12 sps:$4 sm:$0xff]   ;;  %v5712_v38 = vld [vmem:[%s7854_s4 + $0x8] ss:$12 sps:$4 sm:$0xff]  }
   0xb   :  { %v6321_v34 = vld [vmem:[%s7855_s2] sm:$0xff]  ;;  %v6332_v35 = vld [vmem:[%s7854_s4 + $0x30] ss:$12 sps:$4 sm:$0xff]   ;;  %v6340_v37 = vld [vmem:[%s7854_s4 + $0x4c] ss:$12 sps:$4 sm:$0xff]  }
   0xc   :  { %5334 = vmatpush3.bf16.msra.mxu1 %v5685_v15  ;;  %vm360_vm1 = vcmp.gt.s32.totalorder %v6321_v34, 0  ;;  %vm644_vm2 = vcmp.gt.s32.totalorder %v6321_v34, 7  ;;  %vm1499_vm3 = vcmp.gt.s32.totalorder %v6321_v34, 2  ;;  %vm2069_vm4 = vcmp.gt.s32.totalorder %v6321_v34, 3  ;;  %v5716_v42 = vld [vmem:[%s7854_s4 + $0x20] ss:$12 sps:$4 sm:$0xff]  }
   0xd   :  { %259 = vmatpush1.bf16.msra.mxu0 %v6195_v9  ;;  %5335 = vmatprep.subr.bf16.mxu1 %v6098_v2  ;;  %v6335_v36 = vsel %vm360_vm1, 1.0, %v6098_v2  ;;  %v6349_v39 = vsel %vm644_vm2, 1.0, %v6098_v2  ;;  %v6352_v40 = vsel %vm1499_vm3, 1.0, %v6098_v2  ;;  %v6355_v41 = vsel %vm2069_vm4, 1.0, %v6098_v2  ;;  %v6364_v43 = vld [vmem:[%s7854_s4 + $0x48] ss:$12 sps:$4 sm:$0xff]  }
   0xe   :  { %260 = vmatprep.subr.bf16.mxu0 %v6201_v10  ;;  %366 = vperm.xlu0 %5653, %v6335_v36   ;;  %v6370_v44 = vld [vmem:[%s7854_s4 + $0x64] ss:$12 sps:$4 sm:$0xff]   ;;  %v6384_v46 = vld [vmem:[%s7854_s4 + $0x60] ss:$12 sps:$4 sm:$0xff]   ;;  %v6389_v47 = vld [vmem:[%s7854_s4 + $0x7c] ss:$12 sps:$4 sm:$0xff]   ;;  %v5655_v61 = vpack.i.bf16 %v6335_v36, %v6349_v39 }
   0xf   :  { %v5717_v45 = vld [vmem:[%s7854_s4 + $0x38] ss:$12 sps:$4 sm:$0xff]   ;;  %v5718_v48 = vld [vmem:[%s7854_s4 + $0x50] ss:$12 sps:$4 sm:$0xff]   ;;  %v6406_v50 = vld [vmem:[%s7854_s4 + $0x94] ss:$12 sps:$4 sm:$0xff]  }
  0x10   :  { %5336 = vmatpush3.bf16.msra.mxu1 %v5689_v18  ;;  %v6401_v49 = vld [vmem:[%s7854_s4 + $0x78] ss:$12 sps:$4 sm:$0xff]   ;;  %vm2354_vm5 = vcmp.gt.s32.totalorder %v6321_v34, 4  ;;  %v5719_v51 = vld [vmem:[%s7854_s4 + $0x68] ss:$12 sps:$4 sm:$0xff]   ;;  %vm1784_vm6 = vcmp.gt.s32.totalorder %v6321_v34, 5 }
  0x11   :  { %261 = vmatpush1.bf16.msra.mxu0 %v6213_v13  ;;  %5337 = vmatprep.subr.bf16.mxu1 %v6098_v2  ;;  %v6419_v52 = vld [vmem:[%s7854_s4 + $0x90] ss:$12 sps:$4 sm:$0xff]   ;;  %v6422_v53 = vsel %vm2354_vm5, 1.0, %v6098_v2  ;;  %v6427_v54 = vld [vmem:[%s7854_s4 + $0xac] ss:$12 sps:$4 sm:$0xff]   ;;  %v6443_v57 = vsel %vm1784_vm6, 1.0, %v6098_v2 }
  0x12   :  { %262 = vmatprep.subr.bf16.mxu0 %v6220_v14  ;;  %650 = vperm.xlu0 %5653, %v6349_v39   ;;  %v5720_v55 = vld [vmem:[%s7854_s4 + $0x80] ss:$12 sps:$4 sm:$0xff]   ;;  %v6440_v56 = vld [vmem:[%s7854_s4 + $0xa8] ss:$12 sps:$4 sm:$0xff]   ;;  %vm1214_vm7 = vcmp.gt.s32.totalorder %v6321_v34, 6  ;;  %vm929_vm8 = vcmp.gt.s32.totalorder %v6321_v34, 1 }
  0x13   :  { %v5721_v58 = vld [vmem:[%s7854_s4 + $0x98] ss:$12 sps:$4 sm:$0xff]   ;;  %v4815_v59 = vsel %vm1214_vm7, 1.0, %v6098_v2  ;;  %v5722_v60 = vld [vmem:[%s7854_s4 + $0xb0] ss:$12 sps:$4 sm:$0xff]  }
  0x14   :  { %5338 = vmatpush3.bf16.msra.mxu1 %v5693_v21  ;;  %v5723_v62 = vld [vmem:[%s7853_s3 + $0x8] ss:$12 sps:$4 sm:$0xff]   ;;  %v5724_v63 = vld [vmem:[%s7853_s3 + $0x20] ss:$12 sps:$4 sm:$0xff]   ;;  %v5725_v0 = vld [vmem:[%s7853_s3 + $0x38] ss:$12 sps:$4 sm:$0xff]  }
  0x15   :  { %263 = vmatpush1.bf16.msra.mxu0 %v6229_v16  ;;  %5339 = vmatprep.subr.bf16.mxu1 %v6098_v2  ;;  %v5726_v1 = vld [vmem:[%s7853_s3 + $0x50] ss:$12 sps:$4 sm:$0xff]  }
  0x16   :  { %264 = vmatprep.subr.bf16.mxu0 %v6236_v17  ;;  %1505 = vperm.xlu0 %5653, %v6352_v40   ;;  %v337_v34 = vld [vmem:[%s7856_s0 + $0x10] sm:$0xff] }
  0x18   :  { %5340 = vmatpush3.bf16.msra.mxu1 %v5697_v24 }
  0x19   :  { %265 = vmatpush1.bf16.msra.mxu0 %v6245_v19  ;;  %5341 = vmatprep.subr.bf16.mxu1 %v6098_v2 }
  0x1a   :  { %266 = vmatprep.subr.bf16.mxu0 %v6252_v20  ;;  %2075 = vperm.xlu0 %5653, %v6355_v41  }
  0x1c   :  { %5342 = vmatpush3.bf16.msra.mxu1 %v5701_v27 }
  0x1d   :  { %267 = vmatpush1.bf16.msra.mxu0 %v6261_v22  ;;  %5343 = vmatprep.subr.bf16.mxu1 %v6098_v2 }
  0x1e   :  { %268 = vmatprep.subr.bf16.mxu0 %v6268_v23  ;;  %2645 = vperm.xlu0 %5653, %v6422_v53  }
  0x20   :  { %5344 = vmatpush3.bf16.msra.mxu1 %v5705_v32 }
  0x21   :  { %269 = vmatpush1.bf16.msra.mxu0 %v6277_v25  ;;  %5349 = vmatprep.subr.bf16.mxu1 %v6098_v2 }
  0x22   :  { %537 = vmatprep.subr.bf16.mxu0 %v6284_v26  ;;  %3215 = vperm.xlu0 %5653, %v6443_v57  }
  0x23   :  { %5346 = vmatmul.mubr.bf16.vlgmr.msra.gmra.mrb[0].mxu1 %v6101_v31 }
  0x24   :  { %287 = vmatmul.mubr.bf16.vlgmr.msra.gmra.mrb[0].mxu0 %v6101_v31  ;;  %5350 = vmatpush3.bf16.msra.mxu1 %v5712_v38  ;;  %v4748_v38 = vld [vmem:[%s7858_s1 + $0xa8] sm:$0xff] }
  0x25   :  { %538 = vmatpush1.bf16.msra.mxu0 %v6293_v28  ;;  %569 = vmatprep.mubr.bf16.mxu0 %v6099_v3 }
  0x26   :  { %539 = vmatprep.subr.bf16.mxu0 %v6300_v29  ;;  %5365 = vmatprep.mubr.msk.bf16.mxu1 %vm6100_vm0, %v6098_v2 }
  0x27   :  { %5351 = vmatprep.subr.bf16.mxu1 %v6098_v2  ;;  %3785 = vperm.xlu0 %5653, %v4815_v59  }
  0x28   :  { %5352 = vmatpush3.bf16.msra.mxu1 %v5716_v42 }
  0x29   :  { %540 = vmatpush1.bf16.msra.mxu0 %v6305_v30  ;;  %5353 = vmatprep.subr.bf16.mxu1 %v6098_v2 }
  0x2a   :  { %541 = vmatprep.subr.bf16.mxu0 %v6315_v33 }
  0x2b   :  { %5656 = vperm.xlu0 %5653, %v5655_v61  }
  0x2c   :  { %5354 = vmatpush3.bf16.msra.mxu1 %v5717_v45 }
  0x2d   :  { %542 = vmatpush1.bf16.msra.mxu0 %v6332_v35  ;;  %5355 = vmatprep.subr.bf16.mxu1 %v6098_v2 }
  0x2e   :  { %543 = vmatprep.subr.bf16.mxu0 %v6340_v37 }
  0x30   :  { %5356 = vmatpush3.bf16.msra.mxu1 %v5718_v48 }
  0x31   :  { %544 = vmatpush1.bf16.msra.mxu0 %v6364_v43  ;;  %5357 = vmatprep.subr.bf16.mxu1 %v6098_v2 }
  0x32   :  { %545 = vmatprep.subr.bf16.mxu0 %v6370_v44 }
  0x34   :  { %5358 = vmatpush3.bf16.msra.mxu1 %v5719_v51 }
  0x35   :  { %546 = vmatpush1.bf16.msra.mxu0 %v6384_v46  ;;  %5359 = vmatprep.subr.bf16.mxu1 %v6098_v2 }
  0x36   :  { %547 = vmatprep.subr.bf16.mxu0 %v6389_v47 }
  0x38   :  { %5360 = vmatpush3.bf16.msra.mxu1 %v5720_v55  ;;  %v4749_v55 = vld [vmem:[%s7858_s1 + $0xb0] sm:$0xff] }
  0x39   :  { %548 = vmatpush1.bf16.msra.mxu0 %v6401_v49  ;;  %5361 = vmatprep.subr.bf16.mxu1 %v6098_v2 }
  0x3a   :  { %549 = vmatprep.subr.bf16.mxu0 %v6406_v50 }
  0x3c   :  { %5362 = vmatpush3.bf16.msra.mxu1 %v5721_v58 }
  0x3d   :  { %550 = vmatpush1.bf16.msra.mxu0 %v6419_v52  ;;  %5363 = vmatprep.subr.bf16.mxu1 %v6098_v2 }
  0x3e   :  { %551 = vmatprep.subr.bf16.mxu0 %v6427_v54 }
  0x40   :  { %5364 = vmatpush3.bf16.msra.mxu1 %v5722_v60 }
  0x41   :  { %552 = vmatpush1.bf16.msra.mxu0 %v6440_v56  ;;  %5369 = vmatprep.subr.bf16.mxu1 %v6098_v2 }
  0x42   :  { %822 = vmatprep.subr.bf16.mxu0 %v6165_v4  ;;  %v5727_v4 = vld [vmem:[%s7853_s3 + $0x68] ss:$12 sps:$4 sm:$0xff]  }
  0x43   :  { %5366 = vmatmul.mubr.bf16.vlgmr.msra.gmra.mrb[4].mxu1 %v6101_v31 }
  0x44   :  { %570 = vmatmul.mubr.bf16.vlgmr.msra.gmra.mrb[4].mxu0 %v6101_v31  ;;  %5385 = vmatprep.mubr.msk.bf16.mxu1 %vm6100_vm0, %v6098_v2 }
  0x45   :  { %823 = vmatpush1.bf16.msra.mxu0 %v6167_v5  ;;  %854 = vmatprep.mubr.bf16.mxu0 %v6099_v3 }
  0x46   :  { %824 = vmatprep.subr.bf16.mxu0 %v6172_v6  ;;  %5370 = vmatpush3.bf16.msra.mxu1 %v5723_v62  ;;  %v5728_v6 = vld [vmem:[%s7853_s3 + $0x80] ss:$12 sps:$4 sm:$0xff]  }
  0x47   :  { %5371 = vmatprep.subr.bf16.mxu1 %v6098_v2 }
  0x49   :  { %825 = vmatpush1.bf16.msra.mxu0 %v6183_v7  ;;  %v5729_v7 = vld [vmem:[%s7853_s3 + $0x98] ss:$12 sps:$4 sm:$0xff]  }
  0x4a   :  { %826 = vmatprep.subr.bf16.mxu0 %v6189_v8  ;;  %5372 = vmatpush3.bf16.msra.mxu1 %v5724_v63  ;;  %v5730_v8 = vld [vmem:[%s7853_s3 + $0xb0] ss:$12 sps:$4 sm:$0xff]  }
  0x4b   :  { %5373 = vmatprep.subr.bf16.mxu1 %v6098_v2 }
  0x4d   :  { %827 = vmatpush1.bf16.msra.mxu0 %v6195_v9  ;;  %v4784_v9 = vsel %vm929_vm8, 1.0, %v6098_v2 }
  0x4e   :  { %828 = vmatprep.subr.bf16.mxu0 %v6201_v10  ;;  %5374 = vmatpush3.bf16.msra.mxu1 %v5725_v0  ;;  %v335_v10 = vld [vmem:[%s7856_s0] sm:$0xff] }
  0x4f   :  { %5375 = vmatprep.subr.bf16.mxu1 %v6098_v2  ;;  %935 = vperm.xlu1 %5654, %v4784_v9  }
  0x51   :  { %829 = vmatpush1.bf16.msra.mxu0 %v6213_v13 }
  0x52   :  { %830 = vmatprep.subr.bf16.mxu0 %v6220_v14  ;;  %5376 = vmatpush3.bf16.msra.mxu1 %v5726_v1 }
  0x53   :  { %5377 = vmatprep.subr.bf16.mxu1 %v6098_v2  ;;  %1220 = vperm.xlu1 %5654, %v4815_v59  }
  0x55   :  { %831 = vmatpush1.bf16.msra.mxu0 %v6229_v16 }
  0x56   :  { %832 = vmatprep.subr.bf16.mxu0 %v6236_v17  ;;  %5378 = vmatpush3.bf16.msra.mxu1 %v5727_v4  ;;  %v336_v17 = vld [vmem:[%s7856_s0 + $0x8] sm:$0xff] }
  0x57   :  { %5379 = vmatprep.subr.bf16.mxu1 %v6098_v2  ;;  %1790 = vperm.xlu1 %5654, %v6443_v57  }
  0x59   :  { %833 = vmatpush1.bf16.msra.mxu0 %v6245_v19 }
  0x5a   :  { %834 = vmatprep.subr.bf16.mxu0 %v6252_v20  ;;  %5380 = vmatpush3.bf16.msra.mxu1 %v5728_v6 }
  0x5b   :  { %5381 = vmatprep.subr.bf16.mxu1 %v6098_v2  ;;  %2360 = vperm.xlu1 %5654, %v6422_v53  }
  0x5d   :  { %835 = vmatpush1.bf16.msra.mxu0 %v6261_v22 }
  0x5e   :  { %836 = vmatprep.subr.bf16.mxu0 %v6268_v23  ;;  %5382 = vmatpush3.bf16.msra.mxu1 %v5729_v7 }
  0x5f   :  { %5383 = vmatprep.subr.bf16.mxu1 %v6098_v2  ;;  %2930 = vperm.xlu1 %5654, %v6355_v41  }
  0x61   :  { %837 = vmatpush1.bf16.msra.mxu0 %v6277_v25 }
  0x62   :  { %1107 = vmatprep.subr.bf16.mxu0 %v6284_v26  ;;  %5384 = vmatpush3.bf16.msra.mxu1 %v5730_v8  ;;  %v6532_v26 = vld [vmem:[%s7857_s5] ss:$0 sm:$0xff] }
  0x63   :  { %5389 = vmatprep.subr.bf16.mxu1 %v6098_v2  ;;  %3500 = vperm.xlu1 %5654, %v6352_v40  }
  0x67   :  { %4070 = vperm.xlu1 %5654, %v4784_v9  }
  0x8d   :  { %v367_v9 = vpop.permute.xlu0 %366 }
  0xf6   :  { %v329_v18 = vpop.f32.mrb[0].mxu1 }
  0xf7   :  { %v288_v11 = vpop.f32.mrb[0].mxu0  ;;  %v5347_v19 = vpop.f32.mrb[1].mxu1  ;;  %v352_v27 = vadd.f32 %v6532_v26, %v329_v18 }
  0xf8   :  { %v338_v12 = vadd.f32 %v335_v10, %v288_v11  ;;  %v290_v13 = vpop.f32.mrb[1].mxu0  ;;  %v332_v21 = vpop.f32.mrb[2].mxu1  ;;  %v5731_v11 = vld [vmem:[%s7854_s4 + $0x8] ss:$12 sps:$4 sm:$0xff]  }
  0xf9   :  { %v292_v14 = vpop.f32.mrb[2].mxu0  ;;  %v345_v20 = vadd.f32 %v336_v17, %v290_v13  ;;  %v5348_v22 = vpop.f32.mrb[3].mxu1  ;;  %v6558_v13 = vld [vmem:[%s7860_s6] ss:$0 sm:$0xff] }
  0xfa   :  { %v4721_v15 = vmul.f32 -1.442695, %v338_v12  ;;  %v293_v16 = vpop.f32.mrb[3].mxu0  ;;  %v5732_v14 = vld [vmem:[%s7854_s4 + $0x20] ss:$12 sps:$4 sm:$0xff]   ;;  %v651_v22 = vpop.permute.xlu0 %650 }
  0xfb   :  { %v4722_v23 = vmul.f32 -1.442695, %v345_v20 }
  0xfc   :  { %5932 = vpow2.f32 %v4721_v15 }
  0xfd   :  { %5934 = vpow2.f32 %v4722_v23 }
 0x106   :  { %v5933_v24 = vpop.eup %5932 }
 0x107   :  { %v342_v25 = vadd.f32 1.0, %v5933_v24  ;;  %v5935_v31 = vpop.eup %5934  ;;  %v5740_v24 = vld [vmem:[%s7853_s3 + $0x8] ss:$12 sps:$4 sm:$0xff]  }
 0x108   :  { %v349_v39 = vadd.f32 1.0, %v5935_v31  ;;  %v5744_v31 = vld [vmem:[%s7853_s3 + $0x20] ss:$12 sps:$4 sm:$0xff]  }
 0x109   :  { %5936 = vrcp.f32 %v342_v25  ;;  %v6635_v25 = vld [vmem:[%s7853_s3 + $0x1c] ss:$12 sps:$4 sm:$0xff]  }
 0x113   :  { %v5937_v32 = vpop.eup %5936 }
 0x114   :  { %v353_v36 = vmul.f32 %v5937_v32, %v352_v27  ;;  %v6641_v27 = vld [vmem:[%s7853_s3 + $0x18] ss:$12 sps:$4 sm:$0xff]   ;;  %v6657_v32 = vld [vmem:[%s7853_s3 + $0x30] ss:$12 sps:$4 sm:$0xff]  }
 0x116   :  { %v354_v40 = vadd.f32 %v353_v36, %v337_v34  ;;  %v612_v57 = vpop.f32.mrb[4].mxu1  ;;  %v5748_v34 = vld [vmem:[%s7853_s3 + $0x38] ss:$12 sps:$4 sm:$0xff]  }
 0x117   :  { %v571_v41 = vpop.f32.mrb[4].mxu0  ;;  %v5367_v58 = vpop.f32.mrb[5].mxu1  ;;  %v636_v15 = vadd.f32 %v6558_v13, %v612_v57  ;;  %v6667_v36 = vld [vmem:[%s7853_s3 + $0x4c] ss:$12 sps:$4 sm:$0xff]  }
 0x118   :  { %5938 = vtanh.f32 %v354_v40  ;;  %v622_v42 = vadd.f32 %v4748_v38, %v571_v41  ;;  %v573_v45 = vpop.f32.mrb[5].mxu0  ;;  %v615_v60 = vpop.f32.mrb[6].mxu1  ;;  %v6673_v38 = vld [vmem:[%s7853_s3 + $0x48] ss:$12 sps:$4 sm:$0xff]   ;;  %v6683_v40 = vld [vmem:[%s7853_s3 + $0x64] ss:$12 sps:$4 sm:$0xff]  }
 0x119   :  { %v575_v48 = vpop.f32.mrb[6].mxu0  ;;  %5940 = vrcp.f32 %v349_v39  ;;  %v629_v59 = vadd.f32 %v4749_v55, %v573_v45  ;;  %v5368_v61 = vpop.f32.mrb[7].mxu1  ;;  %v5752_v39 = vld [vmem:[%s7853_s3 + $0x50] ss:$12 sps:$4 sm:$0xff]   ;;  %v6689_v41 = vld [vmem:[%s7853_s3 + $0x60] ss:$12 sps:$4 sm:$0xff]  }
 0x11a   :  { %v4751_v51 = vmul.f32 -1.442695, %v622_v42  ;;  %v576_v53 = vpop.f32.mrb[7].mxu0  ;;  %v5756_v42 = vld [vmem:[%s7853_s3 + $0x68] ss:$12 sps:$4 sm:$0xff]  }
 0x11b   :  { %v4752_v1 = vmul.f32 -1.442695, %v629_v59  ;;  %v6699_v45 = vld [vmem:[%s7853_s3 + $0x7c] ss:$12 sps:$4 sm:$0xff]   ;;  %v6705_v48 = vld [vmem:[%s7853_s3 + $0x78] ss:$12 sps:$4 sm:$0xff]  }
 0x11c   :  { %5942 = vpow2.f32 %v4751_v51  ;;  %v5760_v51 = vld [vmem:[%s7853_s3 + $0x80] ss:$12 sps:$4 sm:$0xff]   ;;  %v6721_v55 = vld [vmem:[%s7853_s3 + $0x90] ss:$12 sps:$4 sm:$0xff]   ;;  %v5764_v57 = vld [vmem:[%s7853_s3 + $0x98] ss:$12 sps:$4 sm:$0xff]  }
 0x11d   :  { %5944 = vpow2.f32 %v4752_v1  ;;  %v6715_v53 = vld [vmem:[%s7853_s3 + $0x94] ss:$12 sps:$4 sm:$0xff]   ;;  %v6731_v58 = vld [vmem:[%s7853_s3 + $0xac] ss:$12 sps:$4 sm:$0xff]   ;;  %v5768_v60 = vld [vmem:[%s7853_s3 + $0xb0] ss:$12 sps:$4 sm:$0xff]  }
 0x11e   :  { %v6737_v59 = vld [vmem:[%s7853_s3 + $0xa8] ss:$12 sps:$4 sm:$0xff]   ;;  %v6747_v61 = vld [vmem:[%s7854_s4 + $0x4] ss:$12 sps:$4 sm:$0xff]  }
 0x122   :  { %v5939_v62 = vpop.eup %5938 }
 0x123   :  { %v356_v63 = vsub.f32 0.0, %v5939_v62  ;;  %v5941_v0 = vpop.eup %5940 }
 0x125   :  { %v357_v4 = vmul.f32 %v5941_v0, %v356_v63 }
 0x126   :  { %v5943_v6 = vpop.eup %5942 }
 0x127   :  { %v358_v7 = vadd.f32 %v5939_v62, %v357_v4  ;;  %v626_v8 = vadd.f32 1.0, %v5943_v6  ;;  %v5945_v16 = vpop.eup %5944  ;;  %v4779_v62 = vld [vmem:[%s7856_s0 + $0x18] sm:$0xff] }
 0x128   :  { %v633_v19 = vadd.f32 1.0, %v5945_v16 }
 0x129   :  { %v6544_v10 = vmul.f32 %v367_v9, %v358_v7  ;;  %5946 = vrcp.f32 %v626_v8 }
 0x12b   :  { %v661_v12 = vpack.c.bf16 %v6544_v10, %v6544_v10  ;;  %373 = vst [vmem:[%s7859_s7] sm:$0xff] %v6544_v10 }
 0x12d   :  { %855 = vmatmul.mubr.bf16.vlgmr.msra.gmra.mrb[8].mxu0 %v661_v12  ;;  %5386 = vmatmul.mubr.bf16.vlgmr.msra.gmra.mrb[8].mxu1 %v661_v12 }
 0x12e   :  { %1108 = vmatpush1.bf16.msra.mxu0 %v6293_v28  ;;  %5390 = vmatpush3.bf16.msra.mxu1 %v5731_v11  ;;  %v5733_v28 = vld [vmem:[%s7854_s4 + $0x38] ss:$12 sps:$4 sm:$0xff]  }
 0x12f   :  { %1109 = vmatprep.subr.bf16.mxu0 %v6300_v29  ;;  %5391 = vmatprep.subr.bf16.mxu1 %v6098_v2  ;;  %v4750_v29 = vld [vmem:[%s7858_s1 + $0xb8] sm:$0xff] }
 0x130   :  { %1139 = vmatprep.mubr.bf16.mxu0 %v6099_v3  ;;  %5405 = vmatprep.mubr.msk.bf16.mxu1 %vm6100_vm0, %v6098_v2 }
 0x132   :  { %1110 = vmatpush1.bf16.msra.mxu0 %v6305_v30  ;;  %5392 = vmatpush3.bf16.msra.mxu1 %v5732_v14  ;;  %v5734_v30 = vld [vmem:[%s7854_s4 + $0x50] ss:$12 sps:$4 sm:$0xff]   ;;  %v4780_v14 = vld [vmem:[%s7856_s0 + $0x20] sm:$0xff] }
 0x133   :  { %v5947_v17 = vpop.eup %5946  ;;  %1111 = vmatprep.subr.bf16.mxu0 %v6315_v33  ;;  %5393 = vmatprep.subr.bf16.mxu1 %v6098_v2  ;;  %v5735_v33 = vld [vmem:[%s7854_s4 + $0x68] ss:$12 sps:$4 sm:$0xff]  }
 0x134   :  { %v637_v18 = vmul.f32 %v5947_v17, %v636_v15 }
 0x136   :  { %v638_v20 = vadd.f32 %v4750_v29, %v637_v18  ;;  %1112 = vmatpush1.bf16.msra.mxu0 %v6332_v35  ;;  %5394 = vmatpush3.bf16.msra.mxu1 %v5733_v28  ;;  %v5736_v35 = vld [vmem:[%s7854_s4 + $0x80] ss:$12 sps:$4 sm:$0xff]  }
 0x137   :  { %1113 = vmatprep.subr.bf16.mxu0 %v6340_v37  ;;  %5395 = vmatprep.subr.bf16.mxu1 %v6098_v2 }
 0x138   :  { %5948 = vtanh.f32 %v638_v20  ;;  %v4781_v20 = vld [vmem:[%s7856_s0 + $0x28] sm:$0xff] }
 0x139   :  { %5950 = vrcp.f32 %v633_v19 }
 0x13a   :  { %1114 = vmatpush1.bf16.msra.mxu0 %v6364_v43  ;;  %5396 = vmatpush3.bf16.msra.mxu1 %v5734_v30  ;;  %v5737_v43 = vld [vmem:[%s7854_s4 + $0x98] ss:$12 sps:$4 sm:$0xff]  }
 0x13b   :  { %1115 = vmatprep.subr.bf16.mxu0 %v6370_v44  ;;  %5397 = vmatprep.subr.bf16.mxu1 %v6098_v2 }
 0x13e   :  { %1116 = vmatpush1.bf16.msra.mxu0 %v6384_v46  ;;  %5398 = vmatpush3.bf16.msra.mxu1 %v5735_v33  ;;  %v4810_v33 = vld [vmem:[%s7858_s1 + $0x90] sm:$0xff] }
 0x13f   :  { %1117 = vmatprep.subr.bf16.mxu0 %v6389_v47  ;;  %5399 = vmatprep.subr.bf16.mxu1 %v6098_v2  ;;  %v5738_v47 = vld [vmem:[%s7854_s4 + $0xb0] ss:$12 sps:$4 sm:$0xff]  }
 0x142   :  { %v5949_v37 = vpop.eup %5948  ;;  %1118 = vmatpush1.bf16.msra.mxu0 %v6401_v49  ;;  %5400 = vmatpush3.bf16.msra.mxu1 %v5736_v35 }
 0x143   :  { %v640_v44 = vsub.f32 0.0, %v5949_v37  ;;  %1119 = vmatprep.subr.bf16.mxu0 %v6406_v50  ;;  %5401 = vmatprep.subr.bf16.mxu1 %v6098_v2  ;;  %v5951_v46 = vpop.eup %5950 }
 0x145   :  { %v641_v21 = vmul.f32 %v5951_v46, %v640_v44 }
 0x146   :  { %1120 = vmatpush1.bf16.msra.mxu0 %v6419_v52  ;;  %5402 = vmatpush3.bf16.msra.mxu1 %v5737_v43  ;;  %v6092_v52 = vld [vmem:[%s7853_s3] sm:$0xff] }
 0x147   :  { %v642_v49 = vadd.f32 %v5949_v37, %v641_v21  ;;  %1121 = vmatprep.subr.bf16.mxu0 %v6427_v54  ;;  %5403 = vmatprep.subr.bf16.mxu1 %v6098_v2  ;;  %v6093_v54 = vld [vmem:[%s7853_s3 + $0xc] sm:$0xff] }
 0x149   :  { %v6609_v23 = vmul.f32 %v651_v22, %v642_v49 }
 0x14a   :  { %1122 = vmatpush1.bf16.msra.mxu0 %v6440_v56  ;;  %5404 = vmatpush3.bf16.msra.mxu1 %v5738_v47  ;;  %v4818_v56 = vcombine.high %v6092_v52, %v6093_v54 }
 0x14b   :  { %4754 = vst [vmem:[%s7861_s8 + $0x38] sm:$0xff] %v6609_v23  ;;  %v946_v50 = vpack.c.bf16 %v6609_v23, %v6609_v23  ;;  %5409 = vmatprep.subr.bf16.mxu1 %v6098_v2 }
 0x14c   :  { %1392 = vmatprep.subr.bf16.mxu0 %v4818_v56  ;;  %v4811_v56 = vld [vmem:[%s7858_s1 + $0x98] sm:$0xff] }
 0x14d   :  { %1140 = vmatmul.mubr.bf16.vlgmr.msra.gmra.mrb[12].mxu0 %v946_v50  ;;  %5406 = vmatmul.mubr.bf16.vlgmr.msra.gmra.mrb[12].mxu1 %v946_v50 }
 0x14e   :  { %1424 = vmatprep.mubr.bf16.mxu0 %v6099_v3  ;;  %5425 = vmatprep.mubr.msk.bf16.mxu1 %vm6100_vm0, %v6098_v2 }
 0x14f   :  { %1393 = vmatpush1.bf16.msra.mxu0 %v6167_v5  ;;  %5410 = vmatpush3.bf16.msra.mxu1 %v5740_v24  ;;  %v6651_v5 = vld [vmem:[%s7853_s3 + $0x34] ss:$12 sps:$4 sm:$0xff]  }
 0x150   :  { %5411 = vmatprep.subr.bf16.mxu1 %v6098_v2  ;;  %1394 = vmatprep.subr.bf16.mxu0 %v6635_v25 }
 0x153   :  { %1395 = vmatpush1.bf16.msra.mxu0 %v6641_v27  ;;  %5412 = vmatpush3.bf16.msra.mxu1 %v5744_v31 }
 0x154   :  { %5413 = vmatprep.subr.bf16.mxu1 %v6098_v2  ;;  %1396 = vmatprep.subr.bf16.mxu0 %v6651_v5 }
 0x157   :  { %1397 = vmatpush1.bf16.msra.mxu0 %v6657_v32  ;;  %5414 = vmatpush3.bf16.msra.mxu1 %v5748_v34 }
 0x158   :  { %5415 = vmatprep.subr.bf16.mxu1 %v6098_v2  ;;  %1398 = vmatprep.subr.bf16.mxu0 %v6667_v36 }
 0x15b   :  { %1399 = vmatpush1.bf16.msra.mxu0 %v6673_v38  ;;  %5416 = vmatpush3.bf16.msra.mxu1 %v5752_v39 }
 0x15c   :  { %5417 = vmatprep.subr.bf16.mxu1 %v6098_v2  ;;  %1400 = vmatprep.subr.bf16.mxu0 %v6683_v40 }
 0x15f   :  { %1401 = vmatpush1.bf16.msra.mxu0 %v6689_v41  ;;  %5418 = vmatpush3.bf16.msra.mxu1 %v5756_v42 }
 0x160   :  { %5419 = vmatprep.subr.bf16.mxu1 %v6098_v2  ;;  %1402 = vmatprep.subr.bf16.mxu0 %v6699_v45 }
 0x163   :  { %1403 = vmatpush1.bf16.msra.mxu0 %v6705_v48  ;;  %5420 = vmatpush3.bf16.msra.mxu1 %v5760_v51 }
 0x164   :  { %5421 = vmatprep.subr.bf16.mxu1 %v6098_v2  ;;  %1404 = vmatprep.subr.bf16.mxu0 %v6715_v53 }
 0x167   :  { %1405 = vmatpush1.bf16.msra.mxu0 %v6721_v55  ;;  %5422 = vmatpush3.bf16.msra.mxu1 %v5764_v57 }
 0x168   :  { %5423 = vmatprep.subr.bf16.mxu1 %v6098_v2  ;;  %1406 = vmatprep.subr.bf16.mxu0 %v6731_v58 }
 0x16b   :  { %1407 = vmatpush1.bf16.msra.mxu0 %v6737_v59  ;;  %5424 = vmatpush3.bf16.msra.mxu1 %v5768_v60 }
 0x16c   :  { %5429 = vmatprep.subr.bf16.mxu1 %v6098_v2  ;;  %1677 = vmatprep.subr.bf16.mxu0 %v6747_v61 }
 0x200   :  { %v856_v63 = vpop.f32.mrb[8].mxu0  ;;  %v897_v0 = vpop.f32.mrb[8].mxu1 }
 0x201   :  { %v907_v1 = vadd.f32 %v4779_v62, %v856_v63  ;;  %v858_v4 = vpop.f32.mrb[9].mxu0  ;;  %v5387_v6 = vpop.f32.mrb[9].mxu1  ;;  %v921_v18 = vadd.f32 %v6532_v26, %v897_v0 }
 0x202   :  { %v860_v7 = vpop.f32.mrb[10].mxu0  ;;  %v900_v8 = vpop.f32.mrb[10].mxu1  ;;  %v914_v15 = vadd.f32 %v4780_v14, %v858_v4  ;;  %v6795_v14 = vld [vmem:[%s7854_s4 + $0x18] ss:$12 sps:$4 sm:$0xff]  }
 0x203   :  { %v4782_v9 = vmul.f32 -1.442695, %v907_v1  ;;  %v861_v11 = vpop.f32.mrb[11].mxu0  ;;  %v5388_v12 = vpop.f32.mrb[11].mxu1  ;;  %v6778_v7 = vld [vmem:[%s7854_s4] ss:$12 sps:$4 sm:$0xff]  }
 0x204   :  { %v4783_v16 = vmul.f32 -1.442695, %v914_v15  ;;  %v936_v63 = vpop.permute.xlu1 %935  ;;  %v5772_v8 = vld [vmem:[%s7854_s4 + $0x8] ss:$12 sps:$4 sm:$0xff]   ;;  %v5776_v15 = vld [vmem:[%s7854_s4 + $0x20] ss:$12 sps:$4 sm:$0xff]  }
 0x205   :  { %5952 = vpow2.f32 %v4782_v9  ;;  %v6788_v11 = vld [vmem:[%s7854_s4 + $0x1c] ss:$12 sps:$4 sm:$0xff]  }
 0x206   :  { %5954 = vpow2.f32 %v4783_v16 }
 0x20f   :  { %v5953_v28 = vpop.eup %5952 }
 0x210   :  { %v911_v17 = vadd.f32 1.0, %v5953_v28  ;;  %v5955_v29 = vpop.eup %5954  ;;  %v4812_v28 = vld [vmem:[%s7858_s1 + $0xa0] sm:$0xff] }
 0x211   :  { %v918_v37 = vadd.f32 1.0, %v5955_v29 }
 0x212   :  { %5956 = vrcp.f32 %v911_v17  ;;  %v6808_v17 = vld [vmem:[%s7854_s4 + $0x34] ss:$12 sps:$4 sm:$0xff]  }
 0x21c   :  { %v5957_v19 = vpop.eup %5956 }
 0x21d   :  { %v922_v30 = vmul.f32 %v5957_v19, %v921_v18 }
 0x21f   :  { %v923_v35 = vadd.f32 %v4781_v20, %v922_v30  ;;  %v6817_v20 = vld [vmem:[%s7854_s4 + $0x30] ss:$12 sps:$4 sm:$0xff]   ;;  %v5780_v30 = vld [vmem:[%s7854_s4 + $0x38] ss:$12 sps:$4 sm:$0xff]  }
 0x220   :  { %v1141_v43 = vpop.f32.mrb[12].mxu0  ;;  %v1182_v44 = vpop.f32.mrb[12].mxu1 }
 0x221   :  { %5958 = vtanh.f32 %v923_v35  ;;  %v1192_v46 = vadd.f32 %v4810_v33, %v1141_v43  ;;  %v1143_v21 = vpop.f32.mrb[13].mxu0  ;;  %v5407_v47 = vpop.f32.mrb[13].mxu1  ;;  %v1206_v12 = vadd.f32 %v6558_v13, %v1182_v44  ;;  %v6827_v33 = vld [vmem:[%s7854_s4 + $0x4c] ss:$12 sps:$4 sm:$0xff]   ;;  %v6833_v35 = vld [vmem:[%s7854_s4 + $0x48] ss:$12 sps:$4 sm:$0xff]  }
 0x222   :  { %v1145_v49 = vpop.f32.mrb[14].mxu0  ;;  %v1185_v22 = vpop.f32.mrb[14].mxu1  ;;  %5960 = vrcp.f32 %v918_v37  ;;  %v1199_v24 = vadd.f32 %v4811_v56, %v1143_v21  ;;  %v5784_v37 = vld [vmem:[%s7854_s4 + $0x50] ss:$12 sps:$4 sm:$0xff]   ;;  %v6849_v44 = vld [vmem:[%s7854_s4 + $0x60] ss:$12 sps:$4 sm:$0xff]  }
 0x223   :  { %v4813_v50 = vmul.f32 -1.442695, %v1192_v46  ;;  %v1146_v52 = vpop.f32.mrb[15].mxu0  ;;  %v5408_v54 = vpop.f32.mrb[15].mxu1  ;;  %v6843_v43 = vld [vmem:[%s7854_s4 + $0x64] ss:$12 sps:$4 sm:$0xff]  }
 0x224   :  { %v4814_v42 = vmul.f32 -1.442695, %v1199_v24  ;;  %v5788_v46 = vld [vmem:[%s7854_s4 + $0x68] ss:$12 sps:$4 sm:$0xff]   ;;  %v6865_v49 = vld [vmem:[%s7854_s4 + $0x78] ss:$12 sps:$4 sm:$0xff]  }
 0x225   :  { %5962 = vpow2.f32 %v4813_v50  ;;  %v6859_v21 = vld [vmem:[%s7854_s4 + $0x7c] ss:$12 sps:$4 sm:$0xff]   ;;  %v5792_v22 = vld [vmem:[%s7854_s4 + $0x80] ss:$12 sps:$4 sm:$0xff]  }
 0x226   :  { %5964 = vpow2.f32 %v4814_v42  ;;  %v6876_v52 = vld [vmem:[%s7854_s4 + $0x94] ss:$12 sps:$4 sm:$0xff]   ;;  %v6882_v24 = vld [vmem:[%s7854_s4 + $0x90] ss:$12 sps:$4 sm:$0xff]   ;;  %v1221_v42 = vpop.permute.xlu1 %1220 }
 0x22b   :  { %v5959_v31 = vpop.eup %5958 }
 0x22c   :  { %v925_v34 = vsub.f32 %v6544_v10, %v5959_v31  ;;  %v5961_v39 = vpop.eup %5960 }
 0x22e   :  { %v926_v51 = vmul.f32 %v5961_v39, %v925_v34  ;;  %v6892_v39 = vld [vmem:[%s7854_s4 + $0xac] ss:$12 sps:$4 sm:$0xff]  }
 0x22f   :  { %v5963_v57 = vpop.eup %5962 }
 0x230   :  { %v927_v60 = vadd.f32 %v5959_v31, %v926_v51  ;;  %v1196_v62 = vadd.f32 1.0, %v5963_v57  ;;  %v5796_v31 = vld [vmem:[%s7854_s4 + $0x98] ss:$12 sps:$4 sm:$0xff]  }
 0x232   :  { %v932_v0 = vsub.f32 %v927_v60, %v6544_v10  ;;  %v941_v1 = vmul.f32 %v936_v63, %v927_v60  ;;  %5966 = vrcp.f32 %v1196_v62  ;;  %v6899_v60 = vld [vmem:[%s7854_s4 + $0xa8] ss:$12 sps:$4 sm:$0xff]   ;;  %v5800_v62 = vld [vmem:[%s7854_s4 + $0xb0] ss:$12 sps:$4 sm:$0xff]  }
 0x234   :  { %v938_v4 = vmul.f32 %v936_v63, %v932_v0  ;;  %4785 = vst [vmem:[%s7859_s7 + $0x8] sm:$0xff] %v941_v1 }
 0x236   :  { %v6773_v6 = vadd.f32 %v938_v4, %v6544_v10  ;;  %v5965_v10 = vpop.eup %5964  ;;  %v6927_v4 = vld [vmem:[%s7853_s3] ss:$12 sps:$4 sm:$0xff]  }
 0x237   :  { %v1203_v19 = vadd.f32 1.0, %v5965_v10  ;;  %v5806_v10 = vld [vmem:[%s7853_s3 + $0x38] ss:$12 sps:$4 sm:$0xff]  }
 0x238   :  { %v1231_v9 = vpack.c.bf16 %v6773_v6, %v6773_v6 }
 0x23a   :  { %1425 = vmatmul.mubr.bf16.vlgmr.msra.gmra.mrb[16].mxu0 %v1231_v9  ;;  %5426 = vmatmul.mubr.bf16.vlgmr.msra.gmra.mrb[16].mxu1 %v1231_v9  ;;  %v5805_v9 = vld [vmem:[%s7853_s3 + $0x20] ss:$12 sps:$4 sm:$0xff]  }
 0x23b   :  { %1678 = vmatpush1.bf16.msra.mxu0 %v6778_v7  ;;  %5430 = vmatpush3.bf16.msra.mxu1 %v5772_v8  ;;  %v5804_v8 = vld [vmem:[%s7853_s3 + $0x8] ss:$12 sps:$4 sm:$0xff]  }
 0x23c   :  { %v5967_v16 = vpop.eup %5966  ;;  %1679 = vmatprep.subr.bf16.mxu0 %v6788_v11  ;;  %5431 = vmatprep.subr.bf16.mxu1 %v6098_v2 }
 0x23d   :  { %v1207_v29 = vmul.f32 %v5967_v16, %v1206_v12  ;;  %1709 = vmatprep.mubr.bf16.mxu0 %v6099_v3  ;;  %5445 = vmatprep.mubr.msk.bf16.mxu1 %vm6100_vm0, %v6098_v2  ;;  %v5807_v12 = vld [vmem:[%s7853_s3 + $0x50] ss:$12 sps:$4 sm:$0xff]   ;;  %v5809_v16 = vld [vmem:[%s7853_s3 + $0x80] ss:$12 sps:$4 sm:$0xff]  }
 0x23f   :  { %v1208_v18 = vadd.f32 %v4812_v28, %v1207_v29  ;;  %1680 = vmatpush1.bf16.msra.mxu0 %v6795_v14  ;;  %5432 = vmatpush3.bf16.msra.mxu1 %v5776_v15  ;;  %v5808_v15 = vld [vmem:[%s7853_s3 + $0x68] ss:$12 sps:$4 sm:$0xff]   ;;  %v5810_v28 = vld [vmem:[%s7853_s3 + $0x98] ss:$12 sps:$4 sm:$0xff]   ;;  %v5811_v29 = vld [vmem:[%s7853_s3 + $0xb0] ss:$12 sps:$4 sm:$0xff]  }
 0x240   :  { %1681 = vmatprep.subr.bf16.mxu0 %v6808_v17  ;;  %5433 = vmatprep.subr.bf16.mxu1 %v6098_v2 }
 0x241   :  { %5968 = vtanh.f32 %v1208_v18  ;;  %v4841_v18 = vld [vmem:[%s7856_s0 + $0x30] sm:$0xff] }
 0x242   :  { %5970 = vrcp.f32 %v1203_v19 }
 0x243   :  { %1682 = vmatpush1.bf16.msra.mxu0 %v6817_v20  ;;  %5434 = vmatpush3.bf16.msra.mxu1 %v5780_v30 }
 0x244   :  { %1683 = vmatprep.subr.bf16.mxu0 %v6827_v33  ;;  %5435 = vmatprep.subr.bf16.mxu1 %v6098_v2 }
 0x247   :  { %1684 = vmatpush1.bf16.msra.mxu0 %v6833_v35  ;;  %5436 = vmatpush3.bf16.msra.mxu1 %v5784_v37 }
 0x248   :  { %1685 = vmatprep.subr.bf16.mxu0 %v6843_v43  ;;  %5437 = vmatprep.subr.bf16.mxu1 %v6098_v2 }
 0x24b   :  { %v5969_v47 = vpop.eup %5968  ;;  %1686 = vmatpush1.bf16.msra.mxu0 %v6849_v44  ;;  %5438 = vmatpush3.bf16.msra.mxu1 %v5788_v46 }
 0x24c   :  { %v1210_v50 = vsub.f32 %v6609_v23, %v5969_v47  ;;  %1687 = vmatprep.subr.bf16.mxu0 %v6859_v21  ;;  %5439 = vmatprep.subr.bf16.mxu1 %v6098_v2  ;;  %v5971_v54 = vpop.eup %5970 }
 0x24e   :  { %v1211_v56 = vmul.f32 %v5971_v54, %v1210_v50 }
 0x24f   :  { %1688 = vmatpush1.bf16.msra.mxu0 %v6865_v49  ;;  %5440 = vmatpush3.bf16.msra.mxu1 %v5792_v22 }
 0x250   :  { %v1212_v34 = vadd.f32 %v5969_v47, %v1211_v56  ;;  %1689 = vmatprep.subr.bf16.mxu0 %v6876_v52  ;;  %5441 = vmatprep.subr.bf16.mxu1 %v6098_v2 }
 0x252   :  { %v1226_v51 = vmul.f32 %v1221_v42, %v1212_v34  ;;  %v1217_v57 = vsub.f32 %v1212_v34, %v6609_v23  ;;  %v4842_v34 = vld [vmem:[%s7856_s0 + $0x38] sm:$0xff] }
 0x253   :  { %1690 = vmatpush1.bf16.msra.mxu0 %v6882_v24  ;;  %5442 = vmatpush3.bf16.msra.mxu1 %v5796_v31 }
 0x254   :  { %4816 = vst [vmem:[%s7861_s8 + $0x30] sm:$0xff] %v1226_v51  ;;  %1691 = vmatprep.subr.bf16.mxu0 %v6892_v39  ;;  %5443 = vmatprep.subr.bf16.mxu1 %v6098_v2  ;;  %v1223_v63 = vmul.f32 %v1221_v42, %v1217_v57 }
 0x256   :  { %v6910_v0 = vadd.f32 %v1223_v63, %v6609_v23  ;;  %v6922_v23 = vld [vmem:[%s7853_s3 + $0x4] ss:$12 sps:$4 sm:$0xff]  }
 0x257   :  { %1692 = vmatpush1.bf16.msra.mxu0 %v6899_v60  ;;  %5444 = vmatpush3.bf16.msra.mxu1 %v5800_v62 }
 0x258   :  { %v1516_v1 = vpack.c.bf16 %v6910_v0, %v6910_v0  ;;  %5449 = vmatprep.subr.bf16.mxu1 %v6098_v2  ;;  %1962 = vmatprep.subr.bf16.mxu0 %v6922_v23 }
 0x25a   :  { %1710 = vmatmul.mubr.bf16.vlgmr.msra.gmra.mrb[20].mxu0 %v1516_v1  ;;  %5446 = vmatmul.mubr.bf16.vlgmr.msra.gmra.mrb[20].mxu1 %v1516_v1 }
 0x25b   :  { %1994 = vmatprep.mubr.bf16.mxu0 %v6099_v3  ;;  %5465 = vmatprep.mubr.msk.bf16.mxu1 %vm6100_vm0, %v6098_v2 }
 0x25c   :  { %1963 = vmatpush1.bf16.msra.mxu0 %v6927_v4  ;;  %5450 = vmatpush3.bf16.msra.mxu1 %v5804_v8 }
 0x25d   :  { %1964 = vmatprep.subr.bf16.mxu0 %v6635_v25  ;;  %5451 = vmatprep.subr.bf16.mxu1 %v6098_v2 }
 0x260   :  { %1965 = vmatpush1.bf16.msra.mxu0 %v6641_v27  ;;  %5452 = vmatpush3.bf16.msra.mxu1 %v5805_v9  ;;  %v4843_v9 = vld [vmem:[%s7856_s0 + $0x40] sm:$0xff] }
 0x261   :  { %1966 = vmatprep.subr.bf16.mxu0 %v6651_v5  ;;  %5453 = vmatprep.subr.bf16.mxu1 %v6098_v2 }
 0x264   :  { %1967 = vmatpush1.bf16.msra.mxu0 %v6657_v32  ;;  %5454 = vmatpush3.bf16.msra.mxu1 %v5806_v10 }
 0x265   :  { %1968 = vmatprep.subr.bf16.mxu0 %v6667_v36  ;;  %5455 = vmatprep.subr.bf16.mxu1 %v6098_v2 }
 0x268   :  { %1969 = vmatpush1.bf16.msra.mxu0 %v6673_v38  ;;  %5456 = vmatpush3.bf16.msra.mxu1 %v5807_v12  ;;  %v4872_v12 = vld [vmem:[%s7858_s1 + $0x78] sm:$0xff] }
 0x269   :  { %1970 = vmatprep.subr.bf16.mxu0 %v6683_v40  ;;  %5457 = vmatprep.subr.bf16.mxu1 %v6098_v2 }
 0x26c   :  { %1971 = vmatpush1.bf16.msra.mxu0 %v6689_v41  ;;  %5458 = vmatpush3.bf16.msra.mxu1 %v5808_v15 }
 0x26d   :  { %1972 = vmatprep.subr.bf16.mxu0 %v6699_v45  ;;  %5459 = vmatprep.subr.bf16.mxu1 %v6098_v2 }
 0x270   :  { %1973 = vmatpush1.bf16.msra.mxu0 %v6705_v48  ;;  %5460 = vmatpush3.bf16.msra.mxu1 %v5809_v16 }
 0x271   :  { %1974 = vmatprep.subr.bf16.mxu0 %v6715_v53  ;;  %5461 = vmatprep.subr.bf16.mxu1 %v6098_v2 }
 0x274   :  { %1975 = vmatpush1.bf16.msra.mxu0 %v6721_v55  ;;  %5462 = vmatpush3.bf16.msra.mxu1 %v5810_v28 }
 0x275   :  { %1976 = vmatprep.subr.bf16.mxu0 %v6731_v58  ;;  %5463 = vmatprep.subr.bf16.mxu1 %v6098_v2 }
 0x278   :  { %1977 = vmatpush1.bf16.msra.mxu0 %v6737_v59  ;;  %5464 = vmatpush3.bf16.msra.mxu1 %v5811_v29 }
 0x279   :  { %2247 = vmatprep.subr.bf16.mxu0 %v6747_v61  ;;  %5469 = vmatprep.subr.bf16.mxu1 %v6098_v2 }
 0x30d   :  { %v1426_v19 = vpop.f32.mrb[16].mxu0  ;;  %v1467_v30 = vpop.f32.mrb[16].mxu1 }
 0x30e   :  { %v1477_v37 = vadd.f32 %v4841_v18, %v1426_v19  ;;  %v1428_v46 = vpop.f32.mrb[17].mxu0  ;;  %v5427_v47 = vpop.f32.mrb[17].mxu1  ;;  %v1491_v1 = vadd.f32 %v6532_v26, %v1467_v30 }
 0x30f   :  { %v1430_v22 = vpop.f32.mrb[18].mxu0  ;;  %v1470_v50 = vpop.f32.mrb[18].mxu1  ;;  %v1484_v42 = vadd.f32 %v4842_v34, %v1428_v46 }
 0x310   :  { %v4844_v54 = vmul.f32 -1.442695, %v1477_v37  ;;  %v1431_v56 = vpop.f32.mrb[19].mxu0  ;;  %v5428_v31 = vpop.f32.mrb[19].mxu1  ;;  %v4873_v50 = vld [vmem:[%s7858_s1 + $0x80] sm:$0xff] }
 0x311   :  { %v4845_v51 = vmul.f32 -1.442695, %v1484_v42 }
 0x312   :  { %5972 = vpow2.f32 %v4844_v54 }
 0x313   :  { %5974 = vpow2.f32 %v4845_v51 }
 0x31c   :  { %v5973_v57 = vpop.eup %5972 }
 0x31d   :  { %v1481_v62 = vadd.f32 1.0, %v5973_v57  ;;  %v5975_v63 = vpop.eup %5974 }
 0x31e   :  { %v1488_v16 = vadd.f32 1.0, %v5975_v63 }
 0x31f   :  { %5976 = vrcp.f32 %v1481_v62 }
 0x329   :  { %v5977_v8 = vpop.eup %5976 }
 0x32a   :  { %v1492_v10 = vmul.f32 %v5977_v8, %v1491_v1  ;;  %v1506_v1 = vpop.permute.xlu0 %1505 }
 0x32c   :  { %v1493_v15 = vadd.f32 %v4843_v9, %v1492_v10 }
 0x32d   :  { %v1711_v28 = vpop.f32.mrb[20].mxu0  ;;  %v1752_v29 = vpop.f32.mrb[20].mxu1 }
 0x32e   :  { %5978 = vtanh.f32 %v1493_v15  ;;  %v1762_v18 = vadd.f32 %v4872_v12, %v1711_v28  ;;  %v1713_v19 = vpop.f32.mrb[21].mxu0  ;;  %v5447_v37 = vpop.f32.mrb[21].mxu1  ;;  %v5812_v15 = vld [vmem:[%s7854_s4 + $0x8] ss:$12 sps:$4 sm:$0xff]  }
 0x32f   :  { %v1715_v46 = vpop.f32.mrb[22].mxu0  ;;  %v1755_v26 = vpop.f32.mrb[22].mxu1  ;;  %5980 = vrcp.f32 %v1488_v16  ;;  %v1769_v54 = vadd.f32 %v4873_v50, %v1713_v19  ;;  %v4874_v37 = vld [vmem:[%s7858_s1 + $0x88] sm:$0xff] }
 0x330   :  { %v4875_v30 = vmul.f32 -1.442695, %v1762_v18  ;;  %v1716_v47 = vpop.f32.mrb[23].mxu0  ;;  %v5448_v22 = vpop.f32.mrb[23].mxu1  ;;  %v1776_v18 = vadd.f32 %v6558_v13, %v1752_v29  ;;  %v5814_v26 = vld [vmem:[%s7854_s4 + $0x38] ss:$12 sps:$4 sm:$0xff]  }
 0x331   :  { %v4876_v42 = vmul.f32 -1.442695, %v1769_v54  ;;  %v5816_v47 = vld [vmem:[%s7854_s4 + $0x68] ss:$12 sps:$4 sm:$0xff]   ;;  %v5817_v50 = vld [vmem:[%s7854_s4 + $0x80] ss:$12 sps:$4 sm:$0xff]  }
 0x332   :  { %5982 = vpow2.f32 %v4875_v30  ;;  %v5815_v30 = vld [vmem:[%s7854_s4 + $0x50] ss:$12 sps:$4 sm:$0xff]  }
 0x333   :  { %5984 = vpow2.f32 %v4876_v42 }
 0x338   :  { %v5979_v56 = vpop.eup %5978 }
 0x339   :  { %v1495_v31 = vsub.f32 %v6773_v6, %v5979_v56  ;;  %v5981_v34 = vpop.eup %5980 }
 0x33b   :  { %v1496_v51 = vmul.f32 %v5981_v34, %v1495_v31  ;;  %v5818_v34 = vld [vmem:[%s7854_s4 + $0x98] ss:$12 sps:$4 sm:$0xff]  }
 0x33c   :  { %v5983_v57 = vpop.eup %5982 }
 0x33d   :  { %v1497_v62 = vadd.f32 %v5979_v56, %v1496_v51  ;;  %v1766_v63 = vadd.f32 1.0, %v5983_v57  ;;  %v5985_v28 = vpop.eup %5984  ;;  %v1791_v51 = vpop.permute.xlu1 %1790 }
 0x33e   :  { %v1773_v29 = vadd.f32 1.0, %v5985_v28  ;;  %v4904_v28 = vld [vmem:[%s7856_s0 + $0x50] sm:$0xff] }
 0x33f   :  { %v1511_v8 = vmul.f32 %v1506_v1, %v1497_v62  ;;  %5986 = vrcp.f32 %v1766_v63  ;;  %v1502_v9 = vsub.f32 %v1497_v62, %v6773_v6  ;;  %v5819_v63 = vld [vmem:[%s7854_s4 + $0xb0] ss:$12 sps:$4 sm:$0xff]  }
 0x341   :  { %4847 = vst [vmem:[%s7859_s7 + $0x10] sm:$0xff] %v1511_v8  ;;  %v1508_v10 = vmul.f32 %v1506_v1, %v1502_v9 }
 0x343   :  { %v7000_v12 = vadd.f32 %v1508_v10, %v6773_v6  ;;  %v5813_v6 = vld [vmem:[%s7854_s4 + $0x20] ss:$12 sps:$4 sm:$0xff]  }
 0x345   :  { %v1801_v16 = vpack.c.bf16 %v7000_v12, %v7000_v12 }
 0x347   :  { %1995 = vmatmul.mubr.bf16.vlgmr.msra.gmra.mrb[24].mxu0 %v1801_v16  ;;  %5466 = vmatmul.mubr.bf16.vlgmr.msra.gmra.mrb[24].mxu1 %v1801_v16 }
 0x348   :  { %2248 = vmatpush1.bf16.msra.mxu0 %v6778_v7  ;;  %5470 = vmatpush3.bf16.msra.mxu1 %v5812_v15 }
 0x349   :  { %v5987_v19 = vpop.eup %5986  ;;  %2249 = vmatprep.subr.bf16.mxu0 %v6788_v11  ;;  %5471 = vmatprep.subr.bf16.mxu1 %v6098_v2 }
 0x34a   :  { %v1777_v46 = vmul.f32 %v5987_v19, %v1776_v18  ;;  %2279 = vmatprep.mubr.bf16.mxu0 %v6099_v3  ;;  %5485 = vmatprep.mubr.msk.bf16.mxu1 %vm6100_vm0, %v6098_v2 }
 0x34c   :  { %v1778_v13 = vadd.f32 %v4874_v37, %v1777_v46  ;;  %2250 = vmatpush1.bf16.msra.mxu0 %v6795_v14  ;;  %5472 = vmatpush3.bf16.msra.mxu1 %v5813_v6 }
 0x34d   :  { %2251 = vmatprep.subr.bf16.mxu0 %v6808_v17  ;;  %5473 = vmatprep.subr.bf16.mxu1 %v6098_v2 }
 0x34e   :  { %5988 = vtanh.f32 %v1778_v13  ;;  %v7129_v13 = vld [vmem:[%s7857_s5] ss:$0 sm:$0xff] }
 0x34f   :  { %5990 = vrcp.f32 %v1773_v29 }
 0x350   :  { %2252 = vmatpush1.bf16.msra.mxu0 %v6817_v20  ;;  %5474 = vmatpush3.bf16.msra.mxu1 %v5814_v26 }
 0x351   :  { %2253 = vmatprep.subr.bf16.mxu0 %v6827_v33  ;;  %5475 = vmatprep.subr.bf16.mxu1 %v6098_v2 }
 0x354   :  { %2254 = vmatpush1.bf16.msra.mxu0 %v6833_v35  ;;  %5476 = vmatpush3.bf16.msra.mxu1 %v5815_v30  ;;  %v4905_v30 = vld [vmem:[%s7856_s0 + $0x58] sm:$0xff] }
 0x355   :  { %2255 = vmatprep.subr.bf16.mxu0 %v6843_v43  ;;  %5477 = vmatprep.subr.bf16.mxu1 %v6098_v2 }
 0x358   :  { %v5989_v22 = vpop.eup %5988  ;;  %2256 = vmatpush1.bf16.msra.mxu0 %v6849_v44  ;;  %5478 = vmatpush3.bf16.msra.mxu1 %v5816_v47 }
 0x359   :  { %v1780_v54 = vsub.f32 %v6910_v0, %v5989_v22  ;;  %2257 = vmatprep.subr.bf16.mxu0 %v6859_v21  ;;  %5479 = vmatprep.subr.bf16.mxu1 %v6098_v2  ;;  %v5991_v56 = vpop.eup %5990 }
 0x35b   :  { %v1781_v31 = vmul.f32 %v5991_v56, %v1780_v54 }
 0x35c   :  { %2258 = vmatpush1.bf16.msra.mxu0 %v6865_v49  ;;  %5480 = vmatpush3.bf16.msra.mxu1 %v5817_v50 }
 0x35d   :  { %v1782_v42 = vadd.f32 %v5989_v22, %v1781_v31  ;;  %2259 = vmatprep.subr.bf16.mxu0 %v6876_v52  ;;  %5481 = vmatprep.subr.bf16.mxu1 %v6098_v2  ;;  %v4934_v22 = vld [vmem:[%s7858_s1 + $0x60] sm:$0xff] }
 0x35f   :  { %v1796_v57 = vmul.f32 %v1791_v51, %v1782_v42  ;;  %v1787_v62 = vsub.f32 %v1782_v42, %v6910_v0 }
 0x360   :  { %2260 = vmatpush1.bf16.msra.mxu0 %v6882_v24  ;;  %5482 = vmatpush3.bf16.msra.mxu1 %v5818_v34 }
 0x361   :  { %4878 = vst [vmem:[%s7861_s8 + $0x28] sm:$0xff] %v1796_v57  ;;  %2261 = vmatprep.subr.bf16.mxu0 %v6892_v39  ;;  %5483 = vmatprep.subr.bf16.mxu1 %v6098_v2  ;;  %v1793_v1 = vmul.f32 %v1791_v51, %v1787_v62 }
 0x363   :  { %v7062_v8 = vadd.f32 %v1793_v1, %v6910_v0 }
 0x364   :  { %2262 = vmatpush1.bf16.msra.mxu0 %v6899_v60  ;;  %5484 = vmatpush3.bf16.msra.mxu1 %v5819_v63 }
 0x365   :  { %v2086_v9 = vpack.c.bf16 %v7062_v8, %v7062_v8  ;;  %2532 = vmatprep.subr.bf16.mxu0 %v6922_v23  ;;  %5489 = vmatprep.subr.bf16.mxu1 %v6098_v2 }
 0x367   :  { %2280 = vmatmul.mubr.bf16.vlgmr.msra.gmra.mrb[28].mxu0 %v2086_v9  ;;  %5486 = vmatmul.mubr.bf16.vlgmr.msra.gmra.mrb[28].mxu1 %v2086_v9 }
 0x368   :  { %2533 = vmatpush1.bf16.msra.mxu0 %v6927_v4  ;;  %2564 = vmatprep.mubr.bf16.mxu0 %v6099_v3 }
 0x369   :  { %2534 = vmatprep.subr.bf16.mxu0 %v6635_v25  ;;  %5505 = vmatprep.mubr.msk.bf16.mxu1 %vm6100_vm0, %v6098_v2  ;;  %v5820_v25 = vld [vmem:[%s7853_s3 + $0x8] ss:$12 sps:$4 sm:$0xff]  }
 0x36a   :  { %5490 = vmatpush3.bf16.msra.mxu1 %v5820_v25  ;;  %v4935_v25 = vld [vmem:[%s7858_s1 + $0x68] sm:$0xff] }
 0x36b   :  { %5491 = vmatprep.subr.bf16.mxu1 %v6098_v2 }
 0x36c   :  { %2535 = vmatpush1.bf16.msra.mxu0 %v6641_v27  ;;  %v5821_v27 = vld [vmem:[%s7853_s3 + $0x20] ss:$12 sps:$4 sm:$0xff]  }
 0x36d   :  { %2536 = vmatprep.subr.bf16.mxu0 %v6651_v5  ;;  %v5822_v5 = vld [vmem:[%s7853_s3 + $0x38] ss:$12 sps:$4 sm:$0xff]  }
 0x36e   :  { %5492 = vmatpush3.bf16.msra.mxu1 %v5821_v27 }
 0x36f   :  { %5493 = vmatprep.subr.bf16.mxu1 %v6098_v2 }
 0x370   :  { %2537 = vmatpush1.bf16.msra.mxu0 %v6657_v32  ;;  %v5823_v32 = vld [vmem:[%s7853_s3 + $0x50] ss:$12 sps:$4 sm:$0xff]  }
 0x371   :  { %2538 = vmatprep.subr.bf16.mxu0 %v6667_v36  ;;  %v5824_v36 = vld [vmem:[%s7853_s3 + $0x68] ss:$12 sps:$4 sm:$0xff]  }
 0x372   :  { %5494 = vmatpush3.bf16.msra.mxu1 %v5822_v5 }
 0x373   :  { %5495 = vmatprep.subr.bf16.mxu1 %v6098_v2 }
 0x374   :  { %2539 = vmatpush1.bf16.msra.mxu0 %v6673_v38  ;;  %v5825_v38 = vld [vmem:[%s7853_s3 + $0x80] ss:$12 sps:$4 sm:$0xff]  }
 0x375   :  { %2540 = vmatprep.subr.bf16.mxu0 %v6683_v40  ;;  %v5826_v40 = vld [vmem:[%s7853_s3 + $0x98] ss:$12 sps:$4 sm:$0xff]  }
 0x376   :  { %5496 = vmatpush3.bf16.msra.mxu1 %v5823_v32 }
 0x377   :  { %5497 = vmatprep.subr.bf16.mxu1 %v6098_v2 }
 0x378   :  { %2541 = vmatpush1.bf16.msra.mxu0 %v6689_v41  ;;  %v5827_v41 = vld [vmem:[%s7853_s3 + $0xb0] ss:$12 sps:$4 sm:$0xff]  }
 0x379   :  { %2542 = vmatprep.subr.bf16.mxu0 %v6699_v45  ;;  %v4903_v45 = vld [vmem:[%s7856_s0 + $0x48] sm:$0xff] }
 0x37a   :  { %5498 = vmatpush3.bf16.msra.mxu1 %v5824_v36 }
 0x37b   :  { %5499 = vmatprep.subr.bf16.mxu1 %v6098_v2 }
 0x37c   :  { %2543 = vmatpush1.bf16.msra.mxu0 %v6705_v48 }
 0x37d   :  { %2544 = vmatprep.subr.bf16.mxu0 %v6715_v53 }
 0x37e   :  { %5500 = vmatpush3.bf16.msra.mxu1 %v5825_v38 }
 0x37f   :  { %5501 = vmatprep.subr.bf16.mxu1 %v6098_v2 }
 0x380   :  { %2545 = vmatpush1.bf16.msra.mxu0 %v6721_v55 }
 0x381   :  { %2546 = vmatprep.subr.bf16.mxu0 %v6731_v58 }
 0x382   :  { %5502 = vmatpush3.bf16.msra.mxu1 %v5826_v40 }
 0x383   :  { %5503 = vmatprep.subr.bf16.mxu1 %v6098_v2 }
 0x384   :  { %2547 = vmatpush1.bf16.msra.mxu0 %v6737_v59 }
 0x385   :  { %2817 = vmatprep.subr.bf16.mxu0 %v6747_v61 }
 0x386   :  { %5504 = vmatpush3.bf16.msra.mxu1 %v5827_v41 }
 0x387   :  { %5509 = vmatprep.subr.bf16.mxu1 %v6098_v2 }
 0x41a   :  { %v1996_v48 = vpop.f32.mrb[24].mxu0  ;;  %v2037_v53 = vpop.f32.mrb[24].mxu1 }
 0x41b   :  { %v2047_v55 = vadd.f32 %v4903_v45, %v1996_v48  ;;  %v1998_v58 = vpop.f32.mrb[25].mxu0  ;;  %v5467_v59 = vpop.f32.mrb[25].mxu1  ;;  %v2061_v29 = vadd.f32 %v7129_v13, %v2037_v53 }
 0x41c   :  { %v2000_v61 = vpop.f32.mrb[26].mxu0  ;;  %v2040_v0 = vpop.f32.mrb[26].mxu1  ;;  %v2054_v18 = vadd.f32 %v4904_v28, %v1998_v58 }
 0x41d   :  { %v4906_v10 = vmul.f32 -1.442695, %v2047_v55  ;;  %v2001_v15 = vpop.f32.mrb[27].mxu0  ;;  %v5468_v16 = vpop.f32.mrb[27].mxu1  ;;  %v5828_v0 = vld [vmem:[%s7854_s4 + $0x8] ss:$12 sps:$4 sm:$0xff]  }
 0x41e   :  { %v4907_v6 = vmul.f32 -1.442695, %v2054_v18  ;;  %v2076_v53 = vpop.permute.xlu0 %2075  ;;  %v7157_v16 = vld [vmem:[%s7860_s6] ss:$0 sm:$0xff] }
 0x41f   :  { %5992 = vpow2.f32 %v4906_v10 }
 0x420   :  { %5994 = vpow2.f32 %v4907_v6  ;;  %v4936_v6 = vld [vmem:[%s7858_s1 + $0x70] sm:$0xff] }
 0x429   :  { %v5993_v19 = vpop.eup %5992 }
 0x42a   :  { %v2051_v37 = vadd.f32 1.0, %v5993_v19  ;;  %v5995_v46 = vpop.eup %5994 }
 0x42b   :  { %v2058_v54 = vadd.f32 1.0, %v5995_v46  ;;  %v5830_v46 = vld [vmem:[%s7854_s4 + $0x38] ss:$12 sps:$4 sm:$0xff]  }
 0x42c   :  { %5996 = vrcp.f32 %v2051_v37 }
 0x436   :  { %v5997_v26 = vpop.eup %5996 }
 0x437   :  { %v2062_v47 = vmul.f32 %v5997_v26, %v2061_v29  ;;  %v2361_v26 = vpop.permute.xlu1 %2360 }
 0x439   :  { %v2063_v50 = vadd.f32 %v4905_v30, %v2062_v47 }
 0x43a   :  { %v2281_v56 = vpop.f32.mrb[28].mxu0  ;;  %v2322_v31 = vpop.f32.mrb[28].mxu1 }
 0x43b   :  { %5998 = vtanh.f32 %v2063_v50  ;;  %v2332_v34 = vadd.f32 %v4934_v22, %v2281_v56  ;;  %v2283_v42 = vpop.f32.mrb[29].mxu0  ;;  %v5487_v51 = vpop.f32.mrb[29].mxu1  ;;  %v2346_v28 = vadd.f32 %v7157_v16, %v2322_v31  ;;  %v7253_v22 = vld [vmem:[%s7853_s3 + $0x30] ss:$12 sps:$4 sm:$0xff]   ;;  %v5844_v50 = vld [vmem:[%s7853_s3 + $0x38] ss:$12 sps:$4 sm:$0xff]  }
 0x43c   :  { %v2285_v57 = vpop.f32.mrb[30].mxu0  ;;  %v2325_v62 = vpop.f32.mrb[30].mxu1  ;;  %6000 = vrcp.f32 %v2058_v54  ;;  %v2339_v27 = vadd.f32 %v4935_v25, %v2283_v42  ;;  %v7263_v54 = vld [vmem:[%s7853_s3 + $0x4c] ss:$12 sps:$4 sm:$0xff]   ;;  %v7269_v56 = vld [vmem:[%s7853_s3 + $0x48] ss:$12 sps:$4 sm:$0xff]  }
 0x43d   :  { %v4937_v63 = vmul.f32 -1.442695, %v2332_v34  ;;  %v2286_v1 = vpop.f32.mrb[31].mxu0  ;;  %v5488_v9 = vpop.f32.mrb[31].mxu1  ;;  %v5848_v31 = vld [vmem:[%s7853_s3 + $0x50] ss:$12 sps:$4 sm:$0xff]  }
 0x43e   :  { %v4938_v38 = vmul.f32 -1.442695, %v2339_v27  ;;  %v7279_v34 = vld [vmem:[%s7853_s3 + $0x64] ss:$12 sps:$4 sm:$0xff]   ;;  %v7285_v42 = vld [vmem:[%s7853_s3 + $0x60] ss:$12 sps:$4 sm:$0xff]  }
 0x43f   :  { %6002 = vpow2.f32 %v4937_v63  ;;  %v5852_v51 = vld [vmem:[%s7853_s3 + $0x68] ss:$12 sps:$4 sm:$0xff]   ;;  %v7301_v62 = vld [vmem:[%s7853_s3 + $0x78] ss:$12 sps:$4 sm:$0xff]   ;;  %v5856_v63 = vld [vmem:[%s7853_s3 + $0x80] ss:$12 sps:$4 sm:$0xff]  }
 0x440   :  { %6004 = vpow2.f32 %v4938_v38  ;;  %v7295_v57 = vld [vmem:[%s7853_s3 + $0x7c] ss:$12 sps:$4 sm:$0xff]   ;;  %v7311_v1 = vld [vmem:[%s7853_s3 + $0x94] ss:$12 sps:$4 sm:$0xff]   ;;  %v5860_v25 = vld [vmem:[%s7853_s3 + $0x98] ss:$12 sps:$4 sm:$0xff]  }
 0x441   :  { %v7317_v9 = vld [vmem:[%s7853_s3 + $0x90] ss:$12 sps:$4 sm:$0xff]   ;;  %v7327_v27 = vld [vmem:[%s7853_s3 + $0xac] ss:$12 sps:$4 sm:$0xff]   ;;  %v4965_v38 = vld [vmem:[%s7856_s0 + $0x60] sm:$0xff] }
 0x445   :  { %v5999_v5 = vpop.eup %5998 }
 0x446   :  { %v2065_v32 = vsub.f32 %v7000_v12, %v5999_v5  ;;  %v6001_v36 = vpop.eup %6000 }
 0x448   :  { %v2066_v40 = vmul.f32 %v6001_v36, %v2065_v32  ;;  %v5864_v32 = vld [vmem:[%s7853_s3 + $0xb0] ss:$12 sps:$4 sm:$0xff]  }
 0x449   :  { %v6003_v41 = vpop.eup %6002  ;;  %v7343_v36 = vld [vmem:[%s7854_s4 + $0x4] ss:$12 sps:$4 sm:$0xff]  }
 0x44a   :  { %v2067_v45 = vadd.f32 %v5999_v5, %v2066_v40  ;;  %v2336_v48 = vadd.f32 1.0, %v6003_v41  ;;  %v6005_v15 = vpop.eup %6004  ;;  %v7333_v5 = vld [vmem:[%s7853_s3 + $0xa8] ss:$12 sps:$4 sm:$0xff]  }
 0x44b   :  { %v2343_v37 = vadd.f32 1.0, %v6005_v15  ;;  %v4966_v15 = vld [vmem:[%s7856_s0 + $0x68] sm:$0xff] }
 0x44c   :  { %v2081_v55 = vmul.f32 %v2076_v53, %v2067_v45  ;;  %6006 = vrcp.f32 %v2336_v48  ;;  %v2072_v58 = vsub.f32 %v2067_v45, %v7000_v12 }
 0x44e   :  { %4909 = vst [vmem:[%s7859_s7 + $0x18] sm:$0xff] %v2081_v55  ;;  %v2078_v59 = vmul.f32 %v2076_v53, %v2072_v58 }
 0x450   :  { %v7147_v61 = vadd.f32 %v2078_v59, %v7000_v12  ;;  %v5829_v12 = vld [vmem:[%s7854_s4 + $0x20] ss:$12 sps:$4 sm:$0xff]  }
 0x452   :  { %v2371_v10 = vpack.c.bf16 %v7147_v61, %v7147_v61 }
 0x454   :  { %2565 = vmatmul.mubr.bf16.vlgmr.msra.gmra.mrb[32].mxu0 %v2371_v10  ;;  %5506 = vmatmul.mubr.bf16.vlgmr.msra.gmra.mrb[32].mxu1 %v2371_v10 }
 0x455   :  { %2818 = vmatpush1.bf16.msra.mxu0 %v6778_v7  ;;  %5510 = vmatpush3.bf16.msra.mxu1 %v5828_v0 }
 0x456   :  { %v6007_v18 = vpop.eup %6006  ;;  %2819 = vmatprep.subr.bf16.mxu0 %v6788_v11  ;;  %5511 = vmatprep.subr.bf16.mxu1 %v6098_v2  ;;  %v5831_v11 = vld [vmem:[%s7854_s4 + $0x50] ss:$12 sps:$4 sm:$0xff]  }
 0x457   :  { %v2347_v19 = vmul.f32 %v6007_v18, %v2346_v28  ;;  %2849 = vmatprep.mubr.bf16.mxu0 %v6099_v3  ;;  %5525 = vmatprep.mubr.msk.bf16.mxu1 %vm6100_vm0, %v6098_v2 }
 0x459   :  { %v2348_v7 = vadd.f32 %v4936_v6, %v2347_v19  ;;  %2820 = vmatpush1.bf16.msra.mxu0 %v6795_v14  ;;  %5512 = vmatpush3.bf16.msra.mxu1 %v5829_v12  ;;  %v5832_v14 = vld [vmem:[%s7854_s4 + $0x68] ss:$12 sps:$4 sm:$0xff]  }
 0x45a   :  { %2821 = vmatprep.subr.bf16.mxu0 %v6808_v17  ;;  %5513 = vmatprep.subr.bf16.mxu1 %v6098_v2 }
 0x45b   :  { %6008 = vtanh.f32 %v2348_v7 }
 0x45c   :  { %6010 = vrcp.f32 %v2343_v37 }
 0x45d   :  { %2822 = vmatpush1.bf16.msra.mxu0 %v6817_v20  ;;  %5514 = vmatpush3.bf16.msra.mxu1 %v5830_v46  ;;  %v5833_v20 = vld [vmem:[%s7854_s4 + $0x80] ss:$12 sps:$4 sm:$0xff]   ;;  %v4967_v46 = vld [vmem:[%s7856_s0 + $0x70] sm:$0xff] }
 0x45e   :  { %2823 = vmatprep.subr.bf16.mxu0 %v6827_v33  ;;  %5515 = vmatprep.subr.bf16.mxu1 %v6098_v2 }
 0x461   :  { %2824 = vmatpush1.bf16.msra.mxu0 %v6833_v35  ;;  %5516 = vmatpush3.bf16.msra.mxu1 %v5831_v11 }
 0x462   :  { %2825 = vmatprep.subr.bf16.mxu0 %v6843_v43  ;;  %5517 = vmatprep.subr.bf16.mxu1 %v6098_v2  ;;  %v5834_v43 = vld [vmem:[%s7854_s4 + $0x98] ss:$12 sps:$4 sm:$0xff]  }
 0x465   :  { %v6009_v17 = vpop.eup %6008  ;;  %2826 = vmatpush1.bf16.msra.mxu0 %v6849_v44  ;;  %5518 = vmatpush3.bf16.msra.mxu1 %v5832_v14  ;;  %v4996_v14 = vld [vmem:[%s7858_s1 + $0x48] sm:$0xff] }
 0x466   :  { %v2350_v33 = vsub.f32 %v7062_v8, %v6009_v17  ;;  %2827 = vmatprep.subr.bf16.mxu0 %v6859_v21  ;;  %5519 = vmatprep.subr.bf16.mxu1 %v6098_v2  ;;  %v6011_v35 = vpop.eup %6010 }
 0x468   :  { %v2351_v29 = vmul.f32 %v6011_v35, %v2350_v33 }
 0x469   :  { %2828 = vmatpush1.bf16.msra.mxu0 %v6865_v49  ;;  %5520 = vmatpush3.bf16.msra.mxu1 %v5833_v20  ;;  %v5835_v49 = vld [vmem:[%s7854_s4 + $0xb0] ss:$12 sps:$4 sm:$0xff]  }
 0x46a   :  { %v2352_v44 = vadd.f32 %v6009_v17, %v2351_v29  ;;  %2829 = vmatprep.subr.bf16.mxu0 %v6876_v52  ;;  %5521 = vmatprep.subr.bf16.mxu1 %v6098_v2 }
 0x46c   :  { %v2366_v30 = vmul.f32 %v2361_v26, %v2352_v44  ;;  %v2357_v21 = vsub.f32 %v2352_v44, %v7062_v8 }
 0x46d   :  { %2830 = vmatpush1.bf16.msra.mxu0 %v6882_v24  ;;  %5522 = vmatpush3.bf16.msra.mxu1 %v5834_v43 }
 0x46e   :  { %4940 = vst [vmem:[%s7861_s8 + $0x20] sm:$0xff] %v2366_v30  ;;  %2831 = vmatprep.subr.bf16.mxu0 %v6892_v39  ;;  %5523 = vmatprep.subr.bf16.mxu1 %v6098_v2  ;;  %v2363_v52 = vmul.f32 %v2361_v26, %v2357_v21  ;;  %v5836_v39 = vld [vmem:[%s7853_s3 + $0x8] ss:$12 sps:$4 sm:$0xff]  }
 0x470   :  { %v7214_v47 = vadd.f32 %v2363_v52, %v7062_v8  ;;  %v7247_v8 = vld [vmem:[%s7853_s3 + $0x34] ss:$12 sps:$4 sm:$0xff]  }
 0x471   :  { %2832 = vmatpush1.bf16.msra.mxu0 %v6899_v60  ;;  %5524 = vmatpush3.bf16.msra.mxu1 %v5835_v49  ;;  %v7231_v60 = vld [vmem:[%s7853_s3 + $0x1c] ss:$12 sps:$4 sm:$0xff]  }
 0x472   :  { %v2656_v24 = vpack.c.bf16 %v7214_v47, %v7214_v47  ;;  %3102 = vmatprep.subr.bf16.mxu0 %v6922_v23  ;;  %5529 = vmatprep.subr.bf16.mxu1 %v6098_v2  ;;  %v7237_v23 = vld [vmem:[%s7853_s3 + $0x18] ss:$12 sps:$4 sm:$0xff]  }
 0x474   :  { %2850 = vmatmul.mubr.bf16.vlgmr.msra.gmra.mrb[36].mxu0 %v2656_v24  ;;  %5526 = vmatmul.mubr.bf16.vlgmr.msra.gmra.mrb[36].mxu1 %v2656_v24  ;;  %v4997_v24 = vld [vmem:[%s7858_s1 + $0x50] sm:$0xff] }
 0x475   :  { %3103 = vmatpush1.bf16.msra.mxu0 %v6927_v4  ;;  %3134 = vmatprep.mubr.bf16.mxu0 %v6099_v3  ;;  %v5840_v4 = vld [vmem:[%s7853_s3 + $0x20] ss:$12 sps:$4 sm:$0xff]  }
 0x476   :  { %5545 = vmatprep.mubr.msk.bf16.mxu1 %vm6100_vm0, %v6098_v2  ;;  %5530 = vmatpush3.bf16.msra.mxu1 %v5836_v39 }
 0x477   :  { %5531 = vmatprep.subr.bf16.mxu1 %v6098_v2  ;;  %3104 = vmatprep.subr.bf16.mxu0 %v7231_v60 }
 0x479   :  { %3105 = vmatpush1.bf16.msra.mxu0 %v7237_v23 }
 0x47a   :  { %5532 = vmatpush3.bf16.msra.mxu1 %v5840_v4  ;;  %3106 = vmatprep.subr.bf16.mxu0 %v7247_v8 }
 0x47b   :  { %5533 = vmatprep.subr.bf16.mxu1 %v6098_v2 }
 0x47d   :  { %3107 = vmatpush1.bf16.msra.mxu0 %v7253_v22 }
 0x47e   :  { %5534 = vmatpush3.bf16.msra.mxu1 %v5844_v50  ;;  %3108 = vmatprep.subr.bf16.mxu0 %v7263_v54 }
 0x47f   :  { %5535 = vmatprep.subr.bf16.mxu1 %v6098_v2 }
 0x481   :  { %3109 = vmatpush1.bf16.msra.mxu0 %v7269_v56 }
 0x482   :  { %5536 = vmatpush3.bf16.msra.mxu1 %v5848_v31  ;;  %3110 = vmatprep.subr.bf16.mxu0 %v7279_v34 }
 0x483   :  { %5537 = vmatprep.subr.bf16.mxu1 %v6098_v2 }
 0x485   :  { %3111 = vmatpush1.bf16.msra.mxu0 %v7285_v42 }
 0x486   :  { %5538 = vmatpush3.bf16.msra.mxu1 %v5852_v51  ;;  %3112 = vmatprep.subr.bf16.mxu0 %v7295_v57 }
 0x487   :  { %5539 = vmatprep.subr.bf16.mxu1 %v6098_v2 }
 0x489   :  { %3113 = vmatpush1.bf16.msra.mxu0 %v7301_v62 }
 0x48a   :  { %5540 = vmatpush3.bf16.msra.mxu1 %v5856_v63  ;;  %3114 = vmatprep.subr.bf16.mxu0 %v7311_v1 }
 0x48b   :  { %5541 = vmatprep.subr.bf16.mxu1 %v6098_v2 }
 0x48d   :  { %3115 = vmatpush1.bf16.msra.mxu0 %v7317_v9 }
 0x48e   :  { %5542 = vmatpush3.bf16.msra.mxu1 %v5860_v25  ;;  %3116 = vmatprep.subr.bf16.mxu0 %v7327_v27 }
 0x48f   :  { %5543 = vmatprep.subr.bf16.mxu1 %v6098_v2 }
 0x491   :  { %3117 = vmatpush1.bf16.msra.mxu0 %v7333_v5 }
 0x492   :  { %5544 = vmatpush3.bf16.msra.mxu1 %v5864_v32  ;;  %3387 = vmatprep.subr.bf16.mxu0 %v7343_v36 }
 0x493   :  { %5549 = vmatprep.subr.bf16.mxu1 %v6098_v2 }
 0x527   :  { %v2566_v40 = vpop.f32.mrb[32].mxu0  ;;  %v2607_v41 = vpop.f32.mrb[32].mxu1 }
 0x528   :  { %v2617_v45 = vadd.f32 %v4965_v38, %v2566_v40  ;;  %v2568_v48 = vpop.f32.mrb[33].mxu0  ;;  %v5507_v53 = vpop.f32.mrb[33].mxu1  ;;  %v2631_v7 = vadd.f32 %v7129_v13, %v2607_v41 }
 0x529   :  { %v2570_v55 = vpop.f32.mrb[34].mxu0  ;;  %v2610_v58 = vpop.f32.mrb[34].mxu1  ;;  %v2624_v28 = vadd.f32 %v4966_v15, %v2568_v48  ;;  %v7391_v15 = vld [vmem:[%s7854_s4 + $0x18] ss:$12 sps:$4 sm:$0xff]  }
 0x52a   :  { %v4968_v59 = vmul.f32 -1.442695, %v2617_v45  ;;  %v2571_v0 = vpop.f32.mrb[35].mxu0  ;;  %v5508_v10 = vpop.f32.mrb[35].mxu1  ;;  %v7374_v55 = vld [vmem:[%s7854_s4] ss:$12 sps:$4 sm:$0xff]  }
 0x52b   :  { %v4969_v12 = vmul.f32 -1.442695, %v2624_v28  ;;  %v2646_v40 = vpop.permute.xlu0 %2645  ;;  %v5868_v58 = vld [vmem:[%s7854_s4 + $0x8] ss:$12 sps:$4 sm:$0xff]   ;;  %v5872_v28 = vld [vmem:[%s7854_s4 + $0x20] ss:$12 sps:$4 sm:$0xff]  }
 0x52c   :  { %6012 = vpow2.f32 %v4968_v59  ;;  %v7384_v0 = vld [vmem:[%s7854_s4 + $0x1c] ss:$12 sps:$4 sm:$0xff]  }
 0x52d   :  { %6014 = vpow2.f32 %v4969_v12 }
 0x536   :  { %v6013_v18 = vpop.eup %6012 }
 0x537   :  { %v2621_v6 = vadd.f32 1.0, %v6013_v18  ;;  %v6015_v19 = vpop.eup %6014  ;;  %v4998_v18 = vld [vmem:[%s7858_s1 + $0x58] sm:$0xff] }
 0x538   :  { %v2628_v20 = vadd.f32 1.0, %v6015_v19 }
 0x539   :  { %6016 = vrcp.f32 %v2621_v6  ;;  %v7404_v6 = vld [vmem:[%s7854_s4 + $0x34] ss:$12 sps:$4 sm:$0xff]  }
 0x543   :  { %v6017_v37 = vpop.eup %6016 }
 0x544   :  { %v2632_v11 = vmul.f32 %v6017_v37, %v2631_v7 }
 0x546   :  { %v2633_v17 = vadd.f32 %v4967_v46, %v2632_v11  ;;  %v7413_v46 = vld [vmem:[%s7854_s4 + $0x30] ss:$12 sps:$4 sm:$0xff]   ;;  %v5876_v11 = vld [vmem:[%s7854_s4 + $0x38] ss:$12 sps:$4 sm:$0xff]  }
 0x547   :  { %v2851_v33 = vpop.f32.mrb[36].mxu0  ;;  %v2892_v35 = vpop.f32.mrb[36].mxu1 }
 0x548   :  { %6018 = vtanh.f32 %v2633_v17  ;;  %v2902_v29 = vadd.f32 %v4996_v14, %v2851_v33  ;;  %v2853_v43 = vpop.f32.mrb[37].mxu0  ;;  %v5527_v44 = vpop.f32.mrb[37].mxu1  ;;  %v2916_v10 = vadd.f32 %v7157_v16, %v2892_v35  ;;  %v7423_v14 = vld [vmem:[%s7854_s4 + $0x4c] ss:$12 sps:$4 sm:$0xff]   ;;  %v7429_v17 = vld [vmem:[%s7854_s4 + $0x48] ss:$12 sps:$4 sm:$0xff]  }
 0x549   :  { %v2855_v26 = vpop.f32.mrb[38].mxu0  ;;  %v2895_v30 = vpop.f32.mrb[38].mxu1  ;;  %6020 = vrcp.f32 %v2628_v20  ;;  %v2909_v39 = vadd.f32 %v4997_v24, %v2853_v43  ;;  %v5880_v20 = vld [vmem:[%s7854_s4 + $0x50] ss:$12 sps:$4 sm:$0xff]   ;;  %v7445_v35 = vld [vmem:[%s7854_s4 + $0x60] ss:$12 sps:$4 sm:$0xff]  }
 0x54a   :  { %v4999_v21 = vmul.f32 -1.442695, %v2902_v29  ;;  %v2856_v49 = vpop.f32.mrb[39].mxu0  ;;  %v5528_v52 = vpop.f32.mrb[39].mxu1  ;;  %v7439_v33 = vld [vmem:[%s7854_s4 + $0x64] ss:$12 sps:$4 sm:$0xff]  }
 0x54b   :  { %v5000_v51 = vmul.f32 -1.442695, %v2909_v39  ;;  %v5884_v29 = vld [vmem:[%s7854_s4 + $0x68] ss:$12 sps:$4 sm:$0xff]   ;;  %v7461_v26 = vld [vmem:[%s7854_s4 + $0x78] ss:$12 sps:$4 sm:$0xff]  }
 0x54c   :  { %6022 = vpow2.f32 %v4999_v21  ;;  %v7455_v43 = vld [vmem:[%s7854_s4 + $0x7c] ss:$12 sps:$4 sm:$0xff]   ;;  %v5888_v30 = vld [vmem:[%s7854_s4 + $0x80] ss:$12 sps:$4 sm:$0xff]  }
 0x54d   :  { %6024 = vpow2.f32 %v5000_v51  ;;  %v7472_v49 = vld [vmem:[%s7854_s4 + $0x94] ss:$12 sps:$4 sm:$0xff]   ;;  %v7478_v39 = vld [vmem:[%s7854_s4 + $0x90] ss:$12 sps:$4 sm:$0xff]   ;;  %v2931_v51 = vpop.permute.xlu1 %2930 }
 0x552   :  { %v6019_v4 = vpop.eup %6018 }
 0x553   :  { %v2635_v50 = vsub.f32 %v7147_v61, %v6019_v4  ;;  %v6021_v31 = vpop.eup %6020 }
 0x555   :  { %v2636_v63 = vmul.f32 %v6021_v31, %v2635_v50  ;;  %v7488_v31 = vld [vmem:[%s7854_s4 + $0xac] ss:$12 sps:$4 sm:$0xff]  }
 0x556   :  { %v6023_v25 = vpop.eup %6022 }
 0x557   :  { %v2637_v32 = vadd.f32 %v6019_v4, %v2636_v63  ;;  %v2906_v38 = vadd.f32 1.0, %v6023_v25  ;;  %v5892_v4 = vld [vmem:[%s7854_s4 + $0x98] ss:$12 sps:$4 sm:$0xff]  }
 0x559   :  { %v2651_v41 = vmul.f32 %v2646_v40, %v2637_v32  ;;  %6026 = vrcp.f32 %v2906_v38  ;;  %v2642_v45 = vsub.f32 %v2637_v32, %v7147_v61  ;;  %v7495_v32 = vld [vmem:[%s7854_s4 + $0xa8] ss:$12 sps:$4 sm:$0xff]   ;;  %v5896_v38 = vld [vmem:[%s7854_s4 + $0xb0] ss:$12 sps:$4 sm:$0xff]  }
 0x55b   :  { %4971 = vst [vmem:[%s7859_s7 + $0x20] sm:$0xff] %v2651_v41  ;;  %v2648_v48 = vmul.f32 %v2646_v40, %v2642_v45 }
 0x55d   :  { %v7369_v53 = vadd.f32 %v2648_v48, %v7147_v61  ;;  %v6025_v61 = vpop.eup %6024  ;;  %v7523_v48 = vld [vmem:[%s7853_s3] ss:$12 sps:$4 sm:$0xff]  }
 0x55e   :  { %v2913_v37 = vadd.f32 1.0, %v6025_v61  ;;  %v5902_v61 = vld [vmem:[%s7853_s3 + $0x38] ss:$12 sps:$4 sm:$0xff]  }
 0x55f   :  { %v2941_v59 = vpack.c.bf16 %v7369_v53, %v7369_v53 }
 0x561   :  { %3135 = vmatmul.mubr.bf16.vlgmr.msra.gmra.mrb[40].mxu0 %v2941_v59  ;;  %5546 = vmatmul.mubr.bf16.vlgmr.msra.gmra.mrb[40].mxu1 %v2941_v59  ;;  %v5901_v59 = vld [vmem:[%s7853_s3 + $0x20] ss:$12 sps:$4 sm:$0xff]  }
 0x562   :  { %3388 = vmatpush1.bf16.msra.mxu0 %v7374_v55  ;;  %5550 = vmatpush3.bf16.msra.mxu1 %v5868_v58  ;;  %v5900_v58 = vld [vmem:[%s7853_s3 + $0x8] ss:$12 sps:$4 sm:$0xff]  }
 0x563   :  { %v6027_v12 = vpop.eup %6026  ;;  %3389 = vmatprep.subr.bf16.mxu0 %v7384_v0  ;;  %5551 = vmatprep.subr.bf16.mxu1 %v6098_v2 }
 0x564   :  { %v2917_v19 = vmul.f32 %v6027_v12, %v2916_v10  ;;  %3419 = vmatprep.mubr.bf16.mxu0 %v6099_v3  ;;  %5565 = vmatprep.mubr.msk.bf16.mxu1 %vm6100_vm0, %v6098_v2  ;;  %v5903_v10 = vld [vmem:[%s7853_s3 + $0x50] ss:$12 sps:$4 sm:$0xff]   ;;  %v5905_v12 = vld [vmem:[%s7853_s3 + $0x80] ss:$12 sps:$4 sm:$0xff]  }
 0x566   :  { %v2918_v7 = vadd.f32 %v4998_v18, %v2917_v19  ;;  %3390 = vmatpush1.bf16.msra.mxu0 %v7391_v15  ;;  %5552 = vmatpush3.bf16.msra.mxu1 %v5872_v28  ;;  %v5904_v28 = vld [vmem:[%s7853_s3 + $0x68] ss:$12 sps:$4 sm:$0xff]   ;;  %v5906_v18 = vld [vmem:[%s7853_s3 + $0x98] ss:$12 sps:$4 sm:$0xff]   ;;  %v5907_v19 = vld [vmem:[%s7853_s3 + $0xb0] ss:$12 sps:$4 sm:$0xff]  }
 0x567   :  { %3391 = vmatprep.subr.bf16.mxu0 %v7404_v6  ;;  %5553 = vmatprep.subr.bf16.mxu1 %v6098_v2 }
 0x568   :  { %6028 = vtanh.f32 %v2918_v7  ;;  %v5027_v7 = vld [vmem:[%s7856_s0 + $0x78] sm:$0xff] }
 0x569   :  { %6030 = vrcp.f32 %v2913_v37 }
 0x56a   :  { %3392 = vmatpush1.bf16.msra.mxu0 %v7413_v46  ;;  %5554 = vmatpush3.bf16.msra.mxu1 %v5876_v11 }
 0x56b   :  { %3393 = vmatprep.subr.bf16.mxu0 %v7423_v14  ;;  %5555 = vmatprep.subr.bf16.mxu1 %v6098_v2 }
 0x56e   :  { %3394 = vmatpush1.bf16.msra.mxu0 %v7429_v17  ;;  %5556 = vmatpush3.bf16.msra.mxu1 %v5880_v20 }
 0x56f   :  { %3395 = vmatprep.subr.bf16.mxu0 %v7439_v33  ;;  %5557 = vmatprep.subr.bf16.mxu1 %v6098_v2 }
 0x572   :  { %v6029_v44 = vpop.eup %6028  ;;  %3396 = vmatpush1.bf16.msra.mxu0 %v7445_v35  ;;  %5558 = vmatpush3.bf16.msra.mxu1 %v5884_v29 }
 0x573   :  { %v2920_v21 = vsub.f32 %v7214_v47, %v6029_v44  ;;  %3397 = vmatprep.subr.bf16.mxu0 %v7455_v43  ;;  %5559 = vmatprep.subr.bf16.mxu1 %v6098_v2  ;;  %v6031_v52 = vpop.eup %6030 }
 0x575   :  { %v2921_v24 = vmul.f32 %v6031_v52, %v2920_v21 }
 0x576   :  { %3398 = vmatpush1.bf16.msra.mxu0 %v7461_v26  ;;  %5560 = vmatpush3.bf16.msra.mxu1 %v5888_v30 }
 0x577   :  { %v2922_v50 = vadd.f32 %v6029_v44, %v2921_v24  ;;  %3399 = vmatprep.subr.bf16.mxu0 %v7472_v49  ;;  %5561 = vmatprep.subr.bf16.mxu1 %v6098_v2 }
 0x579   :  { %v2936_v63 = vmul.f32 %v2931_v51, %v2922_v50  ;;  %v2927_v25 = vsub.f32 %v2922_v50, %v7214_v47  ;;  %v5028_v50 = vld [vmem:[%s7856_s0 + $0x80] sm:$0xff] }
 0x57a   :  { %3400 = vmatpush1.bf16.msra.mxu0 %v7478_v39  ;;  %5562 = vmatpush3.bf16.msra.mxu1 %v5892_v4 }
 0x57b   :  { %5002 = vst [vmem:[%s7861_s8 + $0x18] sm:$0xff] %v2936_v63  ;;  %3401 = vmatprep.subr.bf16.mxu0 %v7488_v31  ;;  %5563 = vmatprep.subr.bf16.mxu1 %v6098_v2  ;;  %v2933_v40 = vmul.f32 %v2931_v51, %v2927_v25 }
 0x57d   :  { %v7506_v41 = vadd.f32 %v2933_v40, %v7214_v47  ;;  %v7518_v47 = vld [vmem:[%s7853_s3 + $0x4] ss:$12 sps:$4 sm:$0xff]  }
 0x57e   :  { %3402 = vmatpush1.bf16.msra.mxu0 %v7495_v32  ;;  %5564 = vmatpush3.bf16.msra.mxu1 %v5896_v38 }
 0x57f   :  { %v3226_v45 = vpack.c.bf16 %v7506_v41, %v7506_v41  ;;  %5569 = vmatprep.subr.bf16.mxu1 %v6098_v2  ;;  %3672 = vmatprep.subr.bf16.mxu0 %v7518_v47 }
 0x581   :  { %3420 = vmatmul.mubr.bf16.vlgmr.msra.gmra.mrb[44].mxu0 %v3226_v45  ;;  %5566 = vmatmul.mubr.bf16.vlgmr.msra.gmra.mrb[44].mxu1 %v3226_v45 }
 0x582   :  { %3704 = vmatprep.mubr.bf16.mxu0 %v6099_v3  ;;  %5585 = vmatprep.mubr.msk.bf16.mxu1 %vm6100_vm0, %v6098_v2 }
 0x583   :  { %3673 = vmatpush1.bf16.msra.mxu0 %v7523_v48  ;;  %5570 = vmatpush3.bf16.msra.mxu1 %v5900_v58 }
 0x584   :  { %3674 = vmatprep.subr.bf16.mxu0 %v7231_v60  ;;  %5571 = vmatprep.subr.bf16.mxu1 %v6098_v2 }
 0x587   :  { %3675 = vmatpush1.bf16.msra.mxu0 %v7237_v23  ;;  %5572 = vmatpush3.bf16.msra.mxu1 %v5901_v59  ;;  %v5029_v59 = vld [vmem:[%s7856_s0 + $0x88] sm:$0xff] }
 0x588   :  { %3676 = vmatprep.subr.bf16.mxu0 %v7247_v8  ;;  %5573 = vmatprep.subr.bf16.mxu1 %v6098_v2 }
 0x58b   :  { %3677 = vmatpush1.bf16.msra.mxu0 %v7253_v22  ;;  %5574 = vmatpush3.bf16.msra.mxu1 %v5902_v61 }
 0x58c   :  { %3678 = vmatprep.subr.bf16.mxu0 %v7263_v54  ;;  %5575 = vmatprep.subr.bf16.mxu1 %v6098_v2 }
 0x58f   :  { %3679 = vmatpush1.bf16.msra.mxu0 %v7269_v56  ;;  %5576 = vmatpush3.bf16.msra.mxu1 %v5903_v10  ;;  %v5058_v10 = vld [vmem:[%s7858_s1 + $0x30] sm:$0xff] }
 0x590   :  { %3680 = vmatprep.subr.bf16.mxu0 %v7279_v34  ;;  %5577 = vmatprep.subr.bf16.mxu1 %v6098_v2 }
 0x593   :  { %3681 = vmatpush1.bf16.msra.mxu0 %v7285_v42  ;;  %5578 = vmatpush3.bf16.msra.mxu1 %v5904_v28 }
 0x594   :  { %3682 = vmatprep.subr.bf16.mxu0 %v7295_v57  ;;  %5579 = vmatprep.subr.bf16.mxu1 %v6098_v2 }
 0x597   :  { %3683 = vmatpush1.bf16.msra.mxu0 %v7301_v62  ;;  %5580 = vmatpush3.bf16.msra.mxu1 %v5905_v12 }
 0x598   :  { %3684 = vmatprep.subr.bf16.mxu0 %v7311_v1  ;;  %5581 = vmatprep.subr.bf16.mxu1 %v6098_v2 }
 0x59b   :  { %3685 = vmatpush1.bf16.msra.mxu0 %v7317_v9  ;;  %5582 = vmatpush3.bf16.msra.mxu1 %v5906_v18 }
 0x59c   :  { %3686 = vmatprep.subr.bf16.mxu0 %v7327_v27  ;;  %5583 = vmatprep.subr.bf16.mxu1 %v6098_v2 }
 0x59f   :  { %3687 = vmatpush1.bf16.msra.mxu0 %v7333_v5  ;;  %5584 = vmatpush3.bf16.msra.mxu1 %v5907_v19 }
 0x5a0   :  { %3957 = vmatprep.subr.bf16.mxu0 %v7343_v36  ;;  %5589 = vmatprep.subr.bf16.mxu1 %v6098_v2 }
 0x634   :  { %v3136_v37 = vpop.f32.mrb[40].mxu0  ;;  %v3177_v11 = vpop.f32.mrb[40].mxu1 }
 0x635   :  { %v3187_v20 = vadd.f32 %v5027_v7, %v3136_v37  ;;  %v3138_v29 = vpop.f32.mrb[41].mxu0  ;;  %v5547_v44 = vpop.f32.mrb[41].mxu1  ;;  %v3201_v45 = vadd.f32 %v7129_v13, %v3177_v11 }
 0x636   :  { %v3140_v30 = vpop.f32.mrb[42].mxu0  ;;  %v3180_v21 = vpop.f32.mrb[42].mxu1  ;;  %v3194_v51 = vadd.f32 %v5028_v50, %v3138_v29 }
 0x637   :  { %v5030_v52 = vmul.f32 -1.442695, %v3187_v20  ;;  %v3141_v24 = vpop.f32.mrb[43].mxu0  ;;  %v5548_v4 = vpop.f32.mrb[43].mxu1  ;;  %v5059_v21 = vld [vmem:[%s7858_s1 + $0x38] sm:$0xff] }
 0x638   :  { %v5031_v63 = vmul.f32 -1.442695, %v3194_v51 }
 0x639   :  { %6032 = vpow2.f32 %v5030_v52 }
 0x63a   :  { %6034 = vpow2.f32 %v5031_v63 }
 0x643   :  { %v6033_v25 = vpop.eup %6032 }
 0x644   :  { %v3191_v38 = vadd.f32 1.0, %v6033_v25  ;;  %v6035_v40 = vpop.eup %6034 }
 0x645   :  { %v3198_v12 = vadd.f32 1.0, %v6035_v40 }
 0x646   :  { %6036 = vrcp.f32 %v3191_v38 }
 0x650   :  { %v6037_v58 = vpop.eup %6036 }
 0x651   :  { %v3202_v61 = vmul.f32 %v6037_v58, %v3201_v45  ;;  %v3216_v45 = vpop.permute.xlu0 %3215 }
 0x653   :  { %v3203_v28 = vadd.f32 %v5029_v59, %v3202_v61 }
 0x654   :  { %v3421_v18 = vpop.f32.mrb[44].mxu0  ;;  %v3462_v19 = vpop.f32.mrb[44].mxu1 }
 0x655   :  { %6038 = vtanh.f32 %v3203_v28  ;;  %v3472_v7 = vadd.f32 %v5058_v10, %v3421_v18  ;;  %v3423_v37 = vpop.f32.mrb[45].mxu0  ;;  %v5567_v20 = vpop.f32.mrb[45].mxu1  ;;  %v5908_v28 = vld [vmem:[%s7854_s4 + $0x8] ss:$12 sps:$4 sm:$0xff]  }
 0x656   :  { %v3425_v29 = vpop.f32.mrb[46].mxu0  ;;  %v3465_v13 = vpop.f32.mrb[46].mxu1  ;;  %6040 = vrcp.f32 %v3198_v12  ;;  %v3479_v52 = vadd.f32 %v5059_v21, %v3423_v37  ;;  %v5060_v20 = vld [vmem:[%s7858_s1 + $0x40] sm:$0xff] }
 0x657   :  { %v5061_v11 = vmul.f32 -1.442695, %v3472_v7  ;;  %v3426_v44 = vpop.f32.mrb[47].mxu0  ;;  %v5568_v30 = vpop.f32.mrb[47].mxu1  ;;  %v3486_v7 = vadd.f32 %v7157_v16, %v3462_v19  ;;  %v5910_v13 = vld [vmem:[%s7854_s4 + $0x38] ss:$12 sps:$4 sm:$0xff]  }
 0x658   :  { %v5062_v51 = vmul.f32 -1.442695, %v3479_v52  ;;  %v5912_v44 = vld [vmem:[%s7854_s4 + $0x68] ss:$12 sps:$4 sm:$0xff]   ;;  %v5913_v21 = vld [vmem:[%s7854_s4 + $0x80] ss:$12 sps:$4 sm:$0xff]  }
 0x659   :  { %6042 = vpow2.f32 %v5061_v11  ;;  %v5911_v11 = vld [vmem:[%s7854_s4 + $0x50] ss:$12 sps:$4 sm:$0xff]  }
 0x65a   :  { %6044 = vpow2.f32 %v5062_v51 }
 0x65f   :  { %v6039_v24 = vpop.eup %6038 }
 0x660   :  { %v3205_v4 = vsub.f32 %v7369_v53, %v6039_v24  ;;  %v6041_v50 = vpop.eup %6040 }
 0x662   :  { %v3206_v63 = vmul.f32 %v6041_v50, %v3205_v4  ;;  %v5914_v50 = vld [vmem:[%s7854_s4 + $0x98] ss:$12 sps:$4 sm:$0xff]  }
 0x663   :  { %v6043_v25 = vpop.eup %6042 }
 0x664   :  { %v3207_v38 = vadd.f32 %v6039_v24, %v3206_v63  ;;  %v3476_v40 = vadd.f32 1.0, %v6043_v25  ;;  %v6045_v18 = vpop.eup %6044  ;;  %v3501_v63 = vpop.permute.xlu1 %3500 }
 0x665   :  { %v3483_v19 = vadd.f32 1.0, %v6045_v18 }
 0x666   :  { %v3221_v58 = vmul.f32 %v3216_v45, %v3207_v38  ;;  %6046 = vrcp.f32 %v3476_v40  ;;  %v3212_v59 = vsub.f32 %v3207_v38, %v7369_v53  ;;  %v5915_v40 = vld [vmem:[%s7854_s4 + $0xb0] ss:$12 sps:$4 sm:$0xff]  }
 0x668   :  { %5033 = vst [vmem:[%s7859_s7 + $0x28] sm:$0xff] %v3221_v58  ;;  %v3218_v61 = vmul.f32 %v3216_v45, %v3212_v59 }
 0x66a   :  { %v7596_v10 = vadd.f32 %v3218_v61, %v7369_v53  ;;  %v5909_v53 = vld [vmem:[%s7854_s4 + $0x20] ss:$12 sps:$4 sm:$0xff]  }
 0x66c   :  { %v3511_v12 = vpack.c.bf16 %v7596_v10, %v7596_v10 }
 0x66e   :  { %3705 = vmatmul.mubr.bf16.vlgmr.msra.gmra.mrb[48].mxu0 %v3511_v12  ;;  %5586 = vmatmul.mubr.bf16.vlgmr.msra.gmra.mrb[48].mxu1 %v3511_v12 }
 0x66f   :  { %3958 = vmatpush1.bf16.msra.mxu0 %v7374_v55  ;;  %5590 = vmatpush3.bf16.msra.mxu1 %v5908_v28  ;;  %v5090_v28 = vld [vmem:[%s7856_s0 + $0x98] sm:$0xff] }
 0x670   :  { %v6047_v37 = vpop.eup %6046  ;;  %3959 = vmatprep.subr.bf16.mxu0 %v7384_v0  ;;  %5591 = vmatprep.subr.bf16.mxu1 %v6098_v2 }
 0x671   :  { %v3487_v29 = vmul.f32 %v6047_v37, %v3486_v7  ;;  %3989 = vmatprep.mubr.bf16.mxu0 %v6099_v3  ;;  %5605 = vmatprep.mubr.msk.bf16.mxu1 %vm6100_vm0, %v6098_v2 }
 0x673   :  { %v3488_v16 = vadd.f32 %v5060_v20, %v3487_v29  ;;  %3960 = vmatpush1.bf16.msra.mxu0 %v7391_v15  ;;  %5592 = vmatpush3.bf16.msra.mxu1 %v5909_v53  ;;  %v7725_v20 = vld [vmem:[%s7857_s5] ss:$0 sm:$0xff] }
 0x674   :  { %3961 = vmatprep.subr.bf16.mxu0 %v7404_v6  ;;  %5593 = vmatprep.subr.bf16.mxu1 %v6098_v2 }
 0x675   :  { %6048 = vtanh.f32 %v3488_v16 }
 0x676   :  { %6050 = vrcp.f32 %v3483_v19  ;;  %v5091_v19 = vld [vmem:[%s7856_s0 + $0xa0] sm:$0xff] }
 0x677   :  { %3962 = vmatpush1.bf16.msra.mxu0 %v7413_v46  ;;  %5594 = vmatpush3.bf16.msra.mxu1 %v5910_v13 }
 0x678   :  { %3963 = vmatprep.subr.bf16.mxu0 %v7423_v14  ;;  %5595 = vmatprep.subr.bf16.mxu1 %v6098_v2 }
 0x67b   :  { %3964 = vmatpush1.bf16.msra.mxu0 %v7429_v17  ;;  %5596 = vmatpush3.bf16.msra.mxu1 %v5911_v11  ;;  %v5120_v11 = vld [vmem:[%s7858_s1 + $0x18] sm:$0xff] }
 0x67c   :  { %3965 = vmatprep.subr.bf16.mxu0 %v7439_v33  ;;  %5597 = vmatprep.subr.bf16.mxu1 %v6098_v2 }
 0x67f   :  { %v6049_v30 = vpop.eup %6048  ;;  %3966 = vmatpush1.bf16.msra.mxu0 %v7445_v35  ;;  %5598 = vmatpush3.bf16.msra.mxu1 %v5912_v44 }
 0x680   :  { %v3490_v52 = vsub.f32 %v7506_v41, %v6049_v30  ;;  %3967 = vmatprep.subr.bf16.mxu0 %v7455_v43  ;;  %5599 = vmatprep.subr.bf16.mxu1 %v6098_v2  ;;  %v6051_v24 = vpop.eup %6050 }
 0x682   :  { %v3491_v4 = vmul.f32 %v6051_v24, %v3490_v52 }
 0x683   :  { %3968 = vmatpush1.bf16.msra.mxu0 %v7461_v26  ;;  %5600 = vmatpush3.bf16.msra.mxu1 %v5913_v21 }
 0x684   :  { %v3492_v51 = vadd.f32 %v6049_v30, %v3491_v4  ;;  %3969 = vmatprep.subr.bf16.mxu0 %v7472_v49  ;;  %5601 = vmatprep.subr.bf16.mxu1 %v6098_v2 }
 0x686   :  { %v3506_v25 = vmul.f32 %v3501_v63, %v3492_v51  ;;  %v3497_v38 = vsub.f32 %v3492_v51, %v7506_v41 }
 0x687   :  { %3970 = vmatpush1.bf16.msra.mxu0 %v7478_v39  ;;  %5602 = vmatpush3.bf16.msra.mxu1 %v5914_v50 }
 0x688   :  { %5064 = vst [vmem:[%s7861_s8 + $0x10] sm:$0xff] %v3506_v25  ;;  %3971 = vmatprep.subr.bf16.mxu0 %v7488_v31  ;;  %5603 = vmatprep.subr.bf16.mxu1 %v6098_v2  ;;  %v3503_v45 = vmul.f32 %v3501_v63, %v3497_v38 }
 0x68a   :  { %v7658_v58 = vadd.f32 %v3503_v45, %v7506_v41  ;;  %v5121_v45 = vld [vmem:[%s7858_s1 + $0x20] sm:$0xff] }
 0x68b   :  { %3972 = vmatpush1.bf16.msra.mxu0 %v7495_v32  ;;  %5604 = vmatpush3.bf16.msra.mxu1 %v5915_v40 }
 0x68c   :  { %v3796_v59 = vpack.c.bf16 %v7658_v58, %v7658_v58  ;;  %4242 = vmatprep.subr.bf16.mxu0 %v7518_v47  ;;  %5609 = vmatprep.subr.bf16.mxu1 %v6098_v2 }
 0x68e   :  { %3990 = vmatmul.mubr.bf16.vlgmr.msra.gmra.mrb[52].mxu0 %v3796_v59  ;;  %5606 = vmatmul.mubr.bf16.vlgmr.msra.gmra.mrb[52].mxu1 %v3796_v59 }
 0x68f   :  { %4243 = vmatpush1.bf16.msra.mxu0 %v7523_v48  ;;  %4274 = vmatprep.mubr.bf16.mxu0 %v6099_v3 }
 0x690   :  { %4244 = vmatprep.subr.bf16.mxu0 %v7231_v60  ;;  %5625 = vmatprep.mubr.msk.bf16.mxu1 %vm6100_vm0, %v6098_v2  ;;  %v5916_v60 = vld [vmem:[%s7853_s3 + $0x8] ss:$12 sps:$4 sm:$0xff]  }
 0x691   :  { %5610 = vmatpush3.bf16.msra.mxu1 %v5916_v60 }
 0x692   :  { %5611 = vmatprep.subr.bf16.mxu1 %v6098_v2 }
 0x693   :  { %4245 = vmatpush1.bf16.msra.mxu0 %v7237_v23  ;;  %v5917_v23 = vld [vmem:[%s7853_s3 + $0x20] ss:$12 sps:$4 sm:$0xff]  }
 0x694   :  { %4246 = vmatprep.subr.bf16.mxu0 %v7247_v8  ;;  %v5918_v8 = vld [vmem:[%s7853_s3 + $0x38] ss:$12 sps:$4 sm:$0xff]  }
 0x695   :  { %5612 = vmatpush3.bf16.msra.mxu1 %v5917_v23 }
 0x696   :  { %5613 = vmatprep.subr.bf16.mxu1 %v6098_v2 }
 0x697   :  { %4247 = vmatpush1.bf16.msra.mxu0 %v7253_v22  ;;  %v5919_v22 = vld [vmem:[%s7853_s3 + $0x50] ss:$12 sps:$4 sm:$0xff]  }
 0x698   :  { %4248 = vmatprep.subr.bf16.mxu0 %v7263_v54  ;;  %v5920_v54 = vld [vmem:[%s7853_s3 + $0x68] ss:$12 sps:$4 sm:$0xff]  }
 0x699   :  { %5614 = vmatpush3.bf16.msra.mxu1 %v5918_v8 }
 0x69a   :  { %5615 = vmatprep.subr.bf16.mxu1 %v6098_v2 }
 0x69b   :  { %4249 = vmatpush1.bf16.msra.mxu0 %v7269_v56  ;;  %v5921_v56 = vld [vmem:[%s7853_s3 + $0x80] ss:$12 sps:$4 sm:$0xff]  }
 0x69c   :  { %4250 = vmatprep.subr.bf16.mxu0 %v7279_v34  ;;  %v5922_v34 = vld [vmem:[%s7853_s3 + $0x98] ss:$12 sps:$4 sm:$0xff]  }
 0x69d   :  { %5616 = vmatpush3.bf16.msra.mxu1 %v5919_v22 }
 0x69e   :  { %5617 = vmatprep.subr.bf16.mxu1 %v6098_v2 }
 0x69f   :  { %4251 = vmatpush1.bf16.msra.mxu0 %v7285_v42  ;;  %v5923_v42 = vld [vmem:[%s7853_s3 + $0xb0] ss:$12 sps:$4 sm:$0xff]  }
 0x6a0   :  { %4252 = vmatprep.subr.bf16.mxu0 %v7295_v57  ;;  %v5089_v57 = vld [vmem:[%s7856_s0 + $0x90] sm:$0xff] }
 0x6a1   :  { %5618 = vmatpush3.bf16.msra.mxu1 %v5920_v54 }
 0x6a2   :  { %5619 = vmatprep.subr.bf16.mxu1 %v6098_v2 }
 0x6a3   :  { %4253 = vmatpush1.bf16.msra.mxu0 %v7301_v62 }
 0x6a4   :  { %4254 = vmatprep.subr.bf16.mxu0 %v7311_v1 }
 0x6a5   :  { %5620 = vmatpush3.bf16.msra.mxu1 %v5921_v56 }
 0x6a6   :  { %5621 = vmatprep.subr.bf16.mxu1 %v6098_v2 }
 0x6a7   :  { %4255 = vmatpush1.bf16.msra.mxu0 %v7317_v9 }
 0x6a8   :  { %4256 = vmatprep.subr.bf16.mxu0 %v7327_v27 }
 0x6a9   :  { %5622 = vmatpush3.bf16.msra.mxu1 %v5922_v34 }
 0x6aa   :  { %5623 = vmatprep.subr.bf16.mxu1 %v6098_v2 }
 0x6ab   :  { %4257 = vmatpush1.bf16.msra.mxu0 %v7333_v5 }
 0x6ac   :  { %4527 = vmatprep.subr.bf16.mxu0 %v7343_v36 }
 0x6ad   :  { %5624 = vmatpush3.bf16.msra.mxu1 %v5923_v42 }
 0x6ae   :  { %5629 = vmatprep.subr.bf16.mxu1 %v6098_v2 }
 0x741   :  { %v3706_v62 = vpop.f32.mrb[48].mxu0  ;;  %v3747_v1 = vpop.f32.mrb[48].mxu1 }
 0x742   :  { %v3757_v9 = vadd.f32 %v5089_v57, %v3706_v62  ;;  %v3708_v27 = vpop.f32.mrb[49].mxu0  ;;  %v5587_v5 = vpop.f32.mrb[49].mxu1  ;;  %v3771_v29 = vadd.f32 %v7725_v20, %v3747_v1 }
 0x743   :  { %v3710_v36 = vpop.f32.mrb[50].mxu0  ;;  %v3750_v41 = vpop.f32.mrb[50].mxu1  ;;  %v3764_v12 = vadd.f32 %v5090_v28, %v3708_v27  ;;  %v5924_v5 = vld [vmem:[%s7854_s4 + $0x8] ss:$12 sps:$4 sm:$0xff]  }
 0x744   :  { %v5092_v47 = vmul.f32 -1.442695, %v3757_v9  ;;  %v3711_v48 = vpop.f32.mrb[51].mxu0  ;;  %v5588_v61 = vpop.f32.mrb[51].mxu1  ;;  %v5122_v28 = vld [vmem:[%s7858_s1 + $0x28] sm:$0xff] }
 0x745   :  { %v5093_v18 = vmul.f32 -1.442695, %v3764_v12  ;;  %v3786_v57 = vpop.permute.xlu0 %3785 }
 0x746   :  { %6052 = vpow2.f32 %v5092_v47  ;;  %v7753_v47 = vld [vmem:[%s7860_s6] ss:$0 sm:$0xff] }
 0x747   :  { %6054 = vpow2.f32 %v5093_v18 }
 0x750   :  { %v6053_v7 = vpop.eup %6052 }
 0x751   :  { %v3761_v53 = vadd.f32 1.0, %v6053_v7  ;;  %v6055_v37 = vpop.eup %6054  ;;  %v5926_v7 = vld [vmem:[%s7854_s4 + $0x38] ss:$12 sps:$4 sm:$0xff]  }
 0x752   :  { %v3768_v30 = vadd.f32 1.0, %v6055_v37 }
 0x753   :  { %6056 = vrcp.f32 %v3761_v53  ;;  %v4071_v53 = vpop.permute.xlu1 %4070 }
 0x75d   :  { %v6057_v16 = vpop.eup %6056 }
 0x75e   :  { %v3772_v13 = vmul.f32 %v6057_v16, %v3771_v29  ;;  %v5151_v16 = vld [vmem:[%s7856_s0 + $0xa8] sm:$0xff] }
 0x760   :  { %v3773_v44 = vadd.f32 %v5091_v19, %v3772_v13 }
 0x761   :  { %v3991_v21 = vpop.f32.mrb[52].mxu0  ;;  %v4032_v52 = vpop.f32.mrb[52].mxu1 }
 0x762   :  { %6058 = vtanh.f32 %v3773_v44  ;;  %v4042_v24 = vadd.f32 %v5120_v11, %v3991_v21  ;;  %v3993_v4 = vpop.f32.mrb[53].mxu0  ;;  %v5607_v50 = vpop.f32.mrb[53].mxu1  ;;  %v4056_v48 = vadd.f32 %v7753_v47, %v4032_v52  ;;  %v5152_v52 = vld [vmem:[%s7856_s0 + $0xb0] sm:$0xff] }
 0x763   :  { %v3995_v51 = vpop.f32.mrb[54].mxu0  ;;  %v4035_v63 = vpop.f32.mrb[54].mxu1  ;;  %6060 = vrcp.f32 %v3768_v30  ;;  %v4049_v59 = vadd.f32 %v5121_v45, %v3993_v4 }
 0x764   :  { %v5123_v25 = vmul.f32 -1.442695, %v4042_v24  ;;  %v3996_v38 = vpop.f32.mrb[55].mxu0  ;;  %v5608_v40 = vpop.f32.mrb[55].mxu1 }
 0x765   :  { %v5124_v22 = vmul.f32 -1.442695, %v4049_v59  ;;  %v5153_v40 = vld [vmem:[%s7856_s0 + $0xb8] sm:$0xff]  ;;  %v4608_v59 = vld [vmem:[%s7858_s1] sm:$0xff] }
 0x766   :  { %6062 = vpow2.f32 %v5123_v25 }
 0x767   :  { %6064 = vpow2.f32 %v5124_v22 }
 0x76c   :  { %v6059_v60 = vpop.eup %6058 }
 0x76d   :  { %v3775_v23 = vsub.f32 %v7596_v10, %v6059_v60  ;;  %v6061_v8 = vpop.eup %6060 }
 0x76f   :  { %v3776_v54 = vmul.f32 %v6061_v8, %v3775_v23 }
 0x770   :  { %v6063_v56 = vpop.eup %6062 }
 0x771   :  { %v3777_v34 = vadd.f32 %v6059_v60, %v3776_v54  ;;  %v4046_v42 = vadd.f32 1.0, %v6063_v56  ;;  %v6065_v41 = vpop.eup %6064 }
 0x772   :  { %v4053_v18 = vadd.f32 1.0, %v6065_v41 }
 0x773   :  { %v3791_v62 = vmul.f32 %v3786_v57, %v3777_v34  ;;  %6066 = vrcp.f32 %v4046_v42  ;;  %v3782_v1 = vsub.f32 %v3777_v34, %v7596_v10 }
 0x775   :  { %5095 = vst [vmem:[%s7859_s7 + $0x30] sm:$0xff] %v3791_v62  ;;  %v3788_v9 = vmul.f32 %v3786_v57, %v3782_v1 }
 0x777   :  { %v7743_v27 = vadd.f32 %v3788_v9, %v7596_v10  ;;  %v5925_v10 = vld [vmem:[%s7854_s4 + $0x20] ss:$12 sps:$4 sm:$0xff]  }
 0x778   :  { %v4609_v9 = vld [vmem:[%s7858_s1 + $0x8] sm:$0xff] }
 0x779   :  { %v4081_v36 = vpack.c.bf16 %v7743_v27, %v7743_v27 }
 0x77b   :  { %4275 = vmatmul.mubr.bf16.vlgmr.msra.gmra.mrb[56].mxu0 %v4081_v36  ;;  %5626 = vmatmul.mubr.bf16.vlgmr.msra.gmra.mrb[56].mxu1 %v4081_v36 }
 0x77c   :  { %4528 = vmatpush1.bf16.msra.mxu0 %v7374_v55  ;;  %5630 = vmatpush3.bf16.msra.mxu1 %v5924_v5 }
 0x77d   :  { %v6067_v61 = vpop.eup %6066  ;;  %4529 = vmatprep.subr.bf16.mxu0 %v7384_v0  ;;  %5631 = vmatprep.subr.bf16.mxu1 %v6098_v2  ;;  %v5928_v0 = vld [vmem:[%s7854_s4 + $0x68] ss:$12 sps:$4 sm:$0xff]  }
 0x77e   :  { %v4057_v12 = vmul.f32 %v6067_v61, %v4056_v48  ;;  %4559 = vmatprep.mubr.bf16.mxu0 %v6099_v3  ;;  %5645 = vmatprep.mubr.msk.bf16.mxu1 %vm6100_vm0, %v6098_v2  ;;  %v5927_v3 = vld [vmem:[%s7854_s4 + $0x50] ss:$12 sps:$4 sm:$0xff]  }
 0x780   :  { %v4058_v55 = vadd.f32 %v5122_v28, %v4057_v12  ;;  %4530 = vmatpush1.bf16.msra.mxu0 %v7391_v15  ;;  %5632 = vmatpush3.bf16.msra.mxu1 %v5925_v10  ;;  %v5657_v10 = vpop.permute.xlu0 %5656 }
 0x781   :  { %4531 = vmatprep.subr.bf16.mxu0 %v7404_v6  ;;  %5633 = vmatprep.subr.bf16.mxu1 %v6098_v2  ;;  %v5929_v6 = vld [vmem:[%s7854_s4 + $0x80] ss:$12 sps:$4 sm:$0xff]  }
 0x782   :  { %6068 = vtanh.f32 %v4058_v55  ;;  %v5658_v55 = vunpack.i.l.bf16 %v5657_v10 }
 0x783   :  { %6070 = vrcp.f32 %v4053_v18 }
 0x784   :  { %4532 = vmatpush1.bf16.msra.mxu0 %v7413_v46  ;;  %5634 = vmatpush3.bf16.msra.mxu1 %v5926_v7 }
 0x785   :  { %4533 = vmatprep.subr.bf16.mxu0 %v7423_v14  ;;  %5635 = vmatprep.subr.bf16.mxu1 %v6098_v2 }
 0x788   :  { %4534 = vmatpush1.bf16.msra.mxu0 %v7429_v17  ;;  %5636 = vmatpush3.bf16.msra.mxu1 %v5927_v3 }
 0x789   :  { %4535 = vmatprep.subr.bf16.mxu0 %v7439_v33  ;;  %5637 = vmatprep.subr.bf16.mxu1 %v6098_v2  ;;  %v5930_v33 = vld [vmem:[%s7854_s4 + $0x98] ss:$12 sps:$4 sm:$0xff]  }
 0x78c   :  { %v6069_v15 = vpop.eup %6068  ;;  %4536 = vmatpush1.bf16.msra.mxu0 %v7445_v35  ;;  %5638 = vmatpush3.bf16.msra.mxu1 %v5928_v0 }
 0x78d   :  { %v4060_v46 = vsub.f32 %v7658_v58, %v6069_v15  ;;  %4537 = vmatprep.subr.bf16.mxu0 %v7455_v43  ;;  %5639 = vmatprep.subr.bf16.mxu1 %v6098_v2  ;;  %v6071_v14 = vpop.eup %6070 }
 0x78f   :  { %v4061_v17 = vmul.f32 %v6071_v14, %v4060_v46 }
 0x790   :  { %4538 = vmatpush1.bf16.msra.mxu0 %v7461_v26  ;;  %5640 = vmatpush3.bf16.msra.mxu1 %v5929_v6  ;;  %v5931_v26 = vld [vmem:[%s7854_s4 + $0xb0] ss:$12 sps:$4 sm:$0xff]  }
 0x791   :  { %v4062_v35 = vadd.f32 %v6069_v15, %v4061_v17  ;;  %4539 = vmatprep.subr.bf16.mxu0 %v7472_v49  ;;  %5641 = vmatprep.subr.bf16.mxu1 %v6098_v2 }
 0x793   :  { %v4076_v37 = vmul.f32 %v4071_v53, %v4062_v35  ;;  %v4067_v43 = vsub.f32 %v4062_v35, %v7658_v58 }
 0x794   :  { %4540 = vmatpush1.bf16.msra.mxu0 %v7478_v39  ;;  %5642 = vmatpush3.bf16.msra.mxu1 %v5930_v33  ;;  %v4610_v33 = vld [vmem:[%s7858_s1 + $0x10] sm:$0xff] }
 0x795   :  { %5126 = vst [vmem:[%s7861_s8 + $0x8] sm:$0xff] %v4076_v37  ;;  %4541 = vmatprep.subr.bf16.mxu0 %v7488_v31  ;;  %5643 = vmatprep.subr.bf16.mxu1 %v6098_v2  ;;  %v4073_v49 = vmul.f32 %v4071_v53, %v4067_v43 }
 0x797   :  { %v7810_v29 = vadd.f32 %v4073_v49, %v7658_v58 }
 0x798   :  { %4542 = vmatpush1.bf16.msra.mxu0 %v7495_v32  ;;  %5644 = vmatpush3.bf16.msra.mxu1 %v5931_v26 }
 0x799   :  { %v4366_v39 = vpack.c.bf16 %v7810_v29, %v7810_v29 }
 0x79b   :  { %4560 = vmatmul.mubr.bf16.vlgmr.msra.gmra.mrb[60].mxu0 %v4366_v39  ;;  %5646 = vmatmul.mubr.bf16.vlgmr.msra.gmra.mrb[60].mxu1 %v4366_v39  ;;  %v5659_v39 = vunpack.i.h.bf16 %v5657_v10 }
 0x84e   :  { %v4276_v19 = vpop.f32.mrb[56].mxu0  ;;  %v4317_v31 = vpop.f32.mrb[56].mxu1 }
 0x84f   :  { %v4327_v13 = vadd.f32 %v5151_v16, %v4276_v19  ;;  %v4278_v2 = vpop.f32.mrb[57].mxu0  ;;  %v5627_v11 = vpop.f32.mrb[57].mxu1  ;;  %v4341_v25 = vadd.f32 %v7725_v20, %v4317_v31 }
 0x850   :  { %v4280_v44 = vpop.f32.mrb[58].mxu0  ;;  %v4320_v58 = vpop.f32.mrb[58].mxu1  ;;  %v4334_v24 = vadd.f32 %v5152_v52, %v4278_v2 }
 0x851   :  { %v5154_v30 = vmul.f32 -1.442695, %v4327_v13  ;;  %v4281_v21 = vpop.f32.mrb[59].mxu0  ;;  %v5628_v32 = vpop.f32.mrb[59].mxu1 }
 0x852   :  { %v5155_v4 = vmul.f32 -1.442695, %v4334_v24 }
 0x853   :  { %6072 = vpow2.f32 %v5154_v30 }
 0x854   :  { %6074 = vpow2.f32 %v5155_v4 }
 0x85d   :  { %v6073_v50 = vpop.eup %6072 }
 0x85e   :  { %v4331_v51 = vadd.f32 1.0, %v6073_v50  ;;  %v6075_v63 = vpop.eup %6074 }
 0x85f   :  { %v4338_v23 = vadd.f32 1.0, %v6075_v63 }
 0x860   :  { %6076 = vrcp.f32 %v4331_v51 }
 0x86a   :  { %v6077_v38 = vpop.eup %6076 }
 0x86b   :  { %v4342_v45 = vmul.f32 %v6077_v38, %v4341_v25 }
 0x86d   :  { %v4343_v60 = vadd.f32 %v5153_v40, %v4342_v45 }
 0x86e   :  { %v4561_v8 = vpop.f32.mrb[60].mxu0  ;;  %v4602_v22 = vpop.f32.mrb[60].mxu1 }
 0x86f   :  { %6078 = vtanh.f32 %v4343_v60  ;;  %v4611_v54 = vadd.f32 %v4608_v59, %v4561_v8  ;;  %v4563_v56 = vpop.f32.mrb[61].mxu0  ;;  %v5647_v34 = vpop.f32.mrb[61].mxu1  ;;  %v4625_v14 = vadd.f32 %v7753_v47, %v4602_v22 }
 0x870   :  { %v4565_v42 = vpop.f32.mrb[62].mxu0  ;;  %v4605_v20 = vpop.f32.mrb[62].mxu1  ;;  %6080 = vrcp.f32 %v4338_v23  ;;  %v4618_v5 = vadd.f32 %v4609_v9, %v4563_v56 }
 0x871   :  { %v5182_v57 = vmul.f32 -1.442695, %v4611_v54  ;;  %v4566_v62 = vpop.f32.mrb[63].mxu0  ;;  %v5648_v1 = vpop.f32.mrb[63].mxu1 }
 0x872   :  { %v5183_v61 = vmul.f32 -1.442695, %v4618_v5 }
 0x873   :  { %6082 = vpow2.f32 %v5182_v57 }
 0x874   :  { %6084 = vpow2.f32 %v5183_v61 }
 0x879   :  { %v6079_v36 = vpop.eup %6078 }
 0x87a   :  { %v4345_v41 = vsub.f32 %v7743_v27, %v6079_v36  ;;  %v6081_v48 = vpop.eup %6080 }
 0x87c   :  { %v4346_v28 = vmul.f32 %v6081_v48, %v4345_v41 }
 0x87d   :  { %v6083_v12 = vpop.eup %6082 }
 0x87e   :  { %v4347_v18 = vadd.f32 %v6079_v36, %v4346_v28  ;;  %v4615_v7 = vadd.f32 1.0, %v6083_v12  ;;  %v6085_v46 = vpop.eup %6084 }
 0x87f   :  { %v4622_v37 = vadd.f32 1.0, %v6085_v46 }
 0x880   :  { %v4352_v3 = vsub.f32 %v4347_v18, %v7743_v27  ;;  %v4361_v0 = vmul.f32 %v5658_v55, %v4347_v18  ;;  %6086 = vrcp.f32 %v4615_v7 }
 0x882   :  { %v4358_v15 = vmul.f32 %v5658_v55, %v4352_v3  ;;  %5157 = vst [vmem:[%s7859_s7 + $0x38] sm:$0xff] %v4361_v0 }
 0x884   :  { %v4359_v6 = vadd.f32 %v4358_v15, %v7743_v27 }
 0x886   :  { %4648 = vst [vmem:[%s7862_s9] sm:$0xff] %v4359_v6 }
 0x88a   :  { %v6087_v17 = vpop.eup %6086 }
 0x88b   :  { %v4626_v35 = vmul.f32 %v6087_v17, %v4625_v14 }
 0x88d   :  { %v4627_v53 = vadd.f32 %v4626_v35, %v4610_v33 }
 0x88f   :  { %6088 = vtanh.f32 %v4627_v53 }
 0x890   :  { %6090 = vrcp.f32 %v4622_v37 }
 0x899   :  { %v6089_v43 = vpop.eup %6088 }
 0x89a   :  { %v4629_v27 = vsub.f32 %v7810_v29, %v6089_v43  ;;  %v6091_v26 = vpop.eup %6090 }
 0x89c   :  { %v4630_v49 = vmul.f32 %v6091_v26, %v4629_v27 }
 0x89e   :  { %v4631_v16 = vadd.f32 %v6089_v43, %v4630_v49 }
 0x8a0   :  { %v4636_v19 = vsub.f32 %v4631_v16, %v7810_v29  ;;  %v4645_v47 = vmul.f32 %v5659_v39, %v4631_v16 }
 0x8a2   :  { %v4642_v31 = vmul.f32 %v5659_v39, %v4636_v19  ;;  %4646 = vst [vmem:[%s7861_s8] sm:$0xff] %v4645_v47 }
 0x8a4   :  { %v4643_v13 = vadd.f32 %v4642_v31, %v7810_v29 }
 0x8a6   :  { %4650 = vst [vmem:[%s7863_s10] sm:$0xff] %v4643_v13 }

</bundles_post_ra>
